<compile_context>
chip_gen: v7x
topology: tpu7x:2x2x1
jax: 0.10.0
libtpu: 0.0.40
codegen_flags: <defaults>
</compile_context>

<pallas_src>
import math

import jax
import jax.numpy as jnp
from jax.experimental import pallas as pl
from jax.experimental.pallas import tpu as pltpu

# ----------------------- config (RoBERTa-like, small) -----------------------
VOCAB = 128
HIDDEN = 64
N_LAYERS = 2
N_HEADS = 4
HEAD_DIM = HIDDEN // N_HEADS
INTERMEDIATE = 128
MAX_POS = 64
NUM_LABELS = 3
CLS_PAD = 128        # classifier output padded to a lane-dense 128-wide slab
PAD_ID = 1           # roberta padding_idx
LN_EPS = 1e-5


# ------------------------- in-kernel helper functions ------------------------
def _layer_norm(x, g, b):
    mean = jnp.mean(x, axis=-1, keepdims=True)
    xc = x - mean
    var = jnp.mean(xc * xc, axis=-1, keepdims=True)
    return xc * jax.lax.rsqrt(var + LN_EPS) * g + b


def _matmul_bias(x, w, b):
    # bf16 operands on the MXU, f32 accumulation; bias add in f32.
    y = jnp.dot(x.astype(jnp.bfloat16), w, preferred_element_type=jnp.float32)
    return y + b


def _gelu(x):
    return 0.5 * x * (1.0 + jax.lax.erf(x * (1.0 / math.sqrt(2.0))))


# ------------------------------ fused forward kernel -------------------------
def _fused_forward_kernel(
    emb_ref, mb_ref, emb_g_ref, emb_b_ref,
    qkv_w_ref, qkv_b_ref, o_w_ref, o_b_ref, ln1_g_ref, ln1_b_ref,
    ffn1_w_ref, ffn1_b_ref, ffn2_w_ref, ffn2_b_ref, ln2_g_ref, ln2_b_ref,
    cls_w_ref, cls_b_ref, out_ref,
):
    """RoBERTa token-classifier forward for one block of R = seqs_per_block*S rows."""
    # Embedding LayerNorm (plain LN, no fake residual).
    x = _layer_norm(emb_ref[...], emb_g_ref[...], emb_b_ref[...])     # (R, H) f32
    mb = mb_ref[0]                                                    # (R, R) additive bias

    for l in range(N_LAYERS):
        # ---- self-attention: one fused QKV matmul (scale folded into Wq/bq) ----
        qkv = _matmul_bias(x, qkv_w_ref[l], qkv_b_ref[l])             # (R, 3H) f32

        # Head-major stacks (N_HEADS, R, D): scores / softmax / ctx run once
        # over all heads (batched dot_general), with no k.T transposes.
        q = jnp.stack(
            [qkv[:, h * HEAD_DIM:(h + 1) * HEAD_DIM] for h in range(N_HEADS)], axis=0)
        k = jnp.stack(
            [qkv[:, HIDDEN + h * HEAD_DIM:HIDDEN + (h + 1) * HEAD_DIM]
             for h in range(N_HEADS)], axis=0)
        v = jnp.stack(
            [qkv[:, 2 * HIDDEN + h * HEAD_DIM:2 * HIDDEN + (h + 1) * HEAD_DIM]
             for h in range(N_HEADS)], axis=0)

        s = jnp.einsum('hqd,hkd->hqk', q, k,
                       preferred_element_type=jnp.float32) + mb       # (Hh, R, R)
        s = s - jnp.max(s, axis=-1, keepdims=True)
        p = jnp.exp(s)
        p = p * pl.reciprocal(jnp.sum(p, axis=-1, keepdims=True), approx=False)

        ctx = jnp.einsum('hqk,hkd->hqd', p, v,
                         preferred_element_type=jnp.float32)          # (Hh, R, D)

        # Heads concatenated on lanes -> single output-projection matmul + one bias add.
        ctx_cat = jnp.concatenate([ctx[h] for h in range(N_HEADS)], axis=-1)  # (R, H)
        attn_out = _matmul_bias(ctx_cat, o_w_ref[l], o_b_ref[l])

        x = _layer_norm(attn_out + x, ln1_g_ref[l], ln1_b_ref[l])     # post-LN residual

        # ---- feed-forward ----
        hmid = _gelu(_matmul_bias(x, ffn1_w_ref[l], ffn1_b_ref[l]))   # (R, I)
        ffn_out = _matmul_bias(hmid, ffn2_w_ref[l], ffn2_b_ref[l])    # (R, H)
        x = _layer_norm(ffn_out + x, ln2_g_ref[l], ln2_b_ref[l])

    # ---- token-classification head, lane-dense (128-wide, zero-padded) ----
    out_ref[...] = _matmul_bias(x, cls_w_ref[...], cls_b_ref[...]).astype(out_ref.dtype)


# ----------------------------- parameter setup -------------------------------
def init_params(key):
    std = 0.02
    scale = 1.0 / math.sqrt(HEAD_DIM)   # 0.25 — exactly representable

    def normal(k, shape):
        return std * jax.random.normal(k, shape, jnp.float32)

    keys = iter(jax.random.split(key, 16))

    qkv_w = normal(next(keys), (N_LAYERS, HIDDEN, 3 * HIDDEN))
    qkv_b = jnp.zeros((N_LAYERS, 1, 3 * HIDDEN), jnp.float32)
    # Fold 1/sqrt(HEAD_DIM) into the Q columns (offline weight preprocessing),
    # so the kernel does no per-element score scaling.
    qkv_w = qkv_w.at[:, :, :HIDDEN].multiply(scale)
    qkv_b = qkv_b.at[:, :, :HIDDEN].multiply(scale)

    cls_w = jnp.zeros((HIDDEN, CLS_PAD), jnp.float32)
    cls_w = cls_w.at[:, :NUM_LABELS].set(normal(next(keys), (HIDDEN, NUM_LABELS)))

    params = {
        "word_emb": normal(next(keys), (VOCAB, HIDDEN)),
        "pos_emb": normal(next(keys), (MAX_POS, HIDDEN)),
        "type_emb": normal(next(keys), (1, HIDDEN)),
        "emb_ln_g": jnp.ones((1, HIDDEN), jnp.float32),
        "emb_ln_b": jnp.zeros((1, HIDDEN), jnp.float32),
        # Per-layer weights stacked along a leading layer axis; Q|K|V fused.
        "qkv_w": qkv_w.astype(jnp.bfloat16),
        "qkv_b": qkv_b,
        "o_w": normal(next(keys), (N_LAYERS, HIDDEN, HIDDEN)).astype(jnp.bfloat16),
        "o_b": jnp.zeros((N_LAYERS, 1, HIDDEN), jnp.float32),
        "ln1_g": jnp.ones((N_LAYERS, 1, HIDDEN), jnp.float32),
        "ln1_b": jnp.zeros((N_LAYERS, 1, HIDDEN), jnp.float32),
        "ffn1_w": normal(next(keys), (N_LAYERS, HIDDEN, INTERMEDIATE)).astype(jnp.bfloat16),
        "ffn1_b": jnp.zeros((N_LAYERS, 1, INTERMEDIATE), jnp.float32),
        "ffn2_w": normal(next(keys), (N_LAYERS, INTERMEDIATE, HIDDEN)).astype(jnp.bfloat16),
        "ffn2_b": jnp.zeros((N_LAYERS, 1, HIDDEN), jnp.float32),
        "ln2_g": jnp.ones((N_LAYERS, 1, HIDDEN), jnp.float32),
        "ln2_b": jnp.zeros((N_LAYERS, 1, HIDDEN), jnp.float32),
        # Classifier zero-padded to CLS_PAD lanes (real logits are [:, :NUM_LABELS]).
        "cls_w": cls_w.astype(jnp.bfloat16),
        "cls_b": jnp.zeros((1, CLS_PAD), jnp.float32),
    }
    return params


# ---------------------------------- forward ----------------------------------
def multispan_qa_tagger_forward(params, input_ids, attention_mask, seqs_per_block=None):
    """Token-classification logits of shape (B, S, NUM_LABELS)."""
    B, S = input_ids.shape

    if seqs_per_block is None:
        # Target >= 32 rows per grid step: collapses small batches to a single
        # step (single-TC v5e/v6e pay ~600 cycles per grid step otherwise and
        # sublane occupancy doubles), while larger batches still keep a
        # "parallel" grid axis that megacore-shards across v7x's two TCs.
        seqs_per_block = max(1, min(B, max(1, 32 // S)))
        while B % seqs_per_block:
            seqs_per_block -= 1
    num_blocks = B // seqs_per_block
    R = seqs_per_block * S

    # RoBERTa position ids: cumsum over non-pad tokens, offset by padding_idx.
    not_pad = (input_ids != PAD_ID).astype(jnp.int32)
    position_ids = jnp.cumsum(not_pad, axis=1) * not_pad + PAD_ID

    # Embedding gather is glue (data-dependent vocab lookup); everything after
    # it runs inside the single fused Pallas kernel.
    emb = (
        params["word_emb"][input_ids]
        + params["pos_emb"][position_ids]
        + params["type_emb"][0][None, None, :]
    ).reshape(B * S, HIDDEN)

    # Per-block additive attention bias (R, R): block-diagonal over the
    # seqs_per_block sequences packed into one grid step, times key validity.
    # Cross-sequence / padded-key entries get -1e9 -> exp underflows to 0, so
    # results match per-sequence masked attention exactly.
    key_valid = attention_mask.astype(jnp.float32).reshape(num_blocks, R)
    seq_id = jnp.repeat(jnp.arange(seqs_per_block, dtype=jnp.int32), S)
    same_seq = (seq_id[:, None] == seq_id[None, :]).astype(jnp.float32)      # (R, R)
    mask_bias = (1.0 - same_seq[None, :, :] * key_valid[:, None, :]) * -1e9  # (nb, R, R)

    weight_args = (
        params["emb_ln_g"], params["emb_ln_b"],
        params["qkv_w"], params["qkv_b"], params["o_w"], params["o_b"],
        params["ln1_g"], params["ln1_b"],
        params["ffn1_w"], params["ffn1_b"], params["ffn2_w"], params["ffn2_b"],
        params["ln2_g"], params["ln2_b"],
        params["cls_w"], params["cls_b"],
    )

    def _const_spec(arr):
        ndim = arr.ndim
        # Whole-array block, constant index -> stays resident across grid steps.
        return pl.BlockSpec(arr.shape, lambda g, _n=ndim: (0,) * _n)

    in_specs = [
        pl.BlockSpec((R, HIDDEN), lambda g: (g, 0)),     # this block's embedding rows
        pl.BlockSpec((1, R, R), lambda g: (g, 0, 0)),    # this block's mask bias
    ] + [_const_spec(a) for a in weight_args]

    out = pl.pallas_call(
        _fused_forward_kernel,
        out_shape=jax.ShapeDtypeStruct((B * S, CLS_PAD), jnp.float32),
        grid=(num_blocks,),
        in_specs=in_specs,
        out_specs=pl.BlockSpec((R, CLS_PAD), lambda g: (g, 0)),
        compiler_params=pltpu.CompilerParams(dimension_semantics=("parallel",)),
    )(emb, mask_bias, *weight_args)

    # TODO(synk): dropout omitted (eval-mode identity).
    return out[:, :NUM_LABELS].reshape(B, S, NUM_LABELS)


# ------------------------------------ main ------------------------------------
if __name__ == "__main__":
    key = jax.random.PRNGKey(0)
    pkey, ikey = jax.random.split(key)
    params = init_params(pkey)

    B, S = 2, 16
    input_ids = jax.random.randint(ikey, (B, S), 2, VOCAB, dtype=jnp.int32)
    attention_mask = jnp.ones((B, S), dtype=jnp.int32)
    # Pad the tail of the second example (like a real padded batch).
    attention_mask = attention_mask.at[1, 12:].set(0)
    input_ids = input_ids.at[1, 12:].set(PAD_ID)

    logits = jax.jit(multispan_qa_tagger_forward)(params, input_ids, attention_mask)
    logits = jax.block_until_ready(logits)
    assert logits.shape == (B, S, NUM_LABELS)
    assert bool(jnp.all(jnp.isfinite(logits)))
    print("KERNEL_OK")
</pallas_src>

<mosaic_0001>
module attributes {stable_mosaic.version = 11 : i64} {
  func.func @_fused_forward_kernel(%arg0: i32, %arg1: memref<32x64xf32, #tpu.memory_space<vmem>>, %arg2: memref<1x32x32xf32, #tpu.memory_space<vmem>>, %arg3: memref<1x64xf32, #tpu.memory_space<vmem>>, %arg4: memref<1x64xf32, #tpu.memory_space<vmem>>, %arg5: memref<2x64x192xbf16, #tpu.memory_space<vmem>>, %arg6: memref<2x1x192xf32, #tpu.memory_space<vmem>>, %arg7: memref<2x64x64xbf16, #tpu.memory_space<vmem>>, %arg8: memref<2x1x64xf32, #tpu.memory_space<vmem>>, %arg9: memref<2x1x64xf32, #tpu.memory_space<vmem>>, %arg10: memref<2x1x64xf32, #tpu.memory_space<vmem>>, %arg11: memref<2x64x128xbf16, #tpu.memory_space<vmem>>, %arg12: memref<2x1x128xf32, #tpu.memory_space<vmem>>, %arg13: memref<2x128x64xbf16, #tpu.memory_space<vmem>>, %arg14: memref<2x1x64xf32, #tpu.memory_space<vmem>>, %arg15: memref<2x1x64xf32, #tpu.memory_space<vmem>>, %arg16: memref<2x1x64xf32, #tpu.memory_space<vmem>>, %arg17: memref<64x128xbf16, #tpu.memory_space<vmem>>, %arg18: memref<1x128xf32, #tpu.memory_space<vmem>>, %arg19: memref<32x128xf32, #tpu.memory_space<vmem>>) attributes {dimension_semantics = [#tpu.dimension_semantics<parallel>], iteration_bounds = array<i64: 1>, scalar_prefetch = 0 : i64, scratch_operands = 0 : i64, tpu.core_type = #tpu.core_type<tc>, window_params = [{transform_indices = @transform_0, window_bounds = array<i64: 32, 64>}, {transform_indices = @transform_1, window_bounds = array<i64: 1, 32, 32>}, {pipeline_mode = #tpu.pipeline_mode<synchronous>, transform_indices = @transform_2, window_bounds = array<i64: 1, 64>}, {pipeline_mode = #tpu.pipeline_mode<synchronous>, transform_indices = @transform_3, window_bounds = array<i64: 1, 64>}, {pipeline_mode = #tpu.pipeline_mode<synchronous>, transform_indices = @transform_4, window_bounds = array<i64: 2, 64, 192>}, {pipeline_mode = #tpu.pipeline_mode<synchronous>, transform_indices = @transform_5, window_bounds = array<i64: 2, 1, 192>}, {pipeline_mode = #tpu.pipeline_mode<synchronous>, transform_indices = @transform_6, window_bounds = array<i64: 2, 64, 64>}, {pipeline_mode = #tpu.pipeline_mode<synchronous>, transform_indices = @transform_7, window_bounds = array<i64: 2, 1, 64>}, {pipeline_mode = #tpu.pipeline_mode<synchronous>, transform_indices = @transform_8, window_bounds = array<i64: 2, 1, 64>}, {pipeline_mode = #tpu.pipeline_mode<synchronous>, transform_indices = @transform_9, window_bounds = array<i64: 2, 1, 64>}, {pipeline_mode = #tpu.pipeline_mode<synchronous>, transform_indices = @transform_10, window_bounds = array<i64: 2, 64, 128>}, {pipeline_mode = #tpu.pipeline_mode<synchronous>, transform_indices = @transform_11, window_bounds = array<i64: 2, 1, 128>}, {pipeline_mode = #tpu.pipeline_mode<synchronous>, transform_indices = @transform_12, window_bounds = array<i64: 2, 128, 64>}, {pipeline_mode = #tpu.pipeline_mode<synchronous>, transform_indices = @transform_13, window_bounds = array<i64: 2, 1, 64>}, {pipeline_mode = #tpu.pipeline_mode<synchronous>, transform_indices = @transform_14, window_bounds = array<i64: 2, 1, 64>}, {pipeline_mode = #tpu.pipeline_mode<synchronous>, transform_indices = @transform_15, window_bounds = array<i64: 2, 1, 64>}, {pipeline_mode = #tpu.pipeline_mode<synchronous>, transform_indices = @transform_16, window_bounds = array<i64: 64, 128>}, {pipeline_mode = #tpu.pipeline_mode<synchronous>, transform_indices = @transform_17, window_bounds = array<i64: 1, 128>}, {transform_indices = @transform_18, window_bounds = array<i64: 32, 128>}]} {
    %c0 = arith.constant 0 : index
    %c0_0 = arith.constant 0 : index
    %0 = vector.load %arg1[%c0, %c0_0] : memref<32x64xf32, #tpu.memory_space<vmem>>, vector<32x64xf32>
    %c0_1 = arith.constant 0 : index
    %c0_2 = arith.constant 0 : index
    %1 = vector.load %arg3[%c0_1, %c0_2] : memref<1x64xf32, #tpu.memory_space<vmem>>, vector<1x64xf32>
    %c0_3 = arith.constant 0 : index
    %c0_4 = arith.constant 0 : index
    %2 = vector.load %arg4[%c0_3, %c0_4] : memref<1x64xf32, #tpu.memory_space<vmem>>, vector<1x64xf32>
    %cst = arith.constant dense<0.000000e+00> : vector<32xf32>
    %3 = vector.multi_reduction <add>, %0, %cst [1] : vector<32x64xf32> to vector<32xf32>
    %4 = vector.shape_cast %3 : vector<32xf32> to vector<32x1xf32>
    %cst_5 = arith.constant 6.400000e+01 : f32
    %5 = vector.broadcast %cst_5 : f32 to vector<32x1xf32>
    %6 = arith.divf %4, %5 : vector<32x1xf32>
    %7 = vector.broadcast %6 : vector<32x1xf32> to vector<32x64xf32>
    %8 = arith.subf %0, %7 : vector<32x64xf32>
    %9 = arith.mulf %8, %8 : vector<32x64xf32>
    %cst_6 = arith.constant dense<0.000000e+00> : vector<32xf32>
    %10 = vector.multi_reduction <add>, %9, %cst_6 [1] : vector<32x64xf32> to vector<32xf32>
    %11 = vector.shape_cast %10 : vector<32xf32> to vector<32x1xf32>
    %cst_7 = arith.constant 6.400000e+01 : f32
    %12 = vector.broadcast %cst_7 : f32 to vector<32x1xf32>
    %13 = arith.divf %11, %12 : vector<32x1xf32>
    %cst_8 = arith.constant 9.99999974E-6 : f32
    %14 = vector.broadcast %cst_8 : f32 to vector<32x1xf32>
    %15 = arith.addf %13, %14 : vector<32x1xf32>
    %16 = math.rsqrt %15 : vector<32x1xf32>
    %17 = vector.broadcast %16 : vector<32x1xf32> to vector<32x64xf32>
    %18 = arith.mulf %8, %17 : vector<32x64xf32>
    %19 = vector.broadcast %1 : vector<1x64xf32> to vector<32x64xf32>
    %20 = arith.mulf %18, %19 : vector<32x64xf32>
    %21 = vector.broadcast %2 : vector<1x64xf32> to vector<32x64xf32>
    %22 = arith.addf %20, %21 : vector<32x64xf32>
    %c0_9 = arith.constant 0 : index
    %c0_10 = arith.constant 0 : index
    %c0_11 = arith.constant 0 : index
    %23 = vector.load %arg2[%c0_9, %c0_10, %c0_11] : memref<1x32x32xf32, #tpu.memory_space<vmem>>, vector<1x32x32xf32>
    %24 = vector.shape_cast %23 : vector<1x32x32xf32> to vector<32x32xf32>
    %c0_12 = arith.constant 0 : index
    %c0_13 = arith.constant 0 : index
    %c0_14 = arith.constant 0 : index
    %25 = vector.load %arg5[%c0_12, %c0_13, %c0_14] : memref<2x64x192xbf16, #tpu.memory_space<vmem>>, vector<1x64x192xbf16>
    %26 = vector.shape_cast %25 : vector<1x64x192xbf16> to vector<64x192xbf16>
    %c0_15 = arith.constant 0 : index
    %c0_16 = arith.constant 0 : index
    %c0_17 = arith.constant 0 : index
    %27 = vector.load %arg6[%c0_15, %c0_16, %c0_17] : memref<2x1x192xf32, #tpu.memory_space<vmem>>, vector<1x1x192xf32>
    %28 = vector.shape_cast %27 : vector<1x1x192xf32> to vector<1x192xf32>
    %29 = arith.truncf %22 : vector<32x64xf32> to vector<32x64xbf16>
    %cst_18 = arith.constant dense<0.000000e+00> : vector<32x192xf32>
    %30 = tpu.matmul %29, %26, %cst_18 {dimension_numbers = #tpu.dot_dimension_numbers<[1], [0], [0], [1], [0, 0, 1, 1], [], []>} : vector<32x64xbf16>, vector<64x192xbf16>, vector<32x192xf32> -> vector<32x192xf32>
    %31 = vector.broadcast %28 : vector<1x192xf32> to vector<32x192xf32>
    %32 = arith.addf %30, %31 : vector<32x192xf32>
    %33 = vector.extract_strided_slice %32 {offsets = [0, 0], sizes = [32, 16], strides = [1, 1]} : vector<32x192xf32> to vector<32x16xf32>
    %34 = vector.extract_strided_slice %32 {offsets = [0, 16], sizes = [32, 16], strides = [1, 1]} : vector<32x192xf32> to vector<32x16xf32>
    %35 = vector.extract_strided_slice %32 {offsets = [0, 32], sizes = [32, 16], strides = [1, 1]} : vector<32x192xf32> to vector<32x16xf32>
    %36 = vector.extract_strided_slice %32 {offsets = [0, 48], sizes = [32, 16], strides = [1, 1]} : vector<32x192xf32> to vector<32x16xf32>
    %37 = vector.shape_cast %33 : vector<32x16xf32> to vector<1x32x16xf32>
    %38 = vector.shape_cast %34 : vector<32x16xf32> to vector<1x32x16xf32>
    %39 = vector.shape_cast %35 : vector<32x16xf32> to vector<1x32x16xf32>
    %40 = vector.shape_cast %36 : vector<32x16xf32> to vector<1x32x16xf32>
    %41 = tpu.concatenate %37, %38, %39, %40 in 0 : vector<1x32x16xf32>, vector<1x32x16xf32>, vector<1x32x16xf32>, vector<1x32x16xf32> -> vector<4x32x16xf32>
    %42 = vector.extract_strided_slice %32 {offsets = [0, 64], sizes = [32, 16], strides = [1, 1]} : vector<32x192xf32> to vector<32x16xf32>
    %43 = vector.extract_strided_slice %32 {offsets = [0, 80], sizes = [32, 16], strides = [1, 1]} : vector<32x192xf32> to vector<32x16xf32>
    %44 = vector.extract_strided_slice %32 {offsets = [0, 96], sizes = [32, 16], strides = [1, 1]} : vector<32x192xf32> to vector<32x16xf32>
    %45 = vector.extract_strided_slice %32 {offsets = [0, 112], sizes = [32, 16], strides = [1, 1]} : vector<32x192xf32> to vector<32x16xf32>
    %46 = vector.shape_cast %42 : vector<32x16xf32> to vector<1x32x16xf32>
    %47 = vector.shape_cast %43 : vector<32x16xf32> to vector<1x32x16xf32>
    %48 = vector.shape_cast %44 : vector<32x16xf32> to vector<1x32x16xf32>
    %49 = vector.shape_cast %45 : vector<32x16xf32> to vector<1x32x16xf32>
    %50 = tpu.concatenate %46, %47, %48, %49 in 0 : vector<1x32x16xf32>, vector<1x32x16xf32>, vector<1x32x16xf32>, vector<1x32x16xf32> -> vector<4x32x16xf32>
    %51 = vector.extract_strided_slice %32 {offsets = [0, 128], sizes = [32, 16], strides = [1, 1]} : vector<32x192xf32> to vector<32x16xf32>
    %52 = vector.extract_strided_slice %32 {offsets = [0, 144], sizes = [32, 16], strides = [1, 1]} : vector<32x192xf32> to vector<32x16xf32>
    %53 = vector.extract_strided_slice %32 {offsets = [0, 160], sizes = [32, 16], strides = [1, 1]} : vector<32x192xf32> to vector<32x16xf32>
    %54 = vector.extract_strided_slice %32 {offsets = [0, 176], sizes = [32, 16], strides = [1, 1]} : vector<32x192xf32> to vector<32x16xf32>
    %55 = vector.shape_cast %51 : vector<32x16xf32> to vector<1x32x16xf32>
    %56 = vector.shape_cast %52 : vector<32x16xf32> to vector<1x32x16xf32>
    %57 = vector.shape_cast %53 : vector<32x16xf32> to vector<1x32x16xf32>
    %58 = vector.shape_cast %54 : vector<32x16xf32> to vector<1x32x16xf32>
    %59 = tpu.concatenate %55, %56, %57, %58 in 0 : vector<1x32x16xf32>, vector<1x32x16xf32>, vector<1x32x16xf32>, vector<1x32x16xf32> -> vector<4x32x16xf32>
    "tpu.trace_start"() <{level = 10 : i32, message = "hqd,hkd->hqk"}> : () -> ()
    %cst_19 = arith.constant dense<0.000000e+00> : vector<4x32x32xf32>
    %60 = tpu.matmul %41, %50, %cst_19 {dimension_numbers = #tpu.dot_dimension_numbers<[2], [2], [1], [1], [0, 0, 0, 1, 1, 1], [0], [0]>} : vector<4x32x16xf32>, vector<4x32x16xf32>, vector<4x32x32xf32> -> vector<4x32x32xf32>
    "tpu.trace_stop"() : () -> ()
    %61 = vector.shape_cast %24 : vector<32x32xf32> to vector<1x32x32xf32>
    %62 = vector.broadcast %61 : vector<1x32x32xf32> to vector<4x32x32xf32>
    %63 = arith.addf %60, %62 : vector<4x32x32xf32>
    %cst_20 = arith.constant dense<0xFF800000> : vector<4x32xf32>
    %64 = vector.multi_reduction <maximumf>, %63, %cst_20 [2] : vector<4x32x32xf32> to vector<4x32xf32>
    %65 = vector.shape_cast %64 : vector<4x32xf32> to vector<4x32x1xf32>
    %66 = vector.broadcast %65 : vector<4x32x1xf32> to vector<4x32x32xf32>
    %67 = arith.subf %63, %66 : vector<4x32x32xf32>
    %68 = math.exp %67 : vector<4x32x32xf32>
    %cst_21 = arith.constant dense<0.000000e+00> : vector<4x32xf32>
    %69 = vector.multi_reduction <add>, %68, %cst_21 [2] : vector<4x32x32xf32> to vector<4x32xf32>
    %70 = vector.shape_cast %69 : vector<4x32xf32> to vector<4x32x1xf32>
    %71 = tpu.reciprocal %70 : vector<4x32x1xf32> -> vector<4x32x1xf32>
    %72 = vector.broadcast %71 : vector<4x32x1xf32> to vector<4x32x32xf32>
    %73 = arith.mulf %68, %72 : vector<4x32x32xf32>
    "tpu.trace_start"() <{level = 10 : i32, message = "hqk,hkd->hqd"}> : () -> ()
    %cst_22 = arith.constant dense<0.000000e+00> : vector<4x32x16xf32>
    %74 = tpu.matmul %73, %59, %cst_22 {dimension_numbers = #tpu.dot_dimension_numbers<[2], [1], [1], [2], [0, 0, 0, 1, 1, 2], [0], [0]>} : vector<4x32x32xf32>, vector<4x32x16xf32>, vector<4x32x16xf32> -> vector<4x32x16xf32>
    "tpu.trace_stop"() : () -> ()
    %75 = vector.extract_strided_slice %74 {offsets = [0, 0, 0], sizes = [1, 32, 16], strides = [1, 1, 1]} : vector<4x32x16xf32> to vector<1x32x16xf32>
    %76 = vector.shape_cast %75 : vector<1x32x16xf32> to vector<32x16xf32>
    %77 = vector.extract_strided_slice %74 {offsets = [1, 0, 0], sizes = [1, 32, 16], strides = [1, 1, 1]} : vector<4x32x16xf32> to vector<1x32x16xf32>
    %78 = vector.shape_cast %77 : vector<1x32x16xf32> to vector<32x16xf32>
    %79 = vector.extract_strided_slice %74 {offsets = [2, 0, 0], sizes = [1, 32, 16], strides = [1, 1, 1]} : vector<4x32x16xf32> to vector<1x32x16xf32>
    %80 = vector.shape_cast %79 : vector<1x32x16xf32> to vector<32x16xf32>
    %81 = vector.extract_strided_slice %74 {offsets = [3, 0, 0], sizes = [1, 32, 16], strides = [1, 1, 1]} : vector<4x32x16xf32> to vector<1x32x16xf32>
    %82 = vector.shape_cast %81 : vector<1x32x16xf32> to vector<32x16xf32>
    %83 = tpu.concatenate %76, %78, %80, %82 in 1 : vector<32x16xf32>, vector<32x16xf32>, vector<32x16xf32>, vector<32x16xf32> -> vector<32x64xf32>
    %c0_23 = arith.constant 0 : index
    %c0_24 = arith.constant 0 : index
    %c0_25 = arith.constant 0 : index
    %84 = vector.load %arg7[%c0_23, %c0_24, %c0_25] : memref<2x64x64xbf16, #tpu.memory_space<vmem>>, vector<1x64x64xbf16>
    %85 = vector.shape_cast %84 : vector<1x64x64xbf16> to vector<64x64xbf16>
    %c0_26 = arith.constant 0 : index
    %c0_27 = arith.constant 0 : index
    %c0_28 = arith.constant 0 : index
    %86 = vector.load %arg8[%c0_26, %c0_27, %c0_28] : memref<2x1x64xf32, #tpu.memory_space<vmem>>, vector<1x1x64xf32>
    %87 = vector.shape_cast %86 : vector<1x1x64xf32> to vector<1x64xf32>
    %88 = arith.truncf %83 : vector<32x64xf32> to vector<32x64xbf16>
    %cst_29 = arith.constant dense<0.000000e+00> : vector<32x64xf32>
    %89 = tpu.matmul %88, %85, %cst_29 {dimension_numbers = #tpu.dot_dimension_numbers<[1], [0], [0], [1], [0, 0, 1, 1], [], []>} : vector<32x64xbf16>, vector<64x64xbf16>, vector<32x64xf32> -> vector<32x64xf32>
    %90 = vector.broadcast %87 : vector<1x64xf32> to vector<32x64xf32>
    %91 = arith.addf %89, %90 : vector<32x64xf32>
    %92 = arith.addf %91, %22 : vector<32x64xf32>
    %c0_30 = arith.constant 0 : index
    %c0_31 = arith.constant 0 : index
    %c0_32 = arith.constant 0 : index
    %93 = vector.load %arg9[%c0_30, %c0_31, %c0_32] : memref<2x1x64xf32, #tpu.memory_space<vmem>>, vector<1x1x64xf32>
    %94 = vector.shape_cast %93 : vector<1x1x64xf32> to vector<1x64xf32>
    %c0_33 = arith.constant 0 : index
    %c0_34 = arith.constant 0 : index
    %c0_35 = arith.constant 0 : index
    %95 = vector.load %arg10[%c0_33, %c0_34, %c0_35] : memref<2x1x64xf32, #tpu.memory_space<vmem>>, vector<1x1x64xf32>
    %96 = vector.shape_cast %95 : vector<1x1x64xf32> to vector<1x64xf32>
    %cst_36 = arith.constant dense<0.000000e+00> : vector<32xf32>
    %97 = vector.multi_reduction <add>, %92, %cst_36 [1] : vector<32x64xf32> to vector<32xf32>
    %98 = vector.shape_cast %97 : vector<32xf32> to vector<32x1xf32>
    %cst_37 = arith.constant 6.400000e+01 : f32
    %99 = vector.broadcast %cst_37 : f32 to vector<32x1xf32>
    %100 = arith.divf %98, %99 : vector<32x1xf32>
    %101 = vector.broadcast %100 : vector<32x1xf32> to vector<32x64xf32>
    %102 = arith.subf %92, %101 : vector<32x64xf32>
    %103 = arith.mulf %102, %102 : vector<32x64xf32>
    %cst_38 = arith.constant dense<0.000000e+00> : vector<32xf32>
    %104 = vector.multi_reduction <add>, %103, %cst_38 [1] : vector<32x64xf32> to vector<32xf32>
    %105 = vector.shape_cast %104 : vector<32xf32> to vector<32x1xf32>
    %cst_39 = arith.constant 6.400000e+01 : f32
    %106 = vector.broadcast %cst_39 : f32 to vector<32x1xf32>
    %107 = arith.divf %105, %106 : vector<32x1xf32>
    %cst_40 = arith.constant 9.99999974E-6 : f32
    %108 = vector.broadcast %cst_40 : f32 to vector<32x1xf32>
    %109 = arith.addf %107, %108 : vector<32x1xf32>
    %110 = math.rsqrt %109 : vector<32x1xf32>
    %111 = vector.broadcast %110 : vector<32x1xf32> to vector<32x64xf32>
    %112 = arith.mulf %102, %111 : vector<32x64xf32>
    %113 = vector.broadcast %94 : vector<1x64xf32> to vector<32x64xf32>
    %114 = arith.mulf %112, %113 : vector<32x64xf32>
    %115 = vector.broadcast %96 : vector<1x64xf32> to vector<32x64xf32>
    %116 = arith.addf %114, %115 : vector<32x64xf32>
    %c0_41 = arith.constant 0 : index
    %c0_42 = arith.constant 0 : index
    %c0_43 = arith.constant 0 : index
    %117 = vector.load %arg11[%c0_41, %c0_42, %c0_43] : memref<2x64x128xbf16, #tpu.memory_space<vmem>>, vector<1x64x128xbf16>
    %118 = vector.shape_cast %117 : vector<1x64x128xbf16> to vector<64x128xbf16>
    %c0_44 = arith.constant 0 : index
    %c0_45 = arith.constant 0 : index
    %c0_46 = arith.constant 0 : index
    %119 = vector.load %arg12[%c0_44, %c0_45, %c0_46] : memref<2x1x128xf32, #tpu.memory_space<vmem>>, vector<1x1x128xf32>
    %120 = vector.shape_cast %119 : vector<1x1x128xf32> to vector<1x128xf32>
    %121 = arith.truncf %116 : vector<32x64xf32> to vector<32x64xbf16>
    %cst_47 = arith.constant dense<0.000000e+00> : vector<32x128xf32>
    %122 = tpu.matmul %121, %118, %cst_47 {dimension_numbers = #tpu.dot_dimension_numbers<[1], [0], [0], [1], [0, 0, 1, 1], [], []>} : vector<32x64xbf16>, vector<64x128xbf16>, vector<32x128xf32> -> vector<32x128xf32>
    %123 = vector.broadcast %120 : vector<1x128xf32> to vector<32x128xf32>
    %124 = arith.addf %122, %123 : vector<32x128xf32>
    %cst_48 = arith.constant 5.000000e-01 : f32
    %125 = vector.broadcast %cst_48 : f32 to vector<32x128xf32>
    %126 = arith.mulf %125, %124 : vector<32x128xf32>
    %cst_49 = arith.constant 0.707106769 : f32
    %127 = vector.broadcast %cst_49 : f32 to vector<32x128xf32>
    %128 = arith.mulf %124, %127 : vector<32x128xf32>
    %129 = math.erf %128 : vector<32x128xf32>
    %cst_50 = arith.constant 1.000000e+00 : f32
    %130 = vector.broadcast %cst_50 : f32 to vector<32x128xf32>
    %131 = arith.addf %130, %129 : vector<32x128xf32>
    %132 = arith.mulf %126, %131 : vector<32x128xf32>
    %c0_51 = arith.constant 0 : index
    %c0_52 = arith.constant 0 : index
    %c0_53 = arith.constant 0 : index
    %133 = vector.load %arg13[%c0_51, %c0_52, %c0_53] : memref<2x128x64xbf16, #tpu.memory_space<vmem>>, vector<1x128x64xbf16>
    %134 = vector.shape_cast %133 : vector<1x128x64xbf16> to vector<128x64xbf16>
    %c0_54 = arith.constant 0 : index
    %c0_55 = arith.constant 0 : index
    %c0_56 = arith.constant 0 : index
    %135 = vector.load %arg14[%c0_54, %c0_55, %c0_56] : memref<2x1x64xf32, #tpu.memory_space<vmem>>, vector<1x1x64xf32>
    %136 = vector.shape_cast %135 : vector<1x1x64xf32> to vector<1x64xf32>
    %137 = arith.truncf %132 : vector<32x128xf32> to vector<32x128xbf16>
    %cst_57 = arith.constant dense<0.000000e+00> : vector<32x64xf32>
    %138 = tpu.matmul %137, %134, %cst_57 {dimension_numbers = #tpu.dot_dimension_numbers<[1], [0], [0], [1], [0, 0, 1, 1], [], []>} : vector<32x128xbf16>, vector<128x64xbf16>, vector<32x64xf32> -> vector<32x64xf32>
    %139 = vector.broadcast %136 : vector<1x64xf32> to vector<32x64xf32>
    %140 = arith.addf %138, %139 : vector<32x64xf32>
    %141 = arith.addf %140, %116 : vector<32x64xf32>
    %c0_58 = arith.constant 0 : index
    %c0_59 = arith.constant 0 : index
    %c0_60 = arith.constant 0 : index
    %142 = vector.load %arg15[%c0_58, %c0_59, %c0_60] : memref<2x1x64xf32, #tpu.memory_space<vmem>>, vector<1x1x64xf32>
    %143 = vector.shape_cast %142 : vector<1x1x64xf32> to vector<1x64xf32>
    %c0_61 = arith.constant 0 : index
    %c0_62 = arith.constant 0 : index
    %c0_63 = arith.constant 0 : index
    %144 = vector.load %arg16[%c0_61, %c0_62, %c0_63] : memref<2x1x64xf32, #tpu.memory_space<vmem>>, vector<1x1x64xf32>
    %145 = vector.shape_cast %144 : vector<1x1x64xf32> to vector<1x64xf32>
    %cst_64 = arith.constant dense<0.000000e+00> : vector<32xf32>
    %146 = vector.multi_reduction <add>, %141, %cst_64 [1] : vector<32x64xf32> to vector<32xf32>
    %147 = vector.shape_cast %146 : vector<32xf32> to vector<32x1xf32>
    %cst_65 = arith.constant 6.400000e+01 : f32
    %148 = vector.broadcast %cst_65 : f32 to vector<32x1xf32>
    %149 = arith.divf %147, %148 : vector<32x1xf32>
    %150 = vector.broadcast %149 : vector<32x1xf32> to vector<32x64xf32>
    %151 = arith.subf %141, %150 : vector<32x64xf32>
    %152 = arith.mulf %151, %151 : vector<32x64xf32>
    %cst_66 = arith.constant dense<0.000000e+00> : vector<32xf32>
    %153 = vector.multi_reduction <add>, %152, %cst_66 [1] : vector<32x64xf32> to vector<32xf32>
    %154 = vector.shape_cast %153 : vector<32xf32> to vector<32x1xf32>
    %cst_67 = arith.constant 6.400000e+01 : f32
    %155 = vector.broadcast %cst_67 : f32 to vector<32x1xf32>
    %156 = arith.divf %154, %155 : vector<32x1xf32>
    %cst_68 = arith.constant 9.99999974E-6 : f32
    %157 = vector.broadcast %cst_68 : f32 to vector<32x1xf32>
    %158 = arith.addf %156, %157 : vector<32x1xf32>
    %159 = math.rsqrt %158 : vector<32x1xf32>
    %160 = vector.broadcast %159 : vector<32x1xf32> to vector<32x64xf32>
    %161 = arith.mulf %151, %160 : vector<32x64xf32>
    %162 = vector.broadcast %143 : vector<1x64xf32> to vector<32x64xf32>
    %163 = arith.mulf %161, %162 : vector<32x64xf32>
    %164 = vector.broadcast %145 : vector<1x64xf32> to vector<32x64xf32>
    %165 = arith.addf %163, %164 : vector<32x64xf32>
    %c1 = arith.constant 1 : index
    %c0_69 = arith.constant 0 : index
    %c0_70 = arith.constant 0 : index
    %166 = vector.load %arg5[%c1, %c0_69, %c0_70] : memref<2x64x192xbf16, #tpu.memory_space<vmem>>, vector<1x64x192xbf16>
    %167 = vector.shape_cast %166 : vector<1x64x192xbf16> to vector<64x192xbf16>
    %c1_71 = arith.constant 1 : index
    %c0_72 = arith.constant 0 : index
    %c0_73 = arith.constant 0 : index
    %168 = vector.load %arg6[%c1_71, %c0_72, %c0_73] : memref<2x1x192xf32, #tpu.memory_space<vmem>>, vector<1x1x192xf32>
    %169 = vector.shape_cast %168 : vector<1x1x192xf32> to vector<1x192xf32>
    %170 = arith.truncf %165 : vector<32x64xf32> to vector<32x64xbf16>
    %cst_74 = arith.constant dense<0.000000e+00> : vector<32x192xf32>
    %171 = tpu.matmul %170, %167, %cst_74 {dimension_numbers = #tpu.dot_dimension_numbers<[1], [0], [0], [1], [0, 0, 1, 1], [], []>} : vector<32x64xbf16>, vector<64x192xbf16>, vector<32x192xf32> -> vector<32x192xf32>
    %172 = vector.broadcast %169 : vector<1x192xf32> to vector<32x192xf32>
    %173 = arith.addf %171, %172 : vector<32x192xf32>
    %174 = vector.extract_strided_slice %173 {offsets = [0, 0], sizes = [32, 16], strides = [1, 1]} : vector<32x192xf32> to vector<32x16xf32>
    %175 = vector.extract_strided_slice %173 {offsets = [0, 16], sizes = [32, 16], strides = [1, 1]} : vector<32x192xf32> to vector<32x16xf32>
    %176 = vector.extract_strided_slice %173 {offsets = [0, 32], sizes = [32, 16], strides = [1, 1]} : vector<32x192xf32> to vector<32x16xf32>
    %177 = vector.extract_strided_slice %173 {offsets = [0, 48], sizes = [32, 16], strides = [1, 1]} : vector<32x192xf32> to vector<32x16xf32>
    %178 = vector.shape_cast %174 : vector<32x16xf32> to vector<1x32x16xf32>
    %179 = vector.shape_cast %175 : vector<32x16xf32> to vector<1x32x16xf32>
    %180 = vector.shape_cast %176 : vector<32x16xf32> to vector<1x32x16xf32>
    %181 = vector.shape_cast %177 : vector<32x16xf32> to vector<1x32x16xf32>
    %182 = tpu.concatenate %178, %179, %180, %181 in 0 : vector<1x32x16xf32>, vector<1x32x16xf32>, vector<1x32x16xf32>, vector<1x32x16xf32> -> vector<4x32x16xf32>
    %183 = vector.extract_strided_slice %173 {offsets = [0, 64], sizes = [32, 16], strides = [1, 1]} : vector<32x192xf32> to vector<32x16xf32>
    %184 = vector.extract_strided_slice %173 {offsets = [0, 80], sizes = [32, 16], strides = [1, 1]} : vector<32x192xf32> to vector<32x16xf32>
    %185 = vector.extract_strided_slice %173 {offsets = [0, 96], sizes = [32, 16], strides = [1, 1]} : vector<32x192xf32> to vector<32x16xf32>
    %186 = vector.extract_strided_slice %173 {offsets = [0, 112], sizes = [32, 16], strides = [1, 1]} : vector<32x192xf32> to vector<32x16xf32>
    %187 = vector.shape_cast %183 : vector<32x16xf32> to vector<1x32x16xf32>
    %188 = vector.shape_cast %184 : vector<32x16xf32> to vector<1x32x16xf32>
    %189 = vector.shape_cast %185 : vector<32x16xf32> to vector<1x32x16xf32>
    %190 = vector.shape_cast %186 : vector<32x16xf32> to vector<1x32x16xf32>
    %191 = tpu.concatenate %187, %188, %189, %190 in 0 : vector<1x32x16xf32>, vector<1x32x16xf32>, vector<1x32x16xf32>, vector<1x32x16xf32> -> vector<4x32x16xf32>
    %192 = vector.extract_strided_slice %173 {offsets = [0, 128], sizes = [32, 16], strides = [1, 1]} : vector<32x192xf32> to vector<32x16xf32>
    %193 = vector.extract_strided_slice %173 {offsets = [0, 144], sizes = [32, 16], strides = [1, 1]} : vector<32x192xf32> to vector<32x16xf32>
    %194 = vector.extract_strided_slice %173 {offsets = [0, 160], sizes = [32, 16], strides = [1, 1]} : vector<32x192xf32> to vector<32x16xf32>
    %195 = vector.extract_strided_slice %173 {offsets = [0, 176], sizes = [32, 16], strides = [1, 1]} : vector<32x192xf32> to vector<32x16xf32>
    %196 = vector.shape_cast %192 : vector<32x16xf32> to vector<1x32x16xf32>
    %197 = vector.shape_cast %193 : vector<32x16xf32> to vector<1x32x16xf32>
    %198 = vector.shape_cast %194 : vector<32x16xf32> to vector<1x32x16xf32>
    %199 = vector.shape_cast %195 : vector<32x16xf32> to vector<1x32x16xf32>
    %200 = tpu.concatenate %196, %197, %198, %199 in 0 : vector<1x32x16xf32>, vector<1x32x16xf32>, vector<1x32x16xf32>, vector<1x32x16xf32> -> vector<4x32x16xf32>
    "tpu.trace_start"() <{level = 10 : i32, message = "hqd,hkd->hqk"}> : () -> ()
    %cst_75 = arith.constant dense<0.000000e+00> : vector<4x32x32xf32>
    %201 = tpu.matmul %182, %191, %cst_75 {dimension_numbers = #tpu.dot_dimension_numbers<[2], [2], [1], [1], [0, 0, 0, 1, 1, 1], [0], [0]>} : vector<4x32x16xf32>, vector<4x32x16xf32>, vector<4x32x32xf32> -> vector<4x32x32xf32>
    "tpu.trace_stop"() : () -> ()
    %202 = vector.shape_cast %24 : vector<32x32xf32> to vector<1x32x32xf32>
    %203 = vector.broadcast %202 : vector<1x32x32xf32> to vector<4x32x32xf32>
    %204 = arith.addf %201, %203 : vector<4x32x32xf32>
    %cst_76 = arith.constant dense<0xFF800000> : vector<4x32xf32>
    %205 = vector.multi_reduction <maximumf>, %204, %cst_76 [2] : vector<4x32x32xf32> to vector<4x32xf32>
    %206 = vector.shape_cast %205 : vector<4x32xf32> to vector<4x32x1xf32>
    %207 = vector.broadcast %206 : vector<4x32x1xf32> to vector<4x32x32xf32>
    %208 = arith.subf %204, %207 : vector<4x32x32xf32>
    %209 = math.exp %208 : vector<4x32x32xf32>
    %cst_77 = arith.constant dense<0.000000e+00> : vector<4x32xf32>
    %210 = vector.multi_reduction <add>, %209, %cst_77 [2] : vector<4x32x32xf32> to vector<4x32xf32>
    %211 = vector.shape_cast %210 : vector<4x32xf32> to vector<4x32x1xf32>
    %212 = tpu.reciprocal %211 : vector<4x32x1xf32> -> vector<4x32x1xf32>
    %213 = vector.broadcast %212 : vector<4x32x1xf32> to vector<4x32x32xf32>
    %214 = arith.mulf %209, %213 : vector<4x32x32xf32>
    "tpu.trace_start"() <{level = 10 : i32, message = "hqk,hkd->hqd"}> : () -> ()
    %cst_78 = arith.constant dense<0.000000e+00> : vector<4x32x16xf32>
    %215 = tpu.matmul %214, %200, %cst_78 {dimension_numbers = #tpu.dot_dimension_numbers<[2], [1], [1], [2], [0, 0, 0, 1, 1, 2], [0], [0]>} : vector<4x32x32xf32>, vector<4x32x16xf32>, vector<4x32x16xf32> -> vector<4x32x16xf32>
    "tpu.trace_stop"() : () -> ()
    %216 = vector.extract_strided_slice %215 {offsets = [0, 0, 0], sizes = [1, 32, 16], strides = [1, 1, 1]} : vector<4x32x16xf32> to vector<1x32x16xf32>
    %217 = vector.shape_cast %216 : vector<1x32x16xf32> to vector<32x16xf32>
    %218 = vector.extract_strided_slice %215 {offsets = [1, 0, 0], sizes = [1, 32, 16], strides = [1, 1, 1]} : vector<4x32x16xf32> to vector<1x32x16xf32>
    %219 = vector.shape_cast %218 : vector<1x32x16xf32> to vector<32x16xf32>
    %220 = vector.extract_strided_slice %215 {offsets = [2, 0, 0], sizes = [1, 32, 16], strides = [1, 1, 1]} : vector<4x32x16xf32> to vector<1x32x16xf32>
    %221 = vector.shape_cast %220 : vector<1x32x16xf32> to vector<32x16xf32>
    %222 = vector.extract_strided_slice %215 {offsets = [3, 0, 0], sizes = [1, 32, 16], strides = [1, 1, 1]} : vector<4x32x16xf32> to vector<1x32x16xf32>
    %223 = vector.shape_cast %222 : vector<1x32x16xf32> to vector<32x16xf32>
    %224 = tpu.concatenate %217, %219, %221, %223 in 1 : vector<32x16xf32>, vector<32x16xf32>, vector<32x16xf32>, vector<32x16xf32> -> vector<32x64xf32>
    %c1_79 = arith.constant 1 : index
    %c0_80 = arith.constant 0 : index
    %c0_81 = arith.constant 0 : index
    %225 = vector.load %arg7[%c1_79, %c0_80, %c0_81] : memref<2x64x64xbf16, #tpu.memory_space<vmem>>, vector<1x64x64xbf16>
    %226 = vector.shape_cast %225 : vector<1x64x64xbf16> to vector<64x64xbf16>
    %c1_82 = arith.constant 1 : index
    %c0_83 = arith.constant 0 : index
    %c0_84 = arith.constant 0 : index
    %227 = vector.load %arg8[%c1_82, %c0_83, %c0_84] : memref<2x1x64xf32, #tpu.memory_space<vmem>>, vector<1x1x64xf32>
    %228 = vector.shape_cast %227 : vector<1x1x64xf32> to vector<1x64xf32>
    %229 = arith.truncf %224 : vector<32x64xf32> to vector<32x64xbf16>
    %cst_85 = arith.constant dense<0.000000e+00> : vector<32x64xf32>
    %230 = tpu.matmul %229, %226, %cst_85 {dimension_numbers = #tpu.dot_dimension_numbers<[1], [0], [0], [1], [0, 0, 1, 1], [], []>} : vector<32x64xbf16>, vector<64x64xbf16>, vector<32x64xf32> -> vector<32x64xf32>
    %231 = vector.broadcast %228 : vector<1x64xf32> to vector<32x64xf32>
    %232 = arith.addf %230, %231 : vector<32x64xf32>
    %233 = arith.addf %232, %165 : vector<32x64xf32>
    %c1_86 = arith.constant 1 : index
    %c0_87 = arith.constant 0 : index
    %c0_88 = arith.constant 0 : index
    %234 = vector.load %arg9[%c1_86, %c0_87, %c0_88] : memref<2x1x64xf32, #tpu.memory_space<vmem>>, vector<1x1x64xf32>
    %235 = vector.shape_cast %234 : vector<1x1x64xf32> to vector<1x64xf32>
    %c1_89 = arith.constant 1 : index
    %c0_90 = arith.constant 0 : index
    %c0_91 = arith.constant 0 : index
    %236 = vector.load %arg10[%c1_89, %c0_90, %c0_91] : memref<2x1x64xf32, #tpu.memory_space<vmem>>, vector<1x1x64xf32>
    %237 = vector.shape_cast %236 : vector<1x1x64xf32> to vector<1x64xf32>
    %cst_92 = arith.constant dense<0.000000e+00> : vector<32xf32>
    %238 = vector.multi_reduction <add>, %233, %cst_92 [1] : vector<32x64xf32> to vector<32xf32>
    %239 = vector.shape_cast %238 : vector<32xf32> to vector<32x1xf32>
    %cst_93 = arith.constant 6.400000e+01 : f32
    %240 = vector.broadcast %cst_93 : f32 to vector<32x1xf32>
    %241 = arith.divf %239, %240 : vector<32x1xf32>
    %242 = vector.broadcast %241 : vector<32x1xf32> to vector<32x64xf32>
    %243 = arith.subf %233, %242 : vector<32x64xf32>
    %244 = arith.mulf %243, %243 : vector<32x64xf32>
    %cst_94 = arith.constant dense<0.000000e+00> : vector<32xf32>
    %245 = vector.multi_reduction <add>, %244, %cst_94 [1] : vector<32x64xf32> to vector<32xf32>
    %246 = vector.shape_cast %245 : vector<32xf32> to vector<32x1xf32>
    %cst_95 = arith.constant 6.400000e+01 : f32
    %247 = vector.broadcast %cst_95 : f32 to vector<32x1xf32>
    %248 = arith.divf %246, %247 : vector<32x1xf32>
    %cst_96 = arith.constant 9.99999974E-6 : f32
    %249 = vector.broadcast %cst_96 : f32 to vector<32x1xf32>
    %250 = arith.addf %248, %249 : vector<32x1xf32>
    %251 = math.rsqrt %250 : vector<32x1xf32>
    %252 = vector.broadcast %251 : vector<32x1xf32> to vector<32x64xf32>
    %253 = arith.mulf %243, %252 : vector<32x64xf32>
    %254 = vector.broadcast %235 : vector<1x64xf32> to vector<32x64xf32>
    %255 = arith.mulf %253, %254 : vector<32x64xf32>
    %256 = vector.broadcast %237 : vector<1x64xf32> to vector<32x64xf32>
    %257 = arith.addf %255, %256 : vector<32x64xf32>
    %c1_97 = arith.constant 1 : index
    %c0_98 = arith.constant 0 : index
    %c0_99 = arith.constant 0 : index
    %258 = vector.load %arg11[%c1_97, %c0_98, %c0_99] : memref<2x64x128xbf16, #tpu.memory_space<vmem>>, vector<1x64x128xbf16>
    %259 = vector.shape_cast %258 : vector<1x64x128xbf16> to vector<64x128xbf16>
    %c1_100 = arith.constant 1 : index
    %c0_101 = arith.constant 0 : index
    %c0_102 = arith.constant 0 : index
    %260 = vector.load %arg12[%c1_100, %c0_101, %c0_102] : memref<2x1x128xf32, #tpu.memory_space<vmem>>, vector<1x1x128xf32>
    %261 = vector.shape_cast %260 : vector<1x1x128xf32> to vector<1x128xf32>
    %262 = arith.truncf %257 : vector<32x64xf32> to vector<32x64xbf16>
    %cst_103 = arith.constant dense<0.000000e+00> : vector<32x128xf32>
    %263 = tpu.matmul %262, %259, %cst_103 {dimension_numbers = #tpu.dot_dimension_numbers<[1], [0], [0], [1], [0, 0, 1, 1], [], []>} : vector<32x64xbf16>, vector<64x128xbf16>, vector<32x128xf32> -> vector<32x128xf32>
    %264 = vector.broadcast %261 : vector<1x128xf32> to vector<32x128xf32>
    %265 = arith.addf %263, %264 : vector<32x128xf32>
    %cst_104 = arith.constant 5.000000e-01 : f32
    %266 = vector.broadcast %cst_104 : f32 to vector<32x128xf32>
    %267 = arith.mulf %266, %265 : vector<32x128xf32>
    %cst_105 = arith.constant 0.707106769 : f32
    %268 = vector.broadcast %cst_105 : f32 to vector<32x128xf32>
    %269 = arith.mulf %265, %268 : vector<32x128xf32>
    %270 = math.erf %269 : vector<32x128xf32>
    %cst_106 = arith.constant 1.000000e+00 : f32
    %271 = vector.broadcast %cst_106 : f32 to vector<32x128xf32>
    %272 = arith.addf %271, %270 : vector<32x128xf32>
    %273 = arith.mulf %267, %272 : vector<32x128xf32>
    %c1_107 = arith.constant 1 : index
    %c0_108 = arith.constant 0 : index
    %c0_109 = arith.constant 0 : index
    %274 = vector.load %arg13[%c1_107, %c0_108, %c0_109] : memref<2x128x64xbf16, #tpu.memory_space<vmem>>, vector<1x128x64xbf16>
    %275 = vector.shape_cast %274 : vector<1x128x64xbf16> to vector<128x64xbf16>
    %c1_110 = arith.constant 1 : index
    %c0_111 = arith.constant 0 : index
    %c0_112 = arith.constant 0 : index
    %276 = vector.load %arg14[%c1_110, %c0_111, %c0_112] : memref<2x1x64xf32, #tpu.memory_space<vmem>>, vector<1x1x64xf32>
    %277 = vector.shape_cast %276 : vector<1x1x64xf32> to vector<1x64xf32>
    %278 = arith.truncf %273 : vector<32x128xf32> to vector<32x128xbf16>
    %cst_113 = arith.constant dense<0.000000e+00> : vector<32x64xf32>
    %279 = tpu.matmul %278, %275, %cst_113 {dimension_numbers = #tpu.dot_dimension_numbers<[1], [0], [0], [1], [0, 0, 1, 1], [], []>} : vector<32x128xbf16>, vector<128x64xbf16>, vector<32x64xf32> -> vector<32x64xf32>
    %280 = vector.broadcast %277 : vector<1x64xf32> to vector<32x64xf32>
    %281 = arith.addf %279, %280 : vector<32x64xf32>
    %282 = arith.addf %281, %257 : vector<32x64xf32>
    %c1_114 = arith.constant 1 : index
    %c0_115 = arith.constant 0 : index
    %c0_116 = arith.constant 0 : index
    %283 = vector.load %arg15[%c1_114, %c0_115, %c0_116] : memref<2x1x64xf32, #tpu.memory_space<vmem>>, vector<1x1x64xf32>
    %284 = vector.shape_cast %283 : vector<1x1x64xf32> to vector<1x64xf32>
    %c1_117 = arith.constant 1 : index
    %c0_118 = arith.constant 0 : index
    %c0_119 = arith.constant 0 : index
    %285 = vector.load %arg16[%c1_117, %c0_118, %c0_119] : memref<2x1x64xf32, #tpu.memory_space<vmem>>, vector<1x1x64xf32>
    %286 = vector.shape_cast %285 : vector<1x1x64xf32> to vector<1x64xf32>
    %cst_120 = arith.constant dense<0.000000e+00> : vector<32xf32>
    %287 = vector.multi_reduction <add>, %282, %cst_120 [1] : vector<32x64xf32> to vector<32xf32>
    %288 = vector.shape_cast %287 : vector<32xf32> to vector<32x1xf32>
    %cst_121 = arith.constant 6.400000e+01 : f32
    %289 = vector.broadcast %cst_121 : f32 to vector<32x1xf32>
    %290 = arith.divf %288, %289 : vector<32x1xf32>
    %291 = vector.broadcast %290 : vector<32x1xf32> to vector<32x64xf32>
    %292 = arith.subf %282, %291 : vector<32x64xf32>
    %293 = arith.mulf %292, %292 : vector<32x64xf32>
    %cst_122 = arith.constant dense<0.000000e+00> : vector<32xf32>
    %294 = vector.multi_reduction <add>, %293, %cst_122 [1] : vector<32x64xf32> to vector<32xf32>
    %295 = vector.shape_cast %294 : vector<32xf32> to vector<32x1xf32>
    %cst_123 = arith.constant 6.400000e+01 : f32
    %296 = vector.broadcast %cst_123 : f32 to vector<32x1xf32>
    %297 = arith.divf %295, %296 : vector<32x1xf32>
    %cst_124 = arith.constant 9.99999974E-6 : f32
    %298 = vector.broadcast %cst_124 : f32 to vector<32x1xf32>
    %299 = arith.addf %297, %298 : vector<32x1xf32>
    %300 = math.rsqrt %299 : vector<32x1xf32>
    %301 = vector.broadcast %300 : vector<32x1xf32> to vector<32x64xf32>
    %302 = arith.mulf %292, %301 : vector<32x64xf32>
    %303 = vector.broadcast %284 : vector<1x64xf32> to vector<32x64xf32>
    %304 = arith.mulf %302, %303 : vector<32x64xf32>
    %305 = vector.broadcast %286 : vector<1x64xf32> to vector<32x64xf32>
    %306 = arith.addf %304, %305 : vector<32x64xf32>
    %c0_125 = arith.constant 0 : index
    %c0_126 = arith.constant 0 : index
    %307 = vector.load %arg17[%c0_125, %c0_126] : memref<64x128xbf16, #tpu.memory_space<vmem>>, vector<64x128xbf16>
    %c0_127 = arith.constant 0 : index
    %c0_128 = arith.constant 0 : index
    %308 = vector.load %arg18[%c0_127, %c0_128] : memref<1x128xf32, #tpu.memory_space<vmem>>, vector<1x128xf32>
    %309 = arith.truncf %306 : vector<32x64xf32> to vector<32x64xbf16>
    %cst_129 = arith.constant dense<0.000000e+00> : vector<32x128xf32>
    %310 = tpu.matmul %309, %307, %cst_129 {dimension_numbers = #tpu.dot_dimension_numbers<[1], [0], [0], [1], [0, 0, 1, 1], [], []>} : vector<32x64xbf16>, vector<64x128xbf16>, vector<32x128xf32> -> vector<32x128xf32>
    %311 = vector.broadcast %308 : vector<1x128xf32> to vector<32x128xf32>
    %312 = arith.addf %310, %311 : vector<32x128xf32>
    %c0_130 = arith.constant 0 : index
    %c0_131 = arith.constant 0 : index
    %313 = vector.load %arg19[%c0_130, %c0_131] : memref<32x128xf32, #tpu.memory_space<vmem>>, vector<32x128xf32>
    tpu.vector_store %arg19[%c0_130, %c0_131], %312 {strides = array<i32>} : memref<32x128xf32, #tpu.memory_space<vmem>>, vector<32x128xf32>,
    return
  }
  func.func @transform_0(%arg0: i32) -> (i32, i32) {
    %c0_i32 = arith.constant 0 : i32
    %c0_i32_0 = arith.constant 0 : i32
    return %arg0, %c0_i32 : i32, i32
  }
  func.func @transform_1(%arg0: i32) -> (i32, i32, i32) {
    %c0_i32 = arith.constant 0 : i32
    %c0_i32_0 = arith.constant 0 : i32
    %c0_i32_1 = arith.constant 0 : i32
    return %arg0, %c0_i32, %c0_i32_0 : i32, i32, i32
  }
  func.func @transform_2(%arg0: i32) -> (i32, i32) {
    %c0_i32 = arith.constant 0 : i32
    %c0_i32_0 = arith.constant 0 : i32
    %c0_i32_1 = arith.constant 0 : i32
    return %c0_i32, %c0_i32_0 : i32, i32
  }
  func.func @transform_3(%arg0: i32) -> (i32, i32) {
    %c0_i32 = arith.constant 0 : i32
    %c0_i32_0 = arith.constant 0 : i32
    %c0_i32_1 = arith.constant 0 : i32
    return %c0_i32, %c0_i32_0 : i32, i32
  }
  func.func @transform_4(%arg0: i32) -> (i32, i32, i32) {
    %c0_i32 = arith.constant 0 : i32
    %c0_i32_0 = arith.constant 0 : i32
    %c0_i32_1 = arith.constant 0 : i32
    %c0_i32_2 = arith.constant 0 : i32
    return %c0_i32, %c0_i32_0, %c0_i32_1 : i32, i32, i32
  }
  func.func @transform_5(%arg0: i32) -> (i32, i32, i32) {
    %c0_i32 = arith.constant 0 : i32
    %c0_i32_0 = arith.constant 0 : i32
    %c0_i32_1 = arith.constant 0 : i32
    %c0_i32_2 = arith.constant 0 : i32
    return %c0_i32, %c0_i32_0, %c0_i32_1 : i32, i32, i32
  }
  func.func @transform_6(%arg0: i32) -> (i32, i32, i32) {
    %c0_i32 = arith.constant 0 : i32
    %c0_i32_0 = arith.constant 0 : i32
    %c0_i32_1 = arith.constant 0 : i32
    %c0_i32_2 = arith.constant 0 : i32
    return %c0_i32, %c0_i32_0, %c0_i32_1 : i32, i32, i32
  }
  func.func @transform_7(%arg0: i32) -> (i32, i32, i32) {
    %c0_i32 = arith.constant 0 : i32
    %c0_i32_0 = arith.constant 0 : i32
    %c0_i32_1 = arith.constant 0 : i32
    %c0_i32_2 = arith.constant 0 : i32
    return %c0_i32, %c0_i32_0, %c0_i32_1 : i32, i32, i32
  }
  func.func @transform_8(%arg0: i32) -> (i32, i32, i32) {
    %c0_i32 = arith.constant 0 : i32
    %c0_i32_0 = arith.constant 0 : i32
    %c0_i32_1 = arith.constant 0 : i32
    %c0_i32_2 = arith.constant 0 : i32
    return %c0_i32, %c0_i32_0, %c0_i32_1 : i32, i32, i32
  }
  func.func @transform_9(%arg0: i32) -> (i32, i32, i32) {
    %c0_i32 = arith.constant 0 : i32
    %c0_i32_0 = arith.constant 0 : i32
    %c0_i32_1 = arith.constant 0 : i32
    %c0_i32_2 = arith.constant 0 : i32
    return %c0_i32, %c0_i32_0, %c0_i32_1 : i32, i32, i32
  }
  func.func @transform_10(%arg0: i32) -> (i32, i32, i32) {
    %c0_i32 = arith.constant 0 : i32
    %c0_i32_0 = arith.constant 0 : i32
    %c0_i32_1 = arith.constant 0 : i32
    %c0_i32_2 = arith.constant 0 : i32
    return %c0_i32, %c0_i32_0, %c0_i32_1 : i32, i32, i32
  }
  func.func @transform_11(%arg0: i32) -> (i32, i32, i32) {
    %c0_i32 = arith.constant 0 : i32
    %c0_i32_0 = arith.constant 0 : i32
    %c0_i32_1 = arith.constant 0 : i32
    %c0_i32_2 = arith.constant 0 : i32
    return %c0_i32, %c0_i32_0, %c0_i32_1 : i32, i32, i32
  }
  func.func @transform_12(%arg0: i32) -> (i32, i32, i32) {
    %c0_i32 = arith.constant 0 : i32
    %c0_i32_0 = arith.constant 0 : i32
    %c0_i32_1 = arith.constant 0 : i32
    %c0_i32_2 = arith.constant 0 : i32
    return %c0_i32, %c0_i32_0, %c0_i32_1 : i32, i32, i32
  }
  func.func @transform_13(%arg0: i32) -> (i32, i32, i32) {
    %c0_i32 = arith.constant 0 : i32
    %c0_i32_0 = arith.constant 0 : i32
    %c0_i32_1 = arith.constant 0 : i32
    %c0_i32_2 = arith.constant 0 : i32
    return %c0_i32, %c0_i32_0, %c0_i32_1 : i32, i32, i32
  }
  func.func @transform_14(%arg0: i32) -> (i32, i32, i32) {
    %c0_i32 = arith.constant 0 : i32
    %c0_i32_0 = arith.constant 0 : i32
    %c0_i32_1 = arith.constant 0 : i32
    %c0_i32_2 = arith.constant 0 : i32
    return %c0_i32, %c0_i32_0, %c0_i32_1 : i32, i32, i32
  }
  func.func @transform_15(%arg0: i32) -> (i32, i32, i32) {
    %c0_i32 = arith.constant 0 : i32
    %c0_i32_0 = arith.constant 0 : i32
    %c0_i32_1 = arith.constant 0 : i32
    %c0_i32_2 = arith.constant 0 : i32
    return %c0_i32, %c0_i32_0, %c0_i32_1 : i32, i32, i32
  }
  func.func @transform_16(%arg0: i32) -> (i32, i32) {
    %c0_i32 = arith.constant 0 : i32
    %c0_i32_0 = arith.constant 0 : i32
    %c0_i32_1 = arith.constant 0 : i32
    return %c0_i32, %c0_i32_0 : i32, i32
  }
  func.func @transform_17(%arg0: i32) -> (i32, i32) {
    %c0_i32 = arith.constant 0 : i32
    %c0_i32_0 = arith.constant 0 : i32
    %c0_i32_1 = arith.constant 0 : i32
    return %c0_i32, %c0_i32_0 : i32, i32
  }
  func.func @transform_18(%arg0: i32) -> (i32, i32) {
    %c0_i32 = arith.constant 0 : i32
    %c0_i32_0 = arith.constant 0 : i32
    return %arg0, %c0_i32 : i32, i32
  }
}

</mosaic_0001>

<bundles_post_ra>
// kernel: multispan_qa_tagger_forward.1
= control target key start
LH: loop header
LB: loop body
LE: loop exit
PB: predicated region body
PF: predicated region fallthrough
CT: control target
= control target key end

     0   :  { %vm66_vm0 = vcmask 523264   ;;  %v5086_v32 = vmov 0   ;;  %vm341_vm1 = vcmask 130048   ;;  %s5087_s30 = smov 112   ;;  %s5089_s19 = smov 80   ;;  %vm770_vm3 = vcmask 261120   ;;  %s6274_s0 = inlined_call_operand.vmem [shape: f32[32,64], index: 0, kind: input, shape index: {}]   ;;  %s6275_s4 = inlined_call_operand.vmem [shape: bf16[2,64,192], index: 4, kind: input, shape index: {}]   ;;  %s6276_s2 = inlined_call_operand.vmem [shape: f32[1,64], index: 2, kind: input, shape index: {}]   ;;  %s6277_s3 = inlined_call_operand.vmem [shape: f32[1,64], index: 3, kind: input, shape index: {}]   ;;  %s6278_s5 = inlined_call_operand.vmem [shape: f32[2,1,192], index: 5, kind: input, shape index: {}]   ;;  %s6279_s1 = inlined_call_operand.vmem [shape: f32[1,32,32], index: 1, kind: input, shape index: {}]   ;;  %s6280_s6 = inlined_call_operand.vmem [shape: bf16[2,64,64], index: 6, kind: input, shape index: {}]   ;;  %s6281_s7 = inlined_call_operand.vmem [shape: f32[2,1,64], index: 7, kind: input, shape index: {}]   ;;  %s6282_s10 = inlined_call_operand.vmem [shape: bf16[2,64,128], index: 10, kind: input, shape index: {}]   ;;  %s6283_s12 = inlined_call_operand.vmem [shape: bf16[2,128,64], index: 12, kind: input, shape index: {}]   ;;  %s6284_s8 = inlined_call_operand.vmem [shape: f32[2,1,64], index: 8, kind: input, shape index: {}]   ;;  %s6285_s9 = inlined_call_operand.vmem [shape: f32[2,1,64], index: 9, kind: input, shape index: {}]   ;;  %s6286_s11 = inlined_call_operand.vmem [shape: f32[2,1,128], index: 11, kind: input, shape index: {}]   ;;  %s6287_s13 = inlined_call_operand.vmem [shape: f32[2,1,64], index: 13, kind: input, shape index: {}]   ;;  %s6288_s14 = inlined_call_operand.vmem [shape: f32[2,1,64], index: 14, kind: input, shape index: {}]   ;;  %s6289_s15 = inlined_call_operand.vmem [shape: f32[2,1,64], index: 15, kind: input, shape index: {}]   ;;  %s6290_s16 = inlined_call_operand.vmem [shape: bf16[64,128], index: 16, kind: input, shape index: {}]   ;;  %s6291_s17 = inlined_call_operand.vmem [shape: f32[1,128], index: 17, kind: input, shape index: {}]   ;;  %s6292_s18 = inlined_call_operand.vmem [shape: f32[32,128], index: 18, kind: output, shape index: {}]  }
   0x1   :  { %6299 = sst [smem:[#allocation2_spill]] %s6274_s0  ;;  %244 = vmatprep.mubr.bf16.mxu0 %v5086_v32  ;;  %v3742_v56 = vld [vmem:[%s6277_s3] ss:$0 sm:$0xff]  ;;  %s5088_s0 = smov 96   ;;  %vm5337_vm2 = vmpackc.low %vm341_vm1, %vm341_vm1  ;;  %vm1391_vm4 = vcmask 392192  }
   0x2   :  { %6300 = sst [smem:[#allocation3_spill]] %s6275_s4  ;;  %s6302_s29 = sld [smem:[#allocation2_spill]] }
   0x3   :  { %6301 = sst [smem:[#allocation4_spill]] %s6276_s2  ;;  %s6303_s23 = sld [smem:[#allocation3_spill]] }
   0x4   :  { %s6304_s26 = sld [smem:[#allocation4_spill]]  ;;  %s5090_s4 = smov 64  }
   0x5   :  { %s5091_s28 = smov 16   ;;  %s6297_s24 = smov 32  }
   0x6   :  { %s6295_s27 = smov 48   ;;  %s6308_s20 = smov 48  }
   0x8   :  { %v60_v0 = vld [vmem:[%s6302_s29] sm:$0xff]  ;;  %v62_v1 = vld [vmem:[%s6302_s29 + $0x10] sm:$0xff]  ;;  %v61_v2 = vld [vmem:[%s6302_s29 + $0x8] sm:$0xff] }
   0x9   :  { %v67_v3 = vsel %vm66_vm0, %v60_v0, 0.0  ;;  %v73_v4 = vsel %vm66_vm0, %v62_v1, 0.0  ;;  %v63_v5 = vld [vmem:[%s6302_s29 + $0x18] sm:$0xff]  ;;  %v70_v6 = vsel %vm66_vm0, %v61_v2, 0.0  ;;  %v4838_v28 = vld [vmem:[%s6303_s23 + $0x4] ss:$8 sps:$4 sm:$0xff]  }
   0xa   :  { %68 = vadd.xlane.f32.xlu0 %v67_v3  ;;  %74 = vadd.xlane.f32.xlu1 %v73_v4  ;;  %v76_v7 = vsel %vm66_vm0, %v63_v5, 0.0  ;;  %v4840_v29 = vld [vmem:[%s6303_s23] ss:$8 sps:$4 sm:$0xff]   ;;  %v4841_v30 = vld [vmem:[%s6303_s23 + $0x14] ss:$8 sps:$4 sm:$0xff]  }
   0xb   :  { %212 = vmatprep.subr.bf16.mxu0 %v4838_v28  ;;  %v4843_v31 = vld [vmem:[%s6303_s23 + $0x10] ss:$8 sps:$4 sm:$0xff]   ;;  %v4844_v33 = vld [vmem:[%s6303_s23 + $0x24] ss:$8 sps:$4 sm:$0xff]   ;;  %v4846_v34 = vld [vmem:[%s6303_s23 + $0x20] ss:$8 sps:$4 sm:$0xff]  }
   0xc   :  { %213 = vmatpush1.bf16.msra.mxu0 %v4840_v29  ;;  %v4847_v35 = vld [vmem:[%s6303_s23 + $0x34] ss:$8 sps:$4 sm:$0xff]   ;;  %v4849_v36 = vld [vmem:[%s6303_s23 + $0x30] ss:$8 sps:$4 sm:$0xff]   ;;  %v3741_v51 = vld [vmem:[%s6304_s26] ss:$0 sm:$0xff] }
   0xd   :  { %214 = vmatprep.subr.bf16.mxu0 %v4841_v30 }
   0xe   :  { %71 = vadd.xlane.f32.xlu0 %v70_v6  ;;  %77 = vadd.xlane.f32.xlu1 %v76_v7 }
  0x10   :  { %215 = vmatpush1.bf16.msra.mxu0 %v4843_v31 }
  0x11   :  { %216 = vmatprep.subr.bf16.mxu0 %v4844_v33 }
  0x14   :  { %217 = vmatpush1.bf16.msra.mxu0 %v4846_v34 }
  0x15   :  { %218 = vmatprep.subr.bf16.mxu0 %v4847_v35 }
  0x18   :  { %219 = vmatpush1.bf16.msra.mxu0 %v4849_v36 }
  0x97   :  { %v69_v8 = vpop.xlane.xlu0 %68  ;;  %v75_v9 = vpop.xlane.xlu1 %74 }
  0x98   :  { %v80_v10 = vmul.f32 0.015625, %v69_v8  ;;  %v82_v11 = vmul.f32 0.015625, %v75_v9  ;;  %v152_v8 = vld [vmem:[%s6278_s5] sm:$0x3] }
  0x9a   :  { %v84_v12 = vsub.f32 %v60_v0, %v80_v10  ;;  %v5205_v13 = vsub.f32 %v62_v1, %v82_v11 }
  0x9b   :  { %v72_v14 = vpop.xlane.xlu0 %71  ;;  %v78_v15 = vpop.xlane.xlu1 %77 }
  0x9c   :  { %v81_v16 = vmul.f32 0.015625, %v72_v14  ;;  %v83_v17 = vmul.f32 0.015625, %v78_v15  ;;  %v88_v18 = vmul.f32 %v84_v12, %v84_v12  ;;  %v90_v19 = vmul.f32 %v5205_v13, %v5205_v13 }
  0x9e   :  { %v85_v20 = vsub.f32 %v61_v2, %v81_v16  ;;  %v87_v21 = vsub.f32 %v63_v5, %v83_v17  ;;  %v92_v22 = vsel %vm66_vm0, %v88_v18, 0.0  ;;  %v98_v23 = vsel %vm66_vm0, %v90_v19, 0.0 }
  0x9f   :  { %93 = vadd.xlane.f32.xlu0 %v92_v22  ;;  %v156_v5 = vlaneseq }
  0xa0   :  { %v89_v24 = vmul.f32 %v85_v20, %v85_v20  ;;  %v91_v25 = vmul.f32 %v87_v21, %v87_v21 }
  0xa1   :  { %v5260_v6 = vshrl.u32 %v156_v5, 7 }
  0xa2   :  { %v95_v26 = vsel %vm66_vm0, %v89_v24, 0.0  ;;  %v101_v27 = vsel %vm66_vm0, %v91_v25, 0.0 }
  0xa3   :  { %99 = vadd.xlane.f32.xlu0 %v98_v23  ;;  %96 = vadd.xlane.f32.xlu1 %v95_v26  ;;  %v158_v7 = vsub.s32 0, %v5260_v6  ;;  %v162_v9 = vsub.s32 1, %v5260_v6 }
  0xa5   :  { %v159_v10 = vrot.slane %v152_v8, %v158_v7 }
  0xa7   :  { %102 = vadd.xlane.f32.xlu1 %v101_v27 }
 0x12c   :  { %v94_v37 = vpop.xlane.xlu0 %93 }
 0x12d   :  { %v104_v38 = vmul.f32 0.015625, %v94_v37 }
 0x12f   :  { %v108_v39 = vadd.f32 1e-05, %v104_v38 }
 0x130   :  { %v97_v40 = vpop.xlane.xlu1 %96  ;;  %v100_v41 = vpop.xlane.xlu0 %99 }
 0x131   :  { %4898 = vrsqrt.f32 %v108_v39  ;;  %v105_v42 = vmul.f32 0.015625, %v97_v40  ;;  %v106_v43 = vmul.f32 0.015625, %v100_v41 }
 0x133   :  { %v109_v44 = vadd.f32 1e-05, %v105_v42  ;;  %v110_v45 = vadd.f32 1e-05, %v106_v43 }
 0x134   :  { %v103_v46 = vpop.xlane.xlu1 %102 }
 0x135   :  { %4900 = vrsqrt.f32 %v109_v44  ;;  %v107_v47 = vmul.f32 0.015625, %v103_v46 }
 0x136   :  { %4902 = vrsqrt.f32 %v110_v45 }
 0x137   :  { %v111_v48 = vadd.f32 1e-05, %v107_v47 }
 0x139   :  { %4904 = vrsqrt.f32 %v111_v48 }
 0x13b   :  { %v4899_v49 = vpop.eup %4898 }
 0x13c   :  { %v116_v50 = vmul.f32 %v4899_v49, %v84_v12  ;;  %v163_v12 = vrot.slane %v152_v8, %v162_v9 }
 0x13e   :  { %v126_v54 = vmul.f32 %v3741_v51, %v116_v50 }
 0x13f   :  { %v4901_v52 = vpop.eup %4900 }
 0x140   :  { %v117_v53 = vmul.f32 %v4901_v52, %v85_v20  ;;  %v4903_v55 = vpop.eup %4902  ;;  %v5244_v59 = vadd.f32 %v3742_v56, %v126_v54 }
 0x141   :  { %v118_v61 = vmul.f32 %v4903_v55, %v5205_v13 }
 0x142   :  { %v127_v57 = vmul.f32 %v3741_v51, %v117_v53 }
 0x143   :  { %v4905_v58 = vpop.eup %4904  ;;  %v128_v1 = vmul.f32 %v3741_v51, %v118_v61 }
 0x144   :  { %v5246_v60 = vadd.f32 %v3742_v56, %v127_v57  ;;  %v119_v62 = vmul.f32 %v4905_v58, %v87_v21 }
 0x145   :  { %v5255_v3 = vadd.f32 %v3742_v56, %v128_v1 }
 0x146   :  { %v153_v63 = vpack.c.bf16 %v5246_v60, %v5244_v59  ;;  %v129_v0 = vmul.f32 %v3741_v51, %v119_v62 }
 0x148   :  { %3751 = vmatmul.mubr.msk.bf16.vlgmr.msra.gmra.mrb[0].mxu0 %vm66_vm0, %v153_v63  ;;  %v5253_v2 = vadd.f32 %v3742_v56, %v129_v0 }
 0x149   :  { %254 = vmatprep.mubr.bf16.mxu0 %v5086_v32 }
 0x14a   :  { %v154_v4 = vpack.c.bf16 %v5253_v2, %v5255_v3 }
 0x150   :  { %3752 = vmatmul.mubr.msk.bf16.gmra.mrb[4].mxu0 %vm66_vm0, %v154_v4 }
 0x21b   :  { %v246_v11 = vpop.f32.mrb[0].mxu0 }
 0x21c   :  { %v247_v13 = vadd.f32 %v246_v11, %v159_v10  ;;  %v248_v14 = vpop.f32.mrb[1].mxu0 }
 0x21d   :  { %v250_v15 = vpop.f32.mrb[2].mxu0  ;;  %v249_v18 = vadd.f32 %v248_v14, %v163_v12 }
 0x21e   :  { %v5271_v16 = vadd.f32 %v250_v15, %v159_v10  ;;  %v252_v17 = vpop.f32.mrb[3].mxu0  ;;  %269 = vrot.lane.b32.xlu0 %v247_v13, %s5087_s30  ;;  %4154 = vmatprep.mubr.msk.f32.mxu1 %vm341_vm1, %v247_v13 }
 0x21f   :  { %v253_v19 = vadd.f32 %v252_v17, %v163_v12 }
 0x220   :  { %271 = vrot.lane.b32.xlu1 %v5271_v16, %s5087_s30  ;;  %v4638_v33 = vpack.i.bf16 %v5271_v16, %v247_v13 }
 0x221   :  { %v5277_v20 = vpack.i.bf16 %v253_v19, %v249_v18  ;;  %v5279_v21 = vpack.c.bf16 %v253_v19, %v249_v18 }
 0x222   :  { %277 = vrot.lane.b32.xlu0 %v247_v13, %s5088_s0 }
 0x223   :  { %v256_v22 = vpop.f32.mrb[4].mxu0 }
 0x224   :  { %v5282_v23 = vadd.f32 %v256_v22, %v159_v10  ;;  %279 = vrot.lane.b32.xlu1 %v5271_v16, %s5088_s0  ;;  %v258_v24 = vpop.f32.mrb[5].mxu0 }
 0x225   :  { %v260_v25 = vpop.f32.mrb[6].mxu0  ;;  %v259_v27 = vadd.f32 %v258_v24, %v163_v12 }
 0x226   :  { %v262_v26 = vpop.f32.mrb[7].mxu0  ;;  %281 = vrot.lane.b32.xlu0 %v5282_v23, %s5088_s0  ;;  %v261_v31 = vadd.f32 %v260_v25, %v159_v10 }
 0x227   :  { %v263_v28 = vadd.f32 %v262_v26, %v163_v12 }
 0x228   :  { %273 = vrot.lane.b32.xlu1 %v5282_v23, %s5087_s30  ;;  %v4643_v34 = vpack.i.bf16 %v261_v31, %v5282_v23 }
 0x229   :  { %v5290_v29 = vpack.i.bf16 %v263_v28, %v259_v27  ;;  %v5292_v30 = vpack.c.bf16 %v263_v28, %v259_v27 }
 0x22a   :  { %285 = vrot.lane.b32.xlu0 %v247_v13, %s5089_s19 }
 0x22c   :  { %275 = vrot.lane.b32.xlu1 %v261_v31, %s5087_s30 }
 0x22e   :  { %289 = vrot.lane.b32.xlu0 %v5282_v23, %s5089_s19 }
 0x230   :  { %283 = vrot.lane.b32.xlu1 %v261_v31, %s5088_s0 }
 0x232   :  { %4639 = vrot.lane.b32.xlu0 %v4638_v33, %s5090_s4 }
 0x234   :  { %287 = vrot.lane.b32.xlu1 %v5271_v16, %s5089_s19 }
 0x238   :  { %291 = vrot.lane.b32.xlu1 %v261_v31, %s5089_s19 }
 0x23c   :  { %4644 = vrot.lane.b32.xlu1 %v4643_v34, %s5090_s4 }
 0x290   :  { %v270_v35 = vpop.permute.xlu0 %269 }
 0x291   :  { %4168 = vmatprep.mubr.msk.f32.mxu0 %vm341_vm1, %v270_v35 }
 0x292   :  { %v5307_v36 = vpop.permute.xlu1 %271 }
 0x293   :  { %v4648_v37 = vpack.i.bf16 %v5307_v36, %v270_v35 }
 0x294   :  { %v278_v38 = vpop.permute.xlu0 %277 }
 0x295   :  { %4649 = vrot.lane.b32.xlu0 %v4648_v37, %s5090_s4 }
 0x296   :  { %v5311_v39 = vpop.permute.xlu1 %279 }
 0x297   :  { %v4658_v40 = vpack.i.bf16 %v5311_v39, %v278_v38 }
 0x298   :  { %v5314_v41 = vpop.permute.xlu0 %281 }
 0x299   :  { %4659 = vrot.lane.b32.xlu0 %v4658_v40, %s5090_s4 }
 0x29a   :  { %v5317_v42 = vpop.permute.xlu1 %273 }
 0x29c   :  { %v5319_v43 = vpop.permute.xlu0 %285 }
 0x29e   :  { %v5321_v44 = vpop.permute.xlu1 %275 }
 0x29f   :  { %v4653_v45 = vpack.i.bf16 %v5321_v44, %v5317_v42 }
 0x2a0   :  { %v5325_v46 = vpop.permute.xlu0 %289 }
 0x2a1   :  { %4654 = vrot.lane.b32.xlu1 %v4653_v45, %s5090_s4 }
 0x2a2   :  { %v5328_v47 = vpop.permute.xlu1 %283 }
 0x2a3   :  { %v4663_v48 = vpack.i.bf16 %v5328_v47, %v5314_v41 }
 0x2a4   :  { %v4640_v49 = vpop.permute.xlu0 %4639 }
 0x2a5   :  { %4664 = vrot.lane.b32.xlu1 %v4663_v48, %s5090_s4  ;;  %v4642_v50 = vunpack.i.h.bf16 %v4640_v49  ;;  %v4641_v51 = vunpack.i.l.bf16 %v4640_v49  ;;  %v142_v48 = vld [vmem:[%s6279_s1 + $0x10] sm:$0xff] }
 0x2a6   :  { %v5333_v52 = vpop.permute.xlu1 %287 }
 0x2a7   :  { %v4668_v54 = vpack.i.bf16 %v5333_v52, %v5319_v43  ;;  %v4470_v55 = vpack.c.bf16 %v4642_v50, %v4641_v51 }
 0x2a9   :  { %4669 = vrot.lane.b32.xlu0 %v4668_v54, %s5090_s4  ;;  %4472 = vmatprep.subr.msk.bf16.mxu1 %vm5337_vm2, %v4470_v55 }
 0x2aa   :  { %v5346_v56 = vpop.permute.xlu1 %291  ;;  %4475 = vmatpush3.bf16.xpose.msk.msra.mxu1 %vm5337_vm2, %v4470_v55 }
 0x2ab   :  { %v4673_v57 = vpack.i.bf16 %v5346_v56, %v5325_v46 }
 0x2ad   :  { %4679 = vrot.lane.b32.xlu0 %v5277_v20, %s5087_s30  ;;  %4674 = vrot.lane.b32.xlu1 %v4673_v57, %s5090_s4 }
 0x2ae   :  { %v4645_v58 = vpop.permute.xlu1 %4644 }
 0x2af   :  { %v4647_v61 = vunpack.i.h.bf16 %v4645_v58  ;;  %v4646_v62 = vunpack.i.l.bf16 %v4645_v58 }
 0x2b1   :  { %v4476_v63 = vpack.c.bf16 %v4647_v61, %v4646_v62  ;;  %4684 = vrot.lane.b32.xlu1 %v5290_v29, %s5087_s30 }
 0x2b3   :  { %4478 = vmatprep.subr.msk.bf16.mxu1 %vm5337_vm2, %v4476_v63 }
 0x2b4   :  { %4481 = vmatpush3.bf16.xpose.msk.msra.mxu1 %vm5337_vm2, %v4476_v63 }
 0x2bb   :  { %4155 = vmatmul.mubr.msk.f32.vlgmr.msra.gmra.mrb[0].mxu1 %vm341_vm1, %v5271_v16 }
 0x2bc   :  { %4157 = vmatprep.mubr.msk.f32.mxu1 %vm341_vm1, %v5282_v23 }
 0x2bf   :  { %4158 = vmatmul.mubr.msk.f32.gmra.mrb[2].mxu1 %vm341_vm1, %v261_v31 }
 0x2c0   :  { %4182 = vmatprep.mubr.msk.f32.mxu1 %vm341_vm1, %v278_v38  ;;  %v140_v38 = vld [vmem:[%s6279_s1] sm:$0xff] }
 0x307   :  { %v4650_v0 = vpop.permute.xlu0 %4649 }
 0x308   :  { %v4652_v1 = vunpack.i.h.bf16 %v4650_v0  ;;  %v4651_v4 = vunpack.i.l.bf16 %v4650_v0 }
 0x30a   :  { %v4482_v5 = vpack.c.bf16 %v4652_v1, %v4651_v4 }
 0x30b   :  { %v4660_v8 = vpop.permute.xlu0 %4659 }
 0x30c   :  { %v4662_v10 = vunpack.i.h.bf16 %v4660_v8  ;;  %v4661_v11 = vunpack.i.l.bf16 %v4660_v8  ;;  %4484 = vmatprep.subr.msk.bf16.mxu0 %vm5337_vm2, %v4482_v5 }
 0x30d   :  { %4487 = vmatpush3.bf16.xpose.msk.msra.mxu0 %vm5337_vm2, %v4482_v5 }
 0x30e   :  { %v4494_v12 = vpack.c.bf16 %v4662_v10, %v4661_v11 }
 0x310   :  { %4496 = vmatprep.subr.msk.bf16.mxu1 %vm5337_vm2, %v4494_v12 }
 0x311   :  { %4499 = vmatpush3.bf16.xpose.msk.msra.mxu1 %vm5337_vm2, %v4494_v12 }
 0x313   :  { %v4655_v13 = vpop.permute.xlu1 %4654 }
 0x314   :  { %v4657_v14 = vunpack.i.h.bf16 %v4655_v13  ;;  %v4656_v15 = vunpack.i.l.bf16 %v4655_v13 }
 0x316   :  { %v4488_v16 = vpack.c.bf16 %v4657_v14, %v4656_v15 }
 0x317   :  { %v4665_v17 = vpop.permute.xlu1 %4664 }
 0x318   :  { %v4667_v18 = vunpack.i.h.bf16 %v4665_v17  ;;  %v4666_v19 = vunpack.i.l.bf16 %v4665_v17  ;;  %4490 = vmatprep.subr.msk.bf16.mxu0 %vm5337_vm2, %v4488_v16 }
 0x319   :  { %4493 = vmatpush3.bf16.xpose.msk.msra.mxu0 %vm5337_vm2, %v4488_v16 }
 0x31a   :  { %v4500_v22 = vpack.c.bf16 %v4667_v18, %v4666_v19 }
 0x31b   :  { %v4670_v23 = vpop.permute.xlu0 %4669 }
 0x31c   :  { %v4672_v24 = vunpack.i.h.bf16 %v4670_v23  ;;  %v4671_v25 = vunpack.i.l.bf16 %v4670_v23  ;;  %4502 = vmatprep.subr.msk.bf16.mxu1 %vm5337_vm2, %v4500_v22 }
 0x31d   :  { %4505 = vmatpush3.bf16.xpose.msk.msra.mxu1 %vm5337_vm2, %v4500_v22 }
 0x31e   :  { %v4506_v26 = vpack.c.bf16 %v4672_v24, %v4671_v25  ;;  %4519 = vmatprep.subr.bf16.mxu1 %v5279_v21 }
 0x31f   :  { %v4675_v27 = vpop.permute.xlu1 %4674  ;;  %v4680_v34 = vpop.permute.xlu0 %4679 }
 0x320   :  { %v4677_v28 = vunpack.i.h.bf16 %v4675_v27  ;;  %v4676_v31 = vunpack.i.l.bf16 %v4675_v27  ;;  %4169 = vmatmul.mubr.msk.f32.vlgmr.msra.gmra.mrb[8].mxu0 %vm341_vm1, %v5307_v36  ;;  %4508 = vmatprep.subr.msk.bf16.mxu0 %vm5337_vm2, %v4506_v26  ;;  %v4682_v35 = vunpack.i.h.bf16 %v4680_v34  ;;  %v4681_v37 = vunpack.i.l.bf16 %v4680_v34 }
 0x321   :  { %4171 = vmatprep.mubr.msk.f32.mxu0 %vm341_vm1, %v5317_v42  ;;  %4511 = vmatpush3.bf16.xpose.msk.msra.mxu0 %vm5337_vm2, %v4506_v26  ;;  %v143_v42 = vld [vmem:[%s6279_s1 + $0x18] sm:$0xff] }
 0x322   :  { %v4512_v33 = vpack.c.bf16 %v4677_v28, %v4676_v31  ;;  %v5408_v36 = vpack.c.bf16 %v4682_v35, %v4681_v37 }
 0x324   :  { %4172 = vmatmul.mubr.msk.f32.gmra.mrb[10].mxu0 %vm341_vm1, %v5321_v44  ;;  %4183 = vmatmul.mubr.msk.f32.vlgmr.msra.gmra.mrb[4].mxu1 %vm341_vm1, %v5311_v39 }
 0x325   :  { %4514 = vmatprep.subr.msk.bf16.mxu0 %vm5337_vm2, %v4512_v33  ;;  %4185 = vmatprep.mubr.msk.f32.mxu1 %vm341_vm1, %v5314_v41 }
 0x326   :  { %4196 = vmatprep.mubr.msk.f32.mxu0 %vm341_vm1, %v5319_v43  ;;  %4521 = vmatpush3.bf16.msra.mxu1 %v5279_v21  ;;  %v141_v21 = vld [vmem:[%s6279_s1 + $0x8] sm:$0xff] }
 0x327   :  { %4523 = vmatprep.subr.bf16.mxu1 %v5292_v30 }
 0x328   :  { %4186 = vmatmul.mubr.msk.f32.gmra.mrb[6].mxu1 %vm341_vm1, %v5328_v47 }
 0x329   :  { %4517 = vmatpush3.bf16.xpose.msk.msra.mxu0 %vm5337_vm2, %v4512_v33 }
 0x32a   :  { %4525 = vmatpush3.bf16.msra.mxu1 %v5292_v30 }
 0x32b   :  { %4527 = vmatprep.subr.bf16.mxu1 %v5408_v36 }
 0x330   :  { %4197 = vmatmul.mubr.msk.f32.vlgmr.msra.gmra.mrb[12].mxu0 %vm341_vm1, %v5333_v52 }
 0x331   :  { %4199 = vmatprep.mubr.msk.f32.mxu0 %vm341_vm1, %v5325_v46 }
 0x334   :  { %4200 = vmatmul.mubr.msk.f32.gmra.mrb[14].mxu0 %vm341_vm1, %v5346_v56 }
 0x38e   :  { %v4156_v30 = vpop.f32.mrb[0].mxu1 }
 0x38f   :  { %v5424_v39 = vadd.f32 %v4156_v30, %v141_v21  ;;  %v424_v40 = vpop.f32.mrb[1].mxu1 }
 0x390   :  { %v5426_v41 = vadd.f32 %v424_v40, %v140_v38 }
 0x391   :  { %v774_v43 = vsel %vm770_vm3, %v5424_v39, -inf }
 0x392   :  { %775 = vmax.xlane.f32.xlu1 %v774_v43  ;;  %v4159_v44 = vpop.f32.mrb[2].mxu1  ;;  %v771_v45 = vsel %vm770_vm3, %v5426_v41, -inf }
 0x393   :  { %v5435_v46 = vadd.f32 %v4159_v44, %v143_v42  ;;  %v434_v47 = vpop.f32.mrb[3].mxu1  ;;  %772 = vmax.xlane.f32.xlu0 %v771_v45 }
 0x394   :  { %v5442_v50 = vadd.f32 %v434_v47, %v142_v48 }
 0x395   :  { %v780_v49 = vsel %vm770_vm3, %v5435_v46, -inf }
 0x396   :  { %v777_v51 = vsel %vm770_vm3, %v5442_v50, -inf }
 0x397   :  { %781 = vmax.xlane.f32.xlu0 %v780_v49 }
 0x39b   :  { %778 = vmax.xlane.f32.xlu0 %v777_v51 }
 0x3f3   :  { %v4170_v52 = vpop.f32.mrb[8].mxu0 }
 0x3f4   :  { %v5446_v54 = vadd.f32 %v4170_v52, %v141_v21  ;;  %v533_v55 = vpop.f32.mrb[9].mxu0 }
 0x3f5   :  { %v5448_v56 = vadd.f32 %v533_v55, %v140_v38 }
 0x3f6   :  { %v786_v57 = vsel %vm770_vm3, %v5446_v54, -inf }
 0x3f7   :  { %v4173_v58 = vpop.f32.mrb[10].mxu0  ;;  %787 = vmax.xlane.f32.xlu1 %v786_v57  ;;  %v4184_v61 = vpop.f32.mrb[4].mxu1  ;;  %v783_v62 = vsel %vm770_vm3, %v5448_v56, -inf }
 0x3f8   :  { %v5454_v63 = vadd.f32 %v4184_v61, %v141_v21  ;;  %v543_v0 = vpop.f32.mrb[11].mxu0  ;;  %v642_v1 = vpop.f32.mrb[5].mxu1  ;;  %784 = vmax.xlane.f32.xlu0 %v783_v62  ;;  %v5458_v5 = vadd.f32 %v4173_v58, %v143_v42 }
 0x3f9   :  { %v5456_v4 = vadd.f32 %v642_v1, %v140_v38  ;;  %v5462_v10 = vadd.f32 %v543_v0, %v142_v48 }
 0x3fa   :  { %v798_v8 = vsel %vm770_vm3, %v5454_v63, -inf  ;;  %v792_v15 = vsel %vm770_vm3, %v5458_v5, -inf }
 0x3fb   :  { %799 = vmax.xlane.f32.xlu1 %v798_v8  ;;  %v4187_v11 = vpop.f32.mrb[6].mxu1  ;;  %v795_v12 = vsel %vm770_vm3, %v5456_v4, -inf  ;;  %v789_v17 = vsel %vm770_vm3, %v5462_v10, -inf }
 0x3fc   :  { %v652_v13 = vpop.f32.mrb[7].mxu1  ;;  %796 = vmax.xlane.f32.xlu0 %v795_v12  ;;  %v5466_v14 = vadd.f32 %v4187_v11, %v143_v42 }
 0x3fd   :  { %v5470_v16 = vadd.f32 %v652_v13, %v142_v48 }
 0x3fe   :  { %v804_v18 = vsel %vm770_vm3, %v5466_v14, -inf }
 0x3ff   :  { %793 = vmax.xlane.f32.xlu1 %v792_v15  ;;  %v801_v22 = vsel %vm770_vm3, %v5470_v16, -inf }
 0x400   :  { %790 = vmax.xlane.f32.xlu0 %v789_v17 }
 0x403   :  { %v4198_v19 = vpop.f32.mrb[12].mxu0  ;;  %805 = vmax.xlane.f32.xlu1 %v804_v18 }
 0x404   :  { %v5478_v23 = vadd.f32 %v4198_v19, %v141_v21  ;;  %v751_v24 = vpop.f32.mrb[13].mxu0  ;;  %802 = vmax.xlane.f32.xlu0 %v801_v22 }
 0x405   :  { %v5480_v25 = vadd.f32 %v751_v24, %v140_v38  ;;  %v5498_v38 = vpop.permute.xlu1 %4684 }
 0x406   :  { %v810_v26 = vsel %vm770_vm3, %v5478_v23, -inf }
 0x407   :  { %v4201_v27 = vpop.f32.mrb[14].mxu0  ;;  %811 = vmax.xlane.f32.xlu1 %v810_v26  ;;  %v807_v28 = vsel %vm770_vm3, %v5480_v25, -inf }
 0x408   :  { %v5486_v31 = vadd.f32 %v4201_v27, %v143_v42  ;;  %v761_v33 = vpop.f32.mrb[15].mxu0  ;;  %808 = vmax.xlane.f32.xlu0 %v807_v28 }
 0x409   :  { %v5488_v34 = vadd.f32 %v761_v33, %v142_v48 }
 0x40a   :  { %v816_v35 = vsel %vm770_vm3, %v5486_v31, -inf }
 0x40b   :  { %817 = vmax.xlane.f32.xlu1 %v816_v35  ;;  %v813_v37 = vsel %vm770_vm3, %v5488_v34, -inf }
 0x40c   :  { %814 = vmax.xlane.f32.xlu0 %v813_v37 }
 0x41c   :  { %4694 = vrot.lane.b32.xlu1 %v5290_v29, %s5088_s0 }
 0x41f   :  { %v776_v40 = vpop.xlane.xlu1 %775 }
 0x420   :  { %v773_v21 = vpop.xlane.xlu0 %772  ;;  %v820_v42 = vsub.f32 %v5424_v39, %v776_v40 }
 0x421   :  { %v819_v43 = vsub.f32 %v5426_v41, %v773_v21 }
 0x422   :  { %4689 = vrot.lane.b32.xlu0 %v5277_v20, %s5088_s0  ;;  %v837_v45 = vmul.f32 1.442695, %v820_v42 }
 0x423   :  { %v835_v48 = vmul.f32 1.442695, %v819_v43 }
 0x424   :  { %v782_v30 = vpop.xlane.xlu0 %781  ;;  %4906 = vpow2.f32 %v837_v45 }
 0x425   :  { %v822_v47 = vsub.f32 %v5435_v46, %v782_v30  ;;  %4908 = vpow2.f32 %v835_v48 }
 0x427   :  { %v841_v51 = vmul.f32 1.442695, %v822_v47 }
 0x428   :  { %v779_v44 = vpop.xlane.xlu0 %778 }
 0x429   :  { %v821_v49 = vsub.f32 %v5442_v50, %v779_v44  ;;  %4910 = vpow2.f32 %v841_v51 }
 0x42b   :  { %v839_v52 = vmul.f32 1.442695, %v821_v49 }
 0x42d   :  { %4912 = vpow2.f32 %v839_v52 }
 0x42e   :  { %v5504_v55 = vpop.eup %4906 }
 0x42f   :  { %v5506_v57 = vpop.eup %4908  ;;  %v870_v39 = vsel %vm770_vm3, %v5504_v55, 0.0 }
 0x430   :  { %v867_v46 = vsel %vm770_vm3, %v5506_v57, 0.0 }
 0x433   :  { %v5510_v41 = vpop.eup %4910 }
 0x434   :  { %v876_v58 = vsel %vm770_vm3, %v5510_v41, 0.0 }
 0x437   :  { %v5514_v50 = vpop.eup %4912 }
 0x438   :  { %v873_v61 = vsel %vm770_vm3, %v5514_v50, 0.0 }
 0x440   :  { %871 = vadd.xlane.f32.xlu1 %v870_v39 }
 0x441   :  { %868 = vadd.xlane.f32.xlu0 %v867_v46 }
 0x444   :  { %877 = vadd.xlane.f32.xlu1 %v876_v58 }
 0x445   :  { %874 = vadd.xlane.f32.xlu0 %v873_v61 }
 0x484   :  { %v788_v62 = vpop.xlane.xlu1 %787 }
 0x485   :  { %v824_v0 = vsub.f32 %v5446_v54, %v788_v62  ;;  %v785_v1 = vpop.xlane.xlu0 %784 }
 0x486   :  { %v823_v8 = vsub.f32 %v5448_v56, %v785_v1 }
 0x487   :  { %v845_v11 = vmul.f32 1.442695, %v824_v0 }
 0x488   :  { %v843_v12 = vmul.f32 1.442695, %v823_v8  ;;  %v800_v13 = vpop.xlane.xlu1 %799 }
 0x489   :  { %4914 = vpow2.f32 %v845_v11  ;;  %v828_v15 = vsub.f32 %v5454_v63, %v800_v13  ;;  %v797_v17 = vpop.xlane.xlu0 %796 }
 0x48a   :  { %4916 = vpow2.f32 %v843_v12  ;;  %v827_v18 = vsub.f32 %v5456_v4, %v797_v17 }
 0x48b   :  { %v853_v19 = vmul.f32 1.442695, %v828_v15 }
 0x48c   :  { %v851_v22 = vmul.f32 1.442695, %v827_v18  ;;  %v794_v24 = vpop.xlane.xlu1 %793 }
 0x48d   :  { %4918 = vpow2.f32 %v853_v19  ;;  %v826_v26 = vsub.f32 %v5458_v5, %v794_v24  ;;  %v791_v54 = vpop.xlane.xlu0 %790 }
 0x48e   :  { %4920 = vpow2.f32 %v851_v22  ;;  %v825_v56 = vsub.f32 %v5462_v10, %v791_v54 }
 0x48f   :  { %v849_v27 = vmul.f32 1.442695, %v826_v26 }
 0x490   :  { %v847_v28 = vmul.f32 1.442695, %v825_v56  ;;  %v806_v33 = vpop.xlane.xlu1 %805 }
 0x491   :  { %4922 = vpow2.f32 %v849_v27  ;;  %v830_v63 = vsub.f32 %v5466_v14, %v806_v33  ;;  %v803_v35 = vpop.xlane.xlu0 %802 }
 0x492   :  { %4924 = vpow2.f32 %v847_v28  ;;  %v829_v4 = vsub.f32 %v5470_v16, %v803_v35 }
 0x493   :  { %v5528_v37 = vpop.eup %4914  ;;  %v857_v21 = vmul.f32 1.442695, %v830_v63 }
 0x494   :  { %v5530_v30 = vpop.eup %4916  ;;  %v855_v5 = vmul.f32 1.442695, %v829_v4  ;;  %v812_v40 = vpop.xlane.xlu1 %811  ;;  %v882_v10 = vsel %vm770_vm3, %v5528_v37, 0.0  ;;  %v4687_v4 = vunpack.i.h.bf16 %v5498_v38 }
 0x495   :  { %4926 = vpow2.f32 %v857_v21  ;;  %v832_v42 = vsub.f32 %v5478_v23, %v812_v40  ;;  %883 = vadd.xlane.f32.xlu1 %v882_v10  ;;  %v809_v43 = vpop.xlane.xlu0 %808  ;;  %v879_v14 = vsel %vm770_vm3, %v5530_v30, 0.0  ;;  %v4686_v21 = vunpack.i.l.bf16 %v5498_v38 }
 0x496   :  { %4928 = vpow2.f32 %v855_v5  ;;  %v831_v16 = vsub.f32 %v5480_v25, %v809_v43  ;;  %880 = vadd.xlane.f32.xlu0 %v879_v14 }
 0x497   :  { %v5538_v44 = vpop.eup %4918  ;;  %v861_v45 = vmul.f32 1.442695, %v832_v42  ;;  %v4530_v43 = vpack.c.bf16 %v4687_v4, %v4686_v21 }
 0x498   :  { %v5540_v47 = vpop.eup %4920  ;;  %v859_v48 = vmul.f32 1.442695, %v831_v16  ;;  %v818_v49 = vpop.xlane.xlu1 %817  ;;  %v894_v51 = vsel %vm770_vm3, %v5538_v44, 0.0 }
 0x499   :  { %4930 = vpow2.f32 %v861_v45  ;;  %v834_v23 = vsub.f32 %v5486_v31, %v818_v49  ;;  %895 = vadd.xlane.f32.xlu1 %v894_v51  ;;  %v815_v52 = vpop.xlane.xlu0 %814  ;;  %v891_v39 = vsel %vm770_vm3, %v5540_v47, 0.0 }
 0x49a   :  { %4932 = vpow2.f32 %v859_v48  ;;  %v833_v25 = vsub.f32 %v5488_v34, %v815_v52  ;;  %892 = vadd.xlane.f32.xlu0 %v891_v39 }
 0x49b   :  { %v5548_v46 = vpop.eup %4922  ;;  %v865_v58 = vmul.f32 1.442695, %v834_v23 }
 0x49c   :  { %v5550_v61 = vpop.eup %4924  ;;  %v863_v62 = vmul.f32 1.442695, %v833_v25  ;;  %v888_v0 = vsel %vm770_vm3, %v5548_v46, 0.0  ;;  %v4695_v26 = vpop.permute.xlu1 %4694 }
 0x49d   :  { %4934 = vpow2.f32 %v865_v58  ;;  %889 = vadd.xlane.f32.xlu1 %v888_v0  ;;  %v885_v31 = vsel %vm770_vm3, %v5550_v61, 0.0  ;;  %v4690_v54 = vpop.permute.xlu0 %4689  ;;  %v4697_v51 = vunpack.i.h.bf16 %v4695_v26  ;;  %v4696_v23 = vunpack.i.l.bf16 %v4695_v26 }
 0x49e   :  { %886 = vadd.xlane.f32.xlu0 %v885_v31  ;;  %4936 = vpow2.f32 %v863_v62  ;;  %v4692_v10 = vunpack.i.h.bf16 %v4690_v54  ;;  %v4691_v42 = vunpack.i.l.bf16 %v4690_v54 }
 0x49f   :  { %v5556_v1 = vpop.eup %4926  ;;  %v4538_v0 = vpack.c.bf16 %v4697_v51, %v4696_v23  ;;  %v4853_v23 = vld [vmem:[%s6280_s6 + $0x18] sm:$0xff]  }
 0x4a0   :  { %v5558_v34 = vpop.eup %4928  ;;  %v900_v8 = vsel %vm770_vm3, %v5556_v1, 0.0 }
 0x4a1   :  { %901 = vadd.xlane.f32.xlu1 %v900_v8  ;;  %v897_v11 = vsel %vm770_vm3, %v5558_v34, 0.0 }
 0x4a2   :  { %898 = vadd.xlane.f32.xlu0 %v897_v11 }
 0x4a3   :  { %v5564_v12 = vpop.eup %4930 }
 0x4a4   :  { %v5566_v13 = vpop.eup %4932  ;;  %v906_v15 = vsel %vm770_vm3, %v5564_v12, 0.0 }
 0x4a5   :  { %907 = vadd.xlane.f32.xlu1 %v906_v15  ;;  %v903_v17 = vsel %vm770_vm3, %v5566_v13, 0.0 }
 0x4a6   :  { %904 = vadd.xlane.f32.xlu0 %v903_v17 }
 0x4a7   :  { %v5572_v18 = vpop.eup %4934 }
 0x4a8   :  { %v912_v19 = vsel %vm770_vm3, %v5572_v18, 0.0  ;;  %v5576_v22 = vpop.eup %4936 }
 0x4a9   :  { %913 = vadd.xlane.f32.xlu1 %v912_v19  ;;  %v909_v24 = vsel %vm770_vm3, %v5576_v22, 0.0 }
 0x4ad   :  { %910 = vadd.xlane.f32.xlu1 %v909_v24 }
 0x4bc   :  { %4699 = vrot.lane.b32.xlu0 %v5277_v20, %s5089_s19 }
 0x4be   :  { %4704 = vrot.lane.b32.xlu1 %v5290_v29, %s5089_s19 }
 0x4cd   :  { %v872_v56 = vpop.xlane.xlu1 %871 }
 0x4ce   :  { %4938 = vrcp.f32 %v872_v56  ;;  %v869_v27 = vpop.xlane.xlu0 %868 }
 0x4cf   :  { %4940 = vrcp.f32 %v869_v27 }
 0x4d1   :  { %v878_v28 = vpop.xlane.xlu1 %877 }
 0x4d2   :  { %4942 = vrcp.f32 %v878_v28  ;;  %v875_v33 = vpop.xlane.xlu0 %874 }
 0x4d3   :  { %4944 = vrcp.f32 %v875_v33 }
 0x4d8   :  { %v4939_v63 = vpop.eup %4938 }
 0x4d9   :  { %v4941_v35 = vpop.eup %4940  ;;  %v932_v29 = vmul.f32 %v4939_v63, %v5504_v55  ;;  %v4534_v55 = vpack.c.bf16 %v4692_v10, %v4691_v42 }
 0x4da   :  { %v931_v20 = vmul.f32 %v4941_v35, %v5506_v57 }
 0x4dc   :  { %v4943_v5 = vpop.eup %4942  ;;  %4210 = vmatprep.mubr.msk.f32.mxu1 %vm770_vm3, %v931_v20 }
 0x4dd   :  { %v4945_v40 = vpop.eup %4944  ;;  %4211 = vmatmul.mubr.msk.f32.vlgmr.msra.gmra.mrb[8].mxu1 %vm770_vm3, %v932_v29  ;;  %v934_v38 = vmul.f32 %v4943_v5, %v5510_v41 }
 0x4de   :  { %4529 = vmatpush3.bf16.msra.mxu1 %v5408_v36  ;;  %v933_v14 = vmul.f32 %v4945_v40, %v5514_v50 }
 0x4df   :  { %4531 = vmatprep.subr.bf16.mxu1 %v4530_v43 }
 0x4e0   :  { %4213 = vmatprep.mubr.msk.f32.mxu1 %vm770_vm3, %v933_v14 }
 0x4e1   :  { %4214 = vmatmul.mubr.msk.f32.gmra.mrb[10].mxu1 %vm770_vm3, %v934_v38 }
 0x4e2   :  { %4533 = vmatpush3.bf16.msra.mxu1 %v4530_v43 }
 0x4e3   :  { %4535 = vmatprep.subr.bf16.mxu1 %v4534_v55 }
 0x522   :  { %v884_v57 = vpop.xlane.xlu1 %883 }
 0x523   :  { %4946 = vrcp.f32 %v884_v57  ;;  %v881_v16 = vpop.xlane.xlu0 %880 }
 0x524   :  { %4948 = vrcp.f32 %v881_v16  ;;  %v4851_v16 = vld [vmem:[%s6280_s6 + $0x8] sm:$0xff]  }
 0x526   :  { %v896_v45 = vpop.xlane.xlu1 %895 }
 0x527   :  { %v893_v48 = vpop.xlane.xlu0 %892 }
 0x528   :  { %4950 = vrcp.f32 %v893_v48 }
 0x52a   :  { %v890_v36 = vpop.xlane.xlu1 %889 }
 0x52b   :  { %4952 = vrcp.f32 %v890_v36  ;;  %v887_v50 = vpop.xlane.xlu0 %886 }
 0x52c   :  { %4954 = vrcp.f32 %v887_v50  ;;  %v4852_v50 = vld [vmem:[%s6280_s6 + $0x10] sm:$0xff]  }
 0x52d   :  { %v4947_v49 = vpop.eup %4946  ;;  %4956 = vrcp.f32 %v896_v45 }
 0x52e   :  { %v4949_v41 = vpop.eup %4948  ;;  %v902_v52 = vpop.xlane.xlu1 %901  ;;  %v936_v58 = vmul.f32 %v4947_v49, %v5528_v37 }
 0x52f   :  { %v899_v39 = vpop.xlane.xlu0 %898  ;;  %v935_v25 = vmul.f32 %v4949_v41, %v5530_v30 }
 0x530   :  { %4958 = vrcp.f32 %v899_v39 }
 0x531   :  { %4224 = vmatprep.mubr.msk.f32.mxu1 %vm770_vm3, %v935_v25  ;;  %4960 = vrcp.f32 %v902_v52 }
 0x532   :  { %v908_v62 = vpop.xlane.xlu1 %907  ;;  %4225 = vmatmul.mubr.msk.f32.vlgmr.msra.gmra.mrb[12].mxu1 %vm770_vm3, %v936_v58  ;;  %v4951_v8 = vpop.eup %4950 }
 0x533   :  { %4537 = vmatpush3.bf16.msra.mxu1 %v4534_v55  ;;  %v905_v31 = vpop.xlane.xlu0 %904  ;;  %v939_v56 = vmul.f32 %v4951_v8, %v5540_v47 }
 0x534   :  { %4962 = vrcp.f32 %v905_v31  ;;  %4539 = vmatprep.subr.bf16.mxu1 %v4538_v0 }
 0x535   :  { %v4953_v11 = vpop.eup %4952  ;;  %4964 = vrcp.f32 %v908_v62 }
 0x536   :  { %v4955_v15 = vpop.eup %4954  ;;  %v914_v17 = vpop.xlane.xlu1 %913  ;;  %v938_v26 = vmul.f32 %v4953_v11, %v5548_v46 }
 0x537   :  { %4541 = vmatpush3.bf16.msra.mxu1 %v4538_v0  ;;  %v4700_v30 = vpop.permute.xlu0 %4699  ;;  %v937_v37 = vmul.f32 %v4955_v15, %v5550_v61  ;;  %v4957_v54 = vpop.eup %4956 }
 0x538   :  { %v4702_v19 = vunpack.i.h.bf16 %v4700_v30  ;;  %v4701_v24 = vunpack.i.l.bf16 %v4700_v30  ;;  %v940_v61 = vmul.f32 %v4957_v54, %v5538_v44 }
 0x539   :  { %4227 = vmatprep.mubr.msk.f32.mxu1 %vm770_vm3, %v937_v37 }
 0x53a   :  { %v4959_v27 = vpop.eup %4958  ;;  %v911_v28 = vpop.xlane.xlu1 %910  ;;  %4228 = vmatmul.mubr.msk.f32.gmra.mrb[14].mxu1 %vm770_vm3, %v938_v26  ;;  %v4542_v33 = vpack.c.bf16 %v4702_v19, %v4701_v24 }
 0x53b   :  { %4966 = vrcp.f32 %v911_v28  ;;  %4238 = vmatprep.mubr.msk.f32.mxu1 %vm770_vm3, %v939_v56  ;;  %v4961_v63 = vpop.eup %4960  ;;  %v941_v46 = vmul.f32 %v4959_v27, %v5558_v34 }
 0x53c   :  { %4968 = vrcp.f32 %v914_v17  ;;  %4543 = vmatprep.subr.bf16.mxu1 %v4542_v33  ;;  %v942_v20 = vmul.f32 %v4961_v63, %v5556_v1 }
 0x53e   :  { %v4963_v35 = vpop.eup %4962  ;;  %v4705_v4 = vpop.permute.xlu1 %4704  ;;  %4239 = vmatmul.mubr.msk.f32.vlgmr.msra.gmra.mrb[16].mxu1 %vm770_vm3, %v940_v61 }
 0x53f   :  { %v4707_v47 = vunpack.i.h.bf16 %v4705_v4  ;;  %v4706_v21 = vunpack.i.l.bf16 %v4705_v4  ;;  %4545 = vmatpush3.bf16.msra.mxu1 %v4542_v33  ;;  %4241 = vmatprep.mubr.msk.f32.mxu1 %vm770_vm3, %v941_v46  ;;  %v943_v5 = vmul.f32 %v4963_v35, %v5566_v13  ;;  %v4965_v44 = vpop.eup %4964 }
 0x540   :  { %v944_v40 = vmul.f32 %v4965_v44, %v5564_v12 }
 0x541   :  { %v4546_v29 = vpack.c.bf16 %v4707_v47, %v4706_v21 }
 0x542   :  { %4242 = vmatmul.mubr.msk.f32.gmra.mrb[18].mxu1 %vm770_vm3, %v942_v20 }
 0x543   :  { %4547 = vmatprep.subr.bf16.mxu1 %v4546_v29  ;;  %4252 = vmatprep.mubr.msk.f32.mxu1 %vm770_vm3, %v943_v5 }
 0x544   :  { %4549 = vmatpush3.bf16.msra.mxu1 %v4546_v29 }
 0x545   :  { %v4967_v34 = vpop.eup %4966 }
 0x546   :  { %v4969_v10 = vpop.eup %4968  ;;  %v945_v42 = vmul.f32 %v4967_v34, %v5576_v22  ;;  %v4850_v22 = vld [vmem:[%s6280_s6] sm:$0xff]  }
 0x547   :  { %4253 = vmatmul.mubr.msk.f32.vlgmr.msra.gmra.mrb[20].mxu1 %vm770_vm3, %v944_v40  ;;  %v946_v1 = vmul.f32 %v4969_v10, %v5572_v18  ;;  %4258 = vmatprep.subr.bf16.mxu0 %v4850_v22 }
 0x548   :  { %4255 = vmatprep.mubr.msk.f32.mxu1 %vm770_vm3, %v945_v42  ;;  %4259 = vmatpush3.bf16.msra.mxu0 %v4850_v22 }
 0x549   :  { %4260 = vmatprep.subr.bf16.mxu0 %v4851_v16 }
 0x54b   :  { %4256 = vmatmul.mubr.msk.f32.gmra.mrb[22].mxu1 %vm770_vm3, %v946_v1 }
 0x54c   :  { %4261 = vmatpush3.bf16.msra.mxu0 %v4851_v16 }
 0x54d   :  { %4262 = vmatprep.subr.bf16.mxu0 %v4852_v50 }
 0x550   :  { %4263 = vmatpush3.bf16.msra.mxu0 %v4852_v50 }
 0x551   :  { %4264 = vmatprep.subr.bf16.mxu0 %v4853_v23 }
 0x554   :  { %4265 = vmatpush3.bf16.msra.mxu0 %v4853_v23 }
 0x5b0   :  { %v4212_v13 = vpop.f32.mrb[8].mxu1 }
 0x5b1   :  { %v1025_v43 = vpop.f32.mrb[9].mxu1 }
 0x5b4   :  { %v5619_v14 = vpop.f32.mrb[10].mxu1 }
 0x5b5   :  { %v5621_v38 = vpop.f32.mrb[11].mxu1 }
 0x605   :  { %v4226_v55 = vpop.f32.mrb[12].mxu1 }
 0x606   :  { %v1122_v57 = vpop.f32.mrb[13].mxu1 }
 0x607   :  { %v4708_v12 = vpack.i.bf16 %v4226_v55, %v1122_v57 }
 0x609   :  { %4709 = vrot.lane.b32.xlu0 %v4708_v12, %s5091_s28 }
 0x60d   :  { %v4229_v18 = vpop.f32.mrb[14].mxu1 }
 0x60e   :  { %v1132_v45 = vpop.f32.mrb[15].mxu1 }
 0x60f   :  { %v4713_v48 = vpack.i.bf16 %v4229_v18, %v1132_v45 }
 0x611   :  { %4714 = vrot.lane.b32.xlu1 %v4713_v48, %s5091_s28  ;;  %v4240_v36 = vpop.f32.mrb[16].mxu1 }
 0x612   :  { %v1219_v49 = vpop.f32.mrb[17].mxu1 }
 0x613   :  { %v4718_v41 = vpack.i.bf16 %v4240_v36, %v1219_v49 }
 0x615   :  { %4719 = vrot.lane.b32.xlu0 %v4718_v41, %s6297_s24  ;;  %v4243_v51 = vpop.f32.mrb[18].mxu1 }
 0x616   :  { %v1229_v52 = vpop.f32.mrb[19].mxu1 }
 0x617   :  { %v4723_v39 = vpack.i.bf16 %v4243_v51, %v1229_v52 }
 0x619   :  { %4724 = vrot.lane.b32.xlu1 %v4723_v39, %s6297_s24 }
 0x61a   :  { %v4254_v25 = vpop.f32.mrb[20].mxu1 }
 0x61b   :  { %v1316_v58 = vpop.f32.mrb[21].mxu1 }
 0x61c   :  { %v4728_v62 = vpack.i.bf16 %v4254_v25, %v1316_v58 }
 0x61e   :  { %4729 = vrot.lane.b32.xlu0 %v4728_v62, %s6295_s27  ;;  %v4257_v0 = vpop.f32.mrb[22].mxu1 }
 0x61f   :  { %v1326_v31 = vpop.f32.mrb[23].mxu1 }
 0x620   :  { %v4733_v8 = vpack.i.bf16 %v4257_v0, %v1326_v31 }
 0x622   :  { %4734 = vrot.lane.b32.xlu1 %v4733_v8, %s6295_s27 }
 0x67b   :  { %v4710_v11 = vpop.permute.xlu0 %4709 }
 0x67c   :  { %v4712_v30 = vunpack.i.h.bf16 %v4710_v11  ;;  %v4711_v37 = vunpack.i.l.bf16 %v4710_v11 }
 0x67e   :  { %v1384_v54 = vsel %vm341_vm1, %v4212_v13, %v4712_v30  ;;  %v1383_v56 = vsel %vm341_vm1, %v1025_v43, %v4711_v37 }
 0x683   :  { %v4715_v15 = vpop.permute.xlu1 %4714 }
 0x684   :  { %v4717_v28 = vunpack.i.h.bf16 %v4715_v15  ;;  %v4716_v33 = vunpack.i.l.bf16 %v4715_v15 }
 0x686   :  { %v1386_v44 = vsel %vm341_vm1, %v5619_v14, %v4717_v28  ;;  %v1385_v34 = vsel %vm341_vm1, %v5621_v38, %v4716_v33  ;;  %v3801_v14 = vld [vmem:[%s6281_s7] ss:$0 sm:$0xff]  ;;  %v4855_v28 = vld [vmem:[%s6282_s10 + $0x8] sm:$0xff]   ;;  %v4856_v33 = vld [vmem:[%s6282_s10 + $0x10] sm:$0xff]  }
 0x687   :  { %v4720_v17 = vpop.permute.xlu0 %4719 }
 0x688   :  { %v4722_v19 = vunpack.i.h.bf16 %v4720_v17  ;;  %v4721_v24 = vunpack.i.l.bf16 %v4720_v17 }
 0x68a   :  { %v1388_v46 = vsel %vm770_vm3, %v1384_v54, %v4722_v19  ;;  %v1387_v35 = vsel %vm770_vm3, %v1383_v56, %v4721_v24 }
 0x68b   :  { %v4725_v26 = vpop.permute.xlu1 %4724 }
 0x68c   :  { %v4727_v4 = vunpack.i.h.bf16 %v4725_v26  ;;  %v4726_v47 = vunpack.i.l.bf16 %v4725_v26 }
 0x68e   :  { %v1390_v42 = vsel %vm770_vm3, %v1386_v44, %v4727_v4  ;;  %v1389_v1 = vsel %vm770_vm3, %v1385_v34, %v4726_v47 }
 0x690   :  { %v4730_v27 = vpop.permute.xlu0 %4729 }
 0x691   :  { %v4732_v61 = vunpack.i.h.bf16 %v4730_v27  ;;  %v4731_v63 = vunpack.i.l.bf16 %v4730_v27  ;;  %v4854_v27 = vld [vmem:[%s6282_s10] sm:$0xff]  }
 0x692   :  { %4270 = vmatprep.subr.bf16.mxu1 %v4854_v27 }
 0x693   :  { %v1393_v21 = vsel %vm1391_vm4, %v1388_v46, %v4732_v61  ;;  %v1392_v20 = vsel %vm1391_vm4, %v1387_v35, %v4731_v63  ;;  %4271 = vmatpush3.bf16.msra.mxu1 %v4854_v27  ;;  %v4857_v61 = vld [vmem:[%s6282_s10 + $0x18] sm:$0xff]   ;;  %v4858_v63 = vld [vmem:[%s6283_s12] sm:$0xff]   ;;  %v4859_v46 = vld [vmem:[%s6283_s12 + $0x8] sm:$0xff]  }
 0x694   :  { %v4735_v29 = vpop.permute.xlu1 %4734  ;;  %v1405_v5 = vpack.c.bf16 %v1393_v21, %v1392_v20  ;;  %4272 = vmatprep.subr.bf16.mxu1 %v4855_v28  ;;  %4282 = vmatprep.subr.bf16.mxu0 %v4858_v63 }
 0x695   :  { %v4737_v40 = vunpack.i.h.bf16 %v4735_v29  ;;  %v4736_v10 = vunpack.i.l.bf16 %v4735_v29 }
 0x696   :  { %4266 = vmatprep.mubr.msk.bf16.mxu0 %vm66_vm0, %v1405_v5 }
 0x697   :  { %v1395_v13 = vsel %vm1391_vm4, %v1390_v42, %v4737_v40  ;;  %v1394_v43 = vsel %vm1391_vm4, %v1389_v1, %v4736_v10  ;;  %4273 = vmatpush3.bf16.msra.mxu1 %v4855_v28 }
 0x698   :  { %v1406_v55 = vpack.c.bf16 %v1395_v13, %v1394_v43  ;;  %4274 = vmatprep.subr.bf16.mxu1 %v4856_v33  ;;  %v3808_v13 = vld [vmem:[%s6284_s8] ss:$0 sm:$0xff] }
 0x69a   :  { %4267 = vmatmul.mubr.msk.bf16.vlgmr.msra.gmra.mrb[16].mxu0 %vm66_vm0, %v1406_v55 }
 0x69b   :  { %4275 = vmatpush3.bf16.msra.mxu1 %v4856_v33  ;;  %4283 = vmatpush3.bf16.msra.mxu0 %v4858_v63 }
 0x69c   :  { %4276 = vmatprep.subr.bf16.mxu1 %v4857_v61  ;;  %4284 = vmatprep.subr.bf16.mxu0 %v4859_v46 }
 0x69f   :  { %4277 = vmatpush3.bf16.msra.mxu1 %v4857_v61  ;;  %4285 = vmatpush3.bf16.msra.mxu0 %v4859_v46 }
 0x76d   :  { %v4268_v38 = vpop.f32.mrb[16].mxu0 }
 0x76e   :  { %v1477_v57 = vpop.f32.mrb[17].mxu0  ;;  %v1486_v12 = vadd.f32 %v4268_v38, %v3801_v14 }
 0x76f   :  { %v1478_v22 = vadd.f32 %v3801_v14, %v1477_v57  ;;  %v4269_v18 = vpop.f32.mrb[18].mxu0 }
 0x770   :  { %v1480_v16 = vpop.f32.mrb[19].mxu0  ;;  %v1489_v36 = vadd.f32 %v4269_v18, %v3801_v14  ;;  %v1494_v41 = vadd.f32 %v1486_v12, %v5255_v3  ;;  %v3809_v12 = vld [vmem:[%s6285_s9] ss:$0 sm:$0xff] }
 0x771   :  { %v1481_v45 = vadd.f32 %v3801_v14, %v1480_v16  ;;  %v1492_v48 = vadd.f32 %v1478_v22, %v5244_v59 }
 0x772   :  { %v1504_v23 = vsel %vm66_vm0, %v1494_v41, 0.0  ;;  %v1495_v52 = vadd.f32 %v1489_v36, %v5253_v2 }
 0x773   :  { %v1498_v50 = vsel %vm66_vm0, %v1492_v48, 0.0  ;;  %v1493_v49 = vadd.f32 %v1481_v45, %v5246_v60 }
 0x774   :  { %1499 = vadd.xlane.f32.xlu0 %v1498_v50  ;;  %v1507_v39 = vsel %vm66_vm0, %v1495_v52, 0.0 }
 0x775   :  { %v1501_v51 = vsel %vm66_vm0, %v1493_v49, 0.0 }
 0x776   :  { %1502 = vadd.xlane.f32.xlu1 %v1501_v51 }
 0x778   :  { %1505 = vadd.xlane.f32.xlu0 %v1504_v23 }
 0x77c   :  { %1508 = vadd.xlane.f32.xlu0 %v1507_v39  ;;  %v4860_v39 = vld [vmem:[%s6283_s12 + $0x10] sm:$0xff]  }
 0x77d   :  { %4286 = vmatprep.subr.bf16.mxu0 %v4860_v39 }
 0x77e   :  { %4287 = vmatpush3.bf16.msra.mxu0 %v4860_v39 }
 0x801   :  { %v1500_v59 = vpop.xlane.xlu0 %1499 }
 0x802   :  { %v1510_v25 = vmul.f32 0.015625, %v1500_v59  ;;  %v4861_v59 = vld [vmem:[%s6283_s12 + $0x18] sm:$0xff]  }
 0x803   :  { %v1503_v58 = vpop.xlane.xlu1 %1502  ;;  %4288 = vmatprep.subr.bf16.mxu0 %v4861_v59 }
 0x804   :  { %v1514_v62 = vsub.f32 %v1492_v48, %v1510_v25  ;;  %v1511_v0 = vmul.f32 0.015625, %v1503_v58  ;;  %4289 = vmatpush3.bf16.msra.mxu0 %v4861_v59  ;;  %v4862_v25 = vld [vmem:[%s6283_s12 + $0x20] sm:$0xff]   ;;  %v4863_v58 = vld [vmem:[%s6283_s12 + $0x28] sm:$0xff]  }
 0x805   :  { %v1506_v60 = vpop.xlane.xlu0 %1505  ;;  %4290 = vmatprep.subr.bf16.mxu0 %v4862_v25 }
 0x806   :  { %v1515_v31 = vsub.f32 %v1493_v49, %v1511_v0  ;;  %v1512_v3 = vmul.f32 0.015625, %v1506_v60  ;;  %v1518_v8 = vmul.f32 %v1514_v62, %v1514_v62  ;;  %v4865_v0 = vld [vmem:[%s6283_s12 + $0x38] sm:$0xff]   ;;  %v3810_v60 = vld [vmem:[%s6286_s11] ss:$0 sm:$0xff] }
 0x808   :  { %v1516_v11 = vsub.f32 %v1494_v41, %v1512_v3  ;;  %v1522_v15 = vsel %vm66_vm0, %v1518_v8, 0.0  ;;  %v1519_v17 = vmul.f32 %v1515_v31, %v1515_v31  ;;  %4291 = vmatpush3.bf16.msra.mxu0 %v4862_v25 }
 0x809   :  { %1523 = vadd.xlane.f32.xlu0 %v1522_v15  ;;  %v1509_v30 = vpop.xlane.xlu0 %1508  ;;  %4292 = vmatprep.subr.bf16.mxu0 %v4863_v58 }
 0x80a   :  { %v1513_v2 = vmul.f32 0.015625, %v1509_v30  ;;  %v1525_v37 = vsel %vm66_vm0, %v1519_v17, 0.0  ;;  %v1520_v19 = vmul.f32 %v1516_v11, %v1516_v11 }
 0x80b   :  { %1526 = vadd.xlane.f32.xlu1 %v1525_v37 }
 0x80c   :  { %v1517_v24 = vsub.f32 %v1495_v52, %v1513_v2  ;;  %v1528_v26 = vsel %vm66_vm0, %v1520_v19, 0.0  ;;  %4293 = vmatpush3.bf16.msra.mxu0 %v4863_v58 }
 0x80d   :  { %1529 = vadd.xlane.f32.xlu0 %v1528_v26 }
 0x80e   :  { %v1521_v54 = vmul.f32 %v1517_v24, %v1517_v24 }
 0x810   :  { %v1531_v56 = vsel %vm66_vm0, %v1521_v54, 0.0 }
 0x811   :  { %1532 = vadd.xlane.f32.xlu1 %v1531_v56 }
 0x896   :  { %v1524_v35 = vpop.xlane.xlu0 %1523 }
 0x897   :  { %v1534_v4 = vmul.f32 0.015625, %v1524_v35 }
 0x898   :  { %v1527_v47 = vpop.xlane.xlu1 %1526 }
 0x899   :  { %v1538_v21 = vadd.f32 1e-05, %v1534_v4  ;;  %v1535_v20 = vmul.f32 0.015625, %v1527_v47 }
 0x89a   :  { %v1530_v29 = vpop.xlane.xlu0 %1529 }
 0x89b   :  { %4970 = vrsqrt.f32 %v1538_v21  ;;  %v1539_v5 = vadd.f32 1e-05, %v1535_v20  ;;  %v1536_v44 = vmul.f32 0.015625, %v1530_v29 }
 0x89d   :  { %4972 = vrsqrt.f32 %v1539_v5  ;;  %v1540_v34 = vadd.f32 1e-05, %v1536_v44 }
 0x89e   :  { %v1533_v40 = vpop.xlane.xlu1 %1532 }
 0x89f   :  { %4974 = vrsqrt.f32 %v1540_v34  ;;  %v1537_v10 = vmul.f32 0.015625, %v1533_v40 }
 0x8a1   :  { %v1541_v42 = vadd.f32 1e-05, %v1537_v10  ;;  %v3817_v10 = vld [vmem:[%s6287_s13] ss:$0 sm:$0xff] }
 0x8a3   :  { %4976 = vrsqrt.f32 %v1541_v42 }
 0x8a5   :  { %v4971_v1 = vpop.eup %4970 }
 0x8a6   :  { %v1546_v43 = vmul.f32 %v4971_v1, %v1514_v62  ;;  %v4864_v62 = vld [vmem:[%s6283_s12 + $0x30] sm:$0xff]  }
 0x8a7   :  { %v4973_v55 = vpop.eup %4972  ;;  %4294 = vmatprep.subr.bf16.mxu0 %v4864_v62 }
 0x8a8   :  { %v1547_v14 = vmul.f32 %v4973_v55, %v1515_v31  ;;  %v1556_v38 = vmul.f32 %v3808_v13, %v1546_v43  ;;  %4295 = vmatpush3.bf16.msra.mxu0 %v4864_v62 }
 0x8a9   :  { %v4975_v57 = vpop.eup %4974  ;;  %4296 = vmatprep.subr.bf16.mxu0 %v4865_v0 }
 0x8aa   :  { %v1548_v22 = vmul.f32 %v4975_v57, %v1516_v11  ;;  %v1557_v18 = vmul.f32 %v3808_v13, %v1547_v14  ;;  %v5696_v16 = vadd.f32 %v3809_v12, %v1556_v38 }
 0x8ac   :  { %v5698_v45 = vadd.f32 %v3809_v12, %v1557_v18  ;;  %v1558_v36 = vmul.f32 %v3808_v13, %v1548_v22  ;;  %4297 = vmatpush3.bf16.msra.mxu0 %v4865_v0 }
 0x8ad   :  { %v4977_v48 = vpop.eup %4976 }
 0x8ae   :  { %v1549_v50 = vmul.f32 %v4977_v48, %v1517_v24  ;;  %v1579_v49 = vpack.c.bf16 %v5698_v45, %v5696_v16  ;;  %v5703_v51 = vadd.f32 %v3809_v12, %v1558_v36 }
 0x8b0   :  { %v1559_v41 = vmul.f32 %v3808_v13, %v1549_v50  ;;  %4278 = vmatprep.mubr.msk.bf16.mxu1 %vm66_vm0, %v1579_v49 }
 0x8b2   :  { %v5705_v23 = vadd.f32 %v3809_v12, %v1559_v41 }
 0x8b4   :  { %v1580_v52 = vpack.c.bf16 %v5705_v23, %v5703_v51 }
 0x8b6   :  { %4279 = vmatmul.mubr.msk.bf16.vlgmr.msra.gmra.mrb[24].mxu1 %vm66_vm0, %v1580_v52 }
 0x8b7   :  { %1988 = vmatprep.mubr.bf16.mxu1 %v5086_v32 }
 0x989   :  { %v4280_v31 = vpop.f32.mrb[24].mxu1 }
 0x98a   :  { %v1660_v3 = vadd.f32 %v4280_v31, %v3810_v60  ;;  %v1651_v8 = vpop.f32.mrb[25].mxu1 }
 0x98b   :  { %v1652_v11 = vadd.f32 %v3810_v60, %v1651_v8  ;;  %v4281_v15 = vpop.f32.mrb[26].mxu1 }
 0x98c   :  { %v1672_v17 = vmul.f32 0.70710677, %v1660_v3  ;;  %v1663_v30 = vadd.f32 %v4281_v15, %v3810_v60  ;;  %v1654_v2 = vpop.f32.mrb[27].mxu1  ;;  %v1668_v63 = vmul.f32 0.5, %v1660_v3 }
 0x98d   :  { %v1670_v37 = vmul.f32 0.70710677, %v1652_v11  ;;  %v1655_v19 = vadd.f32 %v3810_v60, %v1654_v2  ;;  %v1666_v4 = vmul.f32 0.5, %v1652_v11 }
 0x98e   :  { %4978 = verf.f32 %v1672_v17  ;;  %v1673_v24 = vmul.f32 0.70710677, %v1663_v30  ;;  %v1669_v46 = vmul.f32 0.5, %v1663_v30 }
 0x98f   :  { %4980 = verf.f32 %v1670_v37  ;;  %v1671_v26 = vmul.f32 0.70710677, %v1655_v19  ;;  %v1667_v47 = vmul.f32 0.5, %v1655_v19  ;;  %v4868_v37 = vld [vmem:[%s6303_s23 + $0x44] ss:$8 sps:$4 sm:$0xff]  }
 0x990   :  { %4982 = verf.f32 %v1673_v24  ;;  %v4866_v19 = vld [vmem:[%s6303_s23 + $0x40] ss:$8 sps:$4 sm:$0xff]   ;;  %1956 = vmatprep.subr.bf16.mxu1 %v4868_v37  ;;  %v4871_v24 = vld [vmem:[%s6303_s23 + $0x54] ss:$8 sps:$4 sm:$0xff]  }
 0x991   :  { %4984 = verf.f32 %v1671_v26  ;;  %1957 = vmatpush1.bf16.msra.mxu1 %v4866_v19  ;;  %v4869_v26 = vld [vmem:[%s6303_s23 + $0x50] ss:$8 sps:$4 sm:$0xff]  }
 0x992   :  { %1958 = vmatprep.subr.bf16.mxu1 %v4871_v24 }
 0x995   :  { %1959 = vmatpush1.bf16.msra.mxu1 %v4869_v26 }
 0x998   :  { %v4979_v54 = vpop.eup %4978 }
 0x999   :  { %v4981_v56 = vpop.eup %4980  ;;  %v1680_v27 = vadd.f32 1.0, %v4979_v54  ;;  %v4874_v54 = vld [vmem:[%s6303_s23 + $0x64] ss:$8 sps:$4 sm:$0xff]  }
 0x99a   :  { %v4983_v28 = vpop.eup %4982  ;;  %v1678_v33 = vadd.f32 1.0, %v4981_v56  ;;  %v4872_v56 = vld [vmem:[%s6303_s23 + $0x60] ss:$8 sps:$4 sm:$0xff]   ;;  %1960 = vmatprep.subr.bf16.mxu1 %v4874_v54 }
 0x99b   :  { %v4985_v61 = vpop.eup %4984  ;;  %v1681_v35 = vadd.f32 1.0, %v4983_v28  ;;  %v1684_v20 = vmul.f32 %v1680_v27, %v1668_v63  ;;  %1961 = vmatpush1.bf16.msra.mxu1 %v4872_v56  ;;  %v4877_v27 = vld [vmem:[%s6303_s23 + $0x74] ss:$8 sps:$4 sm:$0xff]   ;;  %v4875_v28 = vld [vmem:[%s6303_s23 + $0x70] ss:$8 sps:$4 sm:$0xff]  }
 0x99c   :  { %v1679_v21 = vadd.f32 1.0, %v4985_v61  ;;  %v1682_v5 = vmul.f32 %v1678_v33, %v1666_v4  ;;  %1962 = vmatprep.subr.bf16.mxu1 %v4877_v27 }
 0x99d   :  { %v1685_v29 = vmul.f32 %v1681_v35, %v1669_v46 }
 0x99e   :  { %v1683_v44 = vmul.f32 %v1679_v21, %v1667_v47 }
 0x99f   :  { %v1704_v34 = vpack.c.bf16 %v1685_v29, %v1684_v20  ;;  %1963 = vmatpush1.bf16.msra.mxu1 %v4875_v28 }
 0x9a0   :  { %v1703_v40 = vpack.c.bf16 %v1683_v44, %v1682_v5 }
 0x9a2   :  { %4298 = vmatprep.mubr.bf16.mxu0 %v1703_v40  ;;  %v3826_v40 = vld [vmem:[%s6288_s14] ss:$0 sm:$0xff] }
 0x9a3   :  { %4299 = vmatmul.mubr.bf16.vlgmr.msra.gmra.mrb[20].mxu0 %v1704_v34 }
 0xa76   :  { %v4300_v42 = vpop.f32.mrb[20].mxu0 }
 0xa77   :  { %v1793_v1 = vpop.f32.mrb[21].mxu0  ;;  %v1802_v13 = vadd.f32 %v4300_v42, %v3817_v10 }
 0xa78   :  { %v1794_v43 = vadd.f32 %v3817_v10, %v1793_v1  ;;  %v4301_v55 = vpop.f32.mrb[22].mxu0 }
 0xa79   :  { %v1796_v14 = vpop.f32.mrb[23].mxu0  ;;  %v1805_v38 = vadd.f32 %v4301_v55, %v3817_v10  ;;  %v1810_v48 = vadd.f32 %v1802_v13, %v5703_v51  ;;  %v3827_v55 = vld [vmem:[%s6289_s15] ss:$0 sm:$0xff] }
 0xa7a   :  { %v1797_v57 = vadd.f32 %v3817_v10, %v1796_v14  ;;  %v1808_v12 = vadd.f32 %v1794_v43, %v5696_v16 }
 0xa7b   :  { %v1811_v50 = vadd.f32 %v1805_v38, %v5705_v23  ;;  %v1820_v49 = vsel %vm66_vm0, %v1810_v48, 0.0 }
 0xa7c   :  { %v1814_v22 = vsel %vm66_vm0, %v1808_v12, 0.0  ;;  %v1809_v18 = vadd.f32 %v1797_v57, %v5698_v45 }
 0xa7d   :  { %1815 = vadd.xlane.f32.xlu0 %v1814_v22  ;;  %v1823_v41 = vsel %vm66_vm0, %v1811_v50, 0.0 }
 0xa7e   :  { %v1817_v36 = vsel %vm66_vm0, %v1809_v18, 0.0 }
 0xa7f   :  { %1818 = vadd.xlane.f32.xlu1 %v1817_v36 }
 0xa81   :  { %1821 = vadd.xlane.f32.xlu0 %v1820_v49 }
 0xa83   :  { %1824 = vadd.xlane.f32.xlu1 %v1823_v41 }
 0xb0a   :  { %v1816_v52 = vpop.xlane.xlu0 %1815 }
 0xb0b   :  { %v1826_v16 = vmul.f32 0.015625, %v1816_v52 }
 0xb0c   :  { %v1819_v39 = vpop.xlane.xlu1 %1818 }
 0xb0d   :  { %v1830_v59 = vsub.f32 %v1808_v12, %v1826_v16  ;;  %v1827_v25 = vmul.f32 0.015625, %v1819_v39  ;;  %v3836_v16 = vld [vmem:[%s6278_s5 + $0x2] sm:$0x3] }
 0xb0e   :  { %v1822_v45 = vpop.xlane.xlu0 %1821  ;;  %v1903_v39 = vrot.slane %v3836_v16, %v158_v7 }
 0xb0f   :  { %v1831_v58 = vsub.f32 %v1809_v18, %v1827_v25  ;;  %v1828_v51 = vmul.f32 0.015625, %v1822_v45  ;;  %v1834_v62 = vmul.f32 %v1830_v59, %v1830_v59 }
 0xb10   :  { %v1825_v0 = vpop.xlane.xlu1 %1824 }
 0xb11   :  { %v1832_v60 = vsub.f32 %v1810_v48, %v1828_v51  ;;  %v1829_v31 = vmul.f32 0.015625, %v1825_v0  ;;  %v1838_v23 = vsel %vm66_vm0, %v1834_v62, 0.0  ;;  %v1835_v3 = vmul.f32 %v1831_v58, %v1831_v58 }
 0xb12   :  { %1839 = vadd.xlane.f32.xlu0 %v1838_v23 }
 0xb13   :  { %v1833_v8 = vsub.f32 %v1811_v50, %v1829_v31  ;;  %v1841_v11 = vsel %vm66_vm0, %v1835_v3, 0.0  ;;  %v1836_v15 = vmul.f32 %v1832_v60, %v1832_v60 }
 0xb14   :  { %1842 = vadd.xlane.f32.xlu1 %v1841_v11 }
 0xb15   :  { %v1844_v17 = vsel %vm66_vm0, %v1836_v15, 0.0  ;;  %v1837_v30 = vmul.f32 %v1833_v8, %v1833_v8 }
 0xb16   :  { %1845 = vadd.xlane.f32.xlu0 %v1844_v17 }
 0xb17   :  { %v1847_v2 = vsel %vm66_vm0, %v1837_v30, 0.0 }
 0xb18   :  { %1848 = vadd.xlane.f32.xlu1 %v1847_v2 }
 0xb9f   :  { %v1840_v33 = vpop.xlane.xlu0 %1839 }
 0xba0   :  { %v1850_v61 = vmul.f32 0.015625, %v1840_v33 }
 0xba1   :  { %v1843_v63 = vpop.xlane.xlu1 %1842 }
 0xba2   :  { %v1854_v46 = vadd.f32 1e-05, %v1850_v61  ;;  %v1851_v35 = vmul.f32 0.015625, %v1843_v63 }
 0xba3   :  { %v1846_v4 = vpop.xlane.xlu0 %1845 }
 0xba4   :  { %4986 = vrsqrt.f32 %v1854_v46  ;;  %v1855_v47 = vadd.f32 1e-05, %v1851_v35  ;;  %v1852_v21 = vmul.f32 0.015625, %v1846_v4 }
 0xba5   :  { %v1849_v20 = vpop.xlane.xlu1 %1848 }
 0xba6   :  { %4988 = vrsqrt.f32 %v1855_v47  ;;  %v1856_v29 = vadd.f32 1e-05, %v1852_v21  ;;  %v1853_v5 = vmul.f32 0.015625, %v1849_v20 }
 0xba8   :  { %4990 = vrsqrt.f32 %v1856_v29  ;;  %v1857_v44 = vadd.f32 1e-05, %v1853_v5 }
 0xbaa   :  { %4992 = vrsqrt.f32 %v1857_v44 }
 0xbae   :  { %v4987_v34 = vpop.eup %4986 }
 0xbaf   :  { %v1862_v10 = vmul.f32 %v4987_v34, %v1830_v59 }
 0xbb0   :  { %v4989_v42 = vpop.eup %4988 }
 0xbb1   :  { %v1872_v1 = vmul.f32 %v3826_v40, %v1862_v10  ;;  %v1863_v13 = vmul.f32 %v4989_v42, %v1831_v58 }
 0xbb2   :  { %v4991_v43 = vpop.eup %4990 }
 0xbb3   :  { %v1873_v14 = vmul.f32 %v3826_v40, %v1863_v13  ;;  %v1864_v57 = vmul.f32 %v4991_v43, %v1832_v60  ;;  %v5777_v22 = vadd.f32 %v3827_v55, %v1872_v1 }
 0xbb4   :  { %v4993_v38 = vpop.eup %4992 }
 0xbb5   :  { %v1865_v12 = vmul.f32 %v4993_v38, %v1833_v8  ;;  %v5779_v18 = vadd.f32 %v3827_v55, %v1873_v14  ;;  %v1874_v50 = vmul.f32 %v3826_v40, %v1864_v57 }
 0xbb7   :  { %v1897_v48 = vpack.c.bf16 %v5779_v18, %v5777_v22  ;;  %v1875_v36 = vmul.f32 %v3826_v40, %v1865_v12  ;;  %v5787_v41 = vadd.f32 %v3827_v55, %v1874_v50 }
 0xbb9   :  { %3845 = vmatmul.mubr.msk.bf16.vlgmr.msra.gmra.mrb[28].mxu1 %vm66_vm0, %v1897_v48  ;;  %v5785_v49 = vadd.f32 %v3827_v55, %v1875_v36 }
 0xbba   :  { %1998 = vmatprep.mubr.bf16.mxu1 %v5086_v32  ;;  %v1907_v32 = vrot.slane %v3836_v16, %v162_v9 }
 0xbbb   :  { %v1898_v52 = vpack.c.bf16 %v5785_v49, %v5787_v41 }
 0xbc1   :  { %3846 = vmatmul.mubr.msk.bf16.gmra.mrb[32].mxu1 %vm66_vm0, %v1898_v52 }
 0xc8c   :  { %v1990_v59 = vpop.f32.mrb[28].mxu1 }
 0xc8d   :  { %v1991_v25 = vadd.f32 %v1990_v59, %v1903_v39  ;;  %v1992_v45 = vpop.f32.mrb[29].mxu1 }
 0xc8e   :  { %v1994_v58 = vpop.f32.mrb[30].mxu1  ;;  %v1993_v0 = vadd.f32 %v1992_v45, %v1907_v32 }
 0xc8f   :  { %v5799_v51 = vadd.f32 %v1994_v58, %v1903_v39  ;;  %v1996_v62 = vpop.f32.mrb[31].mxu1  ;;  %2013 = vrot.lane.b32.xlu0 %v1991_v25, %s5087_s30  ;;  %4310 = vmatprep.mubr.msk.f32.mxu1 %vm341_vm1, %v1991_v25 }
 0xc90   :  { %v1997_v60 = vadd.f32 %v1996_v62, %v1907_v32 }
 0xc91   :  { %2015 = vrot.lane.b32.xlu1 %v5799_v51, %s5087_s30  ;;  %v4738_v37 = vpack.i.bf16 %v5799_v51, %v1991_v25 }
 0xc92   :  { %v5805_v7 = vpack.c.bf16 %v1997_v60, %v1993_v0  ;;  %v5807_v31 = vpack.i.bf16 %v1997_v60, %v1993_v0 }
 0xc93   :  { %2021 = vrot.lane.b32.xlu0 %v1991_v25, %s5088_s0 }
 0xc94   :  { %v2000_v6 = vpop.f32.mrb[32].mxu1 }
 0xc95   :  { %v2001_v9 = vadd.f32 %v2000_v6, %v1903_v39  ;;  %v2002_v23 = vpop.f32.mrb[33].mxu1 }
 0xc96   :  { %v2004_v3 = vpop.f32.mrb[34].mxu1  ;;  %v2003_v11 = vadd.f32 %v2002_v23, %v1907_v32 }
 0xc97   :  { %2029 = vrot.lane.b32.xlu0 %v1991_v25, %s5089_s19  ;;  %v2006_v8 = vpop.f32.mrb[35].mxu1  ;;  %2017 = vrot.lane.b32.xlu1 %v2001_v9, %s5087_s30  ;;  %v2005_v17 = vadd.f32 %v2004_v3, %v1903_v39 }
 0xc98   :  { %v2007_v15 = vadd.f32 %v2006_v8, %v1907_v32 }
 0xc99   :  { %v4748_v19 = vpack.i.bf16 %v2005_v17, %v2001_v9 }
 0xc9a   :  { %v5812_v30 = vpack.c.bf16 %v2007_v15, %v2003_v11  ;;  %v5814_v2 = vpack.i.bf16 %v2007_v15, %v2003_v11 }
 0xc9b   :  { %2025 = vrot.lane.b32.xlu0 %v2001_v9, %s5088_s0  ;;  %2019 = vrot.lane.b32.xlu1 %v2005_v17, %s5087_s30 }
 0xc9f   :  { %2033 = vrot.lane.b32.xlu0 %v2001_v9, %s5089_s19  ;;  %2023 = vrot.lane.b32.xlu1 %v5799_v51, %s5088_s0 }
 0xca3   :  { %4739 = vrot.lane.b32.xlu0 %v4738_v37, %s5090_s4  ;;  %2031 = vrot.lane.b32.xlu1 %v5799_v51, %s5089_s19 }
 0xca7   :  { %4749 = vrot.lane.b32.xlu0 %v4748_v19, %s5090_s4  ;;  %2027 = vrot.lane.b32.xlu1 %v2005_v17, %s5088_s0 }
 0xcab   :  { %2035 = vrot.lane.b32.xlu1 %v2005_v17, %s5089_s19 }
 0xd01   :  { %v2014_v24 = vpop.permute.xlu0 %2013 }
 0xd02   :  { %4324 = vmatprep.mubr.msk.f32.mxu0 %vm341_vm1, %v2014_v24 }
 0xd03   :  { %v5829_v26 = vpop.permute.xlu1 %2015 }
 0xd04   :  { %v4743_v54 = vpack.i.bf16 %v5829_v26, %v2014_v24 }
 0xd05   :  { %v2022_v56 = vpop.permute.xlu0 %2021 }
 0xd06   :  { %4744 = vrot.lane.b32.xlu1 %v4743_v54, %s5090_s4 }
 0xd09   :  { %v2018_v27 = vpop.permute.xlu1 %2017  ;;  %v5833_v28 = vpop.permute.xlu0 %2029 }
 0xd0d   :  { %v5835_v33 = vpop.permute.xlu1 %2019  ;;  %v5837_v61 = vpop.permute.xlu0 %2025 }
 0xd0e   :  { %v4753_v63 = vpack.i.bf16 %v5835_v33, %v2018_v27 }
 0xd10   :  { %4754 = vrot.lane.b32.xlu1 %v4753_v63, %s5090_s4 }
 0xd11   :  { %v5841_v46 = vpop.permute.xlu1 %2023  ;;  %v5843_v35 = vpop.permute.xlu0 %2033 }
 0xd12   :  { %v4758_v4 = vpack.i.bf16 %v5841_v46, %v2022_v56 }
 0xd14   :  { %4759 = vrot.lane.b32.xlu0 %v4758_v4, %s5090_s4 }
 0xd15   :  { %v5847_v47 = vpop.permute.xlu1 %2031  ;;  %v4740_v21 = vpop.permute.xlu0 %4739 }
 0xd16   :  { %v4763_v20 = vpack.i.bf16 %v5847_v47, %v5833_v28  ;;  %v4742_v29 = vunpack.i.h.bf16 %v4740_v21  ;;  %v4741_v5 = vunpack.i.l.bf16 %v4740_v21 }
 0xd18   :  { %v4550_v44 = vpack.c.bf16 %v4742_v29, %v4741_v5  ;;  %4764 = vrot.lane.b32.xlu1 %v4763_v20, %s5090_s4 }
 0xd19   :  { %v5852_v34 = vpop.permute.xlu1 %2027  ;;  %v4750_v40 = vpop.permute.xlu0 %4749 }
 0xd1a   :  { %v4768_v10 = vpack.i.bf16 %v5852_v34, %v5837_v61  ;;  %v4752_v42 = vunpack.i.h.bf16 %v4750_v40  ;;  %v4751_v1 = vunpack.i.l.bf16 %v4750_v40  ;;  %4552 = vmatprep.subr.msk.bf16.mxu1 %vm5337_vm2, %v4550_v44 }
 0xd1b   :  { %4555 = vmatpush3.bf16.xpose.msk.msra.mxu1 %vm5337_vm2, %v4550_v44 }
 0xd1c   :  { %v4556_v13 = vpack.c.bf16 %v4752_v42, %v4751_v1  ;;  %4769 = vrot.lane.b32.xlu0 %v4768_v10, %s5090_s4 }
 0xd1d   :  { %v2036_v43 = vpop.permute.xlu1 %2035 }
 0xd1e   :  { %v4773_v55 = vpack.i.bf16 %v2036_v43, %v5843_v35  ;;  %4558 = vmatprep.subr.msk.bf16.mxu1 %vm5337_vm2, %v4556_v13 }
 0xd20   :  { %4774 = vrot.lane.b32.xlu1 %v4773_v55, %s5090_s4 }
 0xd23   :  { %4561 = vmatpush3.bf16.xpose.msk.msra.mxu1 %vm5337_vm2, %v4556_v13 }
 0xd2a   :  { %4311 = vmatmul.mubr.msk.f32.vlgmr.msra.gmra.mrb[36].mxu1 %vm341_vm1, %v5799_v51 }
 0xd2b   :  { %4313 = vmatprep.mubr.msk.f32.mxu1 %vm341_vm1, %v2001_v9 }
 0xd2e   :  { %4314 = vmatmul.mubr.msk.f32.gmra.mrb[38].mxu1 %vm341_vm1, %v2005_v17  ;;  %v5083_v17 = vld [vmem:[%s6279_s1] sm:$0xff] }
 0xd2f   :  { %4338 = vmatprep.mubr.msk.f32.mxu1 %vm341_vm1, %v2022_v56 }
 0xd78   :  { %v4745_v14 = vpop.permute.xlu1 %4744 }
 0xd79   :  { %v4747_v38 = vunpack.i.h.bf16 %v4745_v14  ;;  %v4746_v57 = vunpack.i.l.bf16 %v4745_v14 }
 0xd7b   :  { %v4562_v12 = vpack.c.bf16 %v4747_v38, %v4746_v57 }
 0xd7d   :  { %4564 = vmatprep.subr.msk.bf16.mxu0 %vm5337_vm2, %v4562_v12 }
 0xd7e   :  { %4567 = vmatpush3.bf16.xpose.msk.msra.mxu0 %vm5337_vm2, %v4562_v12 }
 0xd82   :  { %v4755_v48 = vpop.permute.xlu1 %4754 }
 0xd83   :  { %v4757_v36 = vunpack.i.h.bf16 %v4755_v48  ;;  %v4756_v50 = vunpack.i.l.bf16 %v4755_v48 }
 0xd85   :  { %v4568_v52 = vpack.c.bf16 %v4757_v36, %v4756_v50 }
 0xd86   :  { %v4760_v16 = vpop.permute.xlu0 %4759 }
 0xd87   :  { %v4762_v39 = vunpack.i.h.bf16 %v4760_v16  ;;  %v4761_v59 = vunpack.i.l.bf16 %v4760_v16  ;;  %4570 = vmatprep.subr.msk.bf16.mxu0 %vm5337_vm2, %v4568_v52 }
 0xd88   :  { %4573 = vmatpush3.bf16.xpose.msk.msra.mxu0 %vm5337_vm2, %v4568_v52 }
 0xd89   :  { %v4574_v32 = vpack.c.bf16 %v4762_v39, %v4761_v59 }
 0xd8a   :  { %v4765_v25 = vpop.permute.xlu1 %4764 }
 0xd8b   :  { %v4767_v45 = vunpack.i.h.bf16 %v4765_v25  ;;  %v4766_v58 = vunpack.i.l.bf16 %v4765_v25  ;;  %4576 = vmatprep.subr.msk.bf16.mxu1 %vm5337_vm2, %v4574_v32 }
 0xd8c   :  { %4579 = vmatpush3.bf16.xpose.msk.msra.mxu1 %vm5337_vm2, %v4574_v32 }
 0xd8d   :  { %v4586_v51 = vpack.c.bf16 %v4767_v45, %v4766_v58 }
 0xd8e   :  { %v4770_v62 = vpop.permute.xlu0 %4769 }
 0xd8f   :  { %v4772_v0 = vunpack.i.h.bf16 %v4770_v62  ;;  %v4771_v60 = vunpack.i.l.bf16 %v4770_v62  ;;  %4325 = vmatmul.mubr.msk.f32.vlgmr.msra.gmra.mrb[24].mxu0 %vm341_vm1, %v5829_v26  ;;  %4588 = vmatprep.subr.msk.bf16.mxu0 %vm5337_vm2, %v4586_v51  ;;  %v5084_v26 = vld [vmem:[%s6279_s1 + $0x18] sm:$0xff] }
 0xd90   :  { %4327 = vmatprep.mubr.msk.f32.mxu0 %vm341_vm1, %v2018_v27  ;;  %4591 = vmatpush3.bf16.xpose.msk.msra.mxu0 %vm5337_vm2, %v4586_v51 }
 0xd91   :  { %v4580_v6 = vpack.c.bf16 %v4772_v0, %v4771_v60 }
 0xd92   :  { %v4775_v9 = vpop.permute.xlu1 %4774 }
 0xd93   :  { %v4777_v23 = vunpack.i.h.bf16 %v4775_v9  ;;  %v4776_v3 = vunpack.i.l.bf16 %v4775_v9  ;;  %4328 = vmatmul.mubr.msk.f32.gmra.mrb[26].mxu0 %vm341_vm1, %v5835_v33  ;;  %4582 = vmatprep.subr.msk.bf16.mxu1 %vm5337_vm2, %v4580_v6 }
 0xd94   :  { %4585 = vmatpush3.bf16.xpose.msk.msra.mxu1 %vm5337_vm2, %v4580_v6  ;;  %4352 = vmatprep.mubr.msk.f32.mxu0 %vm341_vm1, %v5833_v28  ;;  %v5085_v28 = vld [vmem:[%s6279_s1 + $0x10] sm:$0xff] }
 0xd95   :  { %v4592_v8 = vpack.c.bf16 %v4777_v23, %v4776_v3  ;;  %4599 = vmatprep.subr.bf16.mxu1 %v5805_v7 }
 0xd97   :  { %4594 = vmatprep.subr.msk.bf16.mxu0 %vm5337_vm2, %v4592_v8 }
 0xd98   :  { %4597 = vmatpush3.bf16.xpose.msk.msra.mxu0 %vm5337_vm2, %v4592_v8 }
 0xd9b   :  { %4339 = vmatmul.mubr.msk.f32.vlgmr.msra.gmra.mrb[40].mxu1 %vm341_vm1, %v5841_v46 }
 0xd9c   :  { %4341 = vmatprep.mubr.msk.f32.mxu1 %vm341_vm1, %v5837_v61  ;;  %4601 = vmatpush3.bf16.msra.mxu1 %v5805_v7  ;;  %v5082_v7 = vld [vmem:[%s6279_s1 + $0x8] sm:$0xff] }
 0xd9d   :  { %4603 = vmatprep.subr.bf16.mxu1 %v5812_v30 }
 0xd9f   :  { %4342 = vmatmul.mubr.msk.f32.gmra.mrb[42].mxu1 %vm341_vm1, %v5852_v34  ;;  %4353 = vmatmul.mubr.msk.f32.vlgmr.msra.gmra.mrb[28].mxu0 %vm341_vm1, %v5847_v47 }
 0xda0   :  { %4355 = vmatprep.mubr.msk.f32.mxu0 %vm341_vm1, %v5843_v35  ;;  %4605 = vmatpush3.bf16.msra.mxu1 %v5812_v30 }
 0xda3   :  { %4356 = vmatmul.mubr.msk.f32.gmra.mrb[30].mxu0 %vm341_vm1, %v2036_v43 }
 0xdfd   :  { %v4312_v53 = vpop.f32.mrb[36].mxu1 }
 0xdfe   :  { %v5921_v11 = vadd.f32 %v5082_v7, %v4312_v53  ;;  %v2167_v15 = vpop.f32.mrb[37].mxu1 }
 0xdff   :  { %v5926_v37 = vadd.f32 %v5083_v17, %v2167_v15 }
 0xe00   :  { %v2516_v19 = vsel %vm770_vm3, %v5921_v11, -inf }
 0xe01   :  { %2517 = vmax.xlane.f32.xlu1 %v2516_v19  ;;  %v4315_v30 = vpop.f32.mrb[38].mxu1  ;;  %v2513_v24 = vsel %vm770_vm3, %v5926_v37, -inf }
 0xe02   :  { %v5935_v54 = vadd.f32 %v5084_v26, %v4315_v30  ;;  %v2177_v56 = vpop.f32.mrb[39].mxu1  ;;  %2514 = vmax.xlane.f32.xlu0 %v2513_v24 }
 0xe03   :  { %v5942_v33 = vadd.f32 %v5085_v28, %v2177_v56 }
 0xe04   :  { %v2522_v27 = vsel %vm770_vm3, %v5935_v54, -inf }
 0xe05   :  { %v2519_v61 = vsel %vm770_vm3, %v5942_v33, -inf }
 0xe06   :  { %2523 = vmax.xlane.f32.xlu0 %v2522_v27 }
 0xe0a   :  { %2520 = vmax.xlane.f32.xlu0 %v2519_v61 }
 0xe62   :  { %v4326_v63 = vpop.f32.mrb[24].mxu0 }
 0xe63   :  { %v5946_v46 = vadd.f32 %v5082_v7, %v4326_v63  ;;  %v2276_v35 = vpop.f32.mrb[25].mxu0 }
 0xe64   :  { %v5948_v4 = vadd.f32 %v5083_v17, %v2276_v35 }
 0xe65   :  { %v2528_v47 = vsel %vm770_vm3, %v5946_v46, -inf }
 0xe66   :  { %v4329_v21 = vpop.f32.mrb[26].mxu0  ;;  %2529 = vmax.xlane.f32.xlu1 %v2528_v47  ;;  %v2525_v20 = vsel %vm770_vm3, %v5948_v4, -inf }
 0xe67   :  { %v2286_v29 = vpop.f32.mrb[27].mxu0  ;;  %2526 = vmax.xlane.f32.xlu0 %v2525_v20  ;;  %v5958_v10 = vadd.f32 %v5084_v26, %v4329_v21 }
 0xe68   :  { %v5962_v1 = vadd.f32 %v5085_v28, %v2286_v29 }
 0xe69   :  { %v2534_v12 = vsel %vm770_vm3, %v5958_v10, -inf }
 0xe6a   :  { %v2531_v50 = vsel %vm770_vm3, %v5962_v1, -inf }
 0xe6e   :  { %v4340_v5 = vpop.f32.mrb[40].mxu1 }
 0xe6f   :  { %v5954_v44 = vadd.f32 %v5082_v7, %v4340_v5  ;;  %v2385_v34 = vpop.f32.mrb[41].mxu1 }
 0xe70   :  { %v5956_v40 = vadd.f32 %v5083_v17, %v2385_v34 }
 0xe71   :  { %v2540_v42 = vsel %vm770_vm3, %v5954_v44, -inf }
 0xe72   :  { %v4354_v13 = vpop.f32.mrb[28].mxu0  ;;  %2541 = vmax.xlane.f32.xlu1 %v2540_v42  ;;  %v4343_v43 = vpop.f32.mrb[42].mxu1  ;;  %v2537_v55 = vsel %vm770_vm3, %v5956_v40, -inf }
 0xe73   :  { %v2395_v14 = vpop.f32.mrb[43].mxu1  ;;  %v2494_v38 = vpop.f32.mrb[29].mxu0  ;;  %2538 = vmax.xlane.f32.xlu0 %v2537_v55  ;;  %v5966_v57 = vadd.f32 %v5084_v26, %v4343_v43  ;;  %v5974_v16 = vadd.f32 %v5082_v7, %v4354_v13 }
 0xe74   :  { %v5970_v48 = vadd.f32 %v5085_v28, %v2395_v14  ;;  %v5978_v59 = vadd.f32 %v5083_v17, %v2494_v38 }
 0xe75   :  { %v2546_v39 = vsel %vm770_vm3, %v5966_v57, -inf  ;;  %v2552_v45 = vsel %vm770_vm3, %v5974_v16, -inf }
 0xe76   :  { %v4357_v36 = vpop.f32.mrb[30].mxu0  ;;  %2535 = vmax.xlane.f32.xlu1 %v2534_v12  ;;  %v2543_v32 = vsel %vm770_vm3, %v5970_v48, -inf  ;;  %v2549_v51 = vsel %vm770_vm3, %v5978_v59, -inf }
 0xe77   :  { %v2504_v52 = vpop.f32.mrb[31].mxu0  ;;  %2532 = vmax.xlane.f32.xlu0 %v2531_v50  ;;  %v5982_v25 = vadd.f32 %v5084_v26, %v4357_v36 }
 0xe78   :  { %v5986_v58 = vadd.f32 %v5085_v28, %v2504_v52 }
 0xe79   :  { %v2558_v62 = vsel %vm770_vm3, %v5982_v25, -inf }
 0xe7a   :  { %2547 = vmax.xlane.f32.xlu1 %v2546_v39  ;;  %v2555_v0 = vsel %vm770_vm3, %v5986_v58, -inf }
 0xe7b   :  { %2544 = vmax.xlane.f32.xlu0 %v2543_v32 }
 0xe7e   :  { %2553 = vmax.xlane.f32.xlu1 %v2552_v45 }
 0xe7f   :  { %2550 = vmax.xlane.f32.xlu0 %v2549_v51 }
 0xe82   :  { %2559 = vmax.xlane.f32.xlu1 %v2558_v62 }
 0xe83   :  { %2556 = vmax.xlane.f32.xlu0 %v2555_v0 }
 0xe8e   :  { %v2518_v3 = vpop.xlane.xlu1 %2517 }
 0xe8f   :  { %v2515_v60 = vpop.xlane.xlu0 %2514  ;;  %v2562_v7 = vsub.f32 %v5921_v11, %v2518_v3 }
 0xe90   :  { %v2561_v9 = vsub.f32 %v5926_v37, %v2515_v60 }
 0xe91   :  { %v2579_v17 = vmul.f32 1.442695, %v2562_v7 }
 0xe92   :  { %v2577_v8 = vmul.f32 1.442695, %v2561_v9 }
 0xe93   :  { %4784 = vrot.lane.b32.xlu1 %v5814_v2, %s5087_s30  ;;  %v2524_v6 = vpop.xlane.xlu0 %2523 }
 0xe94   :  { %4994 = vpow2.f32 %v2577_v8  ;;  %v2564_v19 = vsub.f32 %v5935_v54, %v2524_v6 }
 0xe96   :  { %v2583_v30 = vmul.f32 1.442695, %v2564_v19 }
 0xe97   :  { %4789 = vrot.lane.b32.xlu1 %v5807_v31, %s5088_s0  ;;  %v2521_v23 = vpop.xlane.xlu0 %2520 }
 0xe98   :  { %v2563_v53 = vsub.f32 %v5942_v33, %v2521_v23 }
 0xe99   :  { %4779 = vrot.lane.b32.xlu0 %v5807_v31, %s5087_s30 }
 0xe9a   :  { %v2581_v15 = vmul.f32 1.442695, %v2563_v53 }
 0xe9b   :  { %4794 = vrot.lane.b32.xlu1 %v5807_v31, %s5089_s19 }
 0xe9c   :  { %4996 = vpow2.f32 %v2581_v15 }
 0xe9d   :  { %4998 = vpow2.f32 %v2579_v17 }
 0xe9e   :  { %v6006_v24 = vpop.eup %4994  ;;  %5000 = vpow2.f32 %v2583_v30 }
 0xe9f   :  { %v2609_v31 = vsel %vm770_vm3, %v6006_v24, 0.0 }
 0xea6   :  { %v6010_v37 = vpop.eup %4996 }
 0xea7   :  { %v6012_v26 = vpop.eup %4998  ;;  %v2615_v11 = vsel %vm770_vm3, %v6010_v37, 0.0 }
 0xea8   :  { %v2612_v54 = vsel %vm770_vm3, %v6012_v26, 0.0  ;;  %v6018_v56 = vpop.eup %5000 }
 0xea9   :  { %v2618_v27 = vsel %vm770_vm3, %v6018_v56, 0.0 }
 0xeb8   :  { %2610 = vadd.xlane.f32.xlu0 %v2609_v31 }
 0xebc   :  { %2616 = vadd.xlane.f32.xlu0 %v2615_v11 }
 0xebf   :  { %2613 = vadd.xlane.f32.xlu1 %v2612_v54 }
 0xec3   :  { %2619 = vadd.xlane.f32.xlu1 %v2618_v27 }
 0xef3   :  { %v2530_v28 = vpop.xlane.xlu1 %2529 }
 0xef4   :  { %v2566_v33 = vsub.f32 %v5946_v46, %v2530_v28  ;;  %v2527_v61 = vpop.xlane.xlu0 %2526 }
 0xef5   :  { %v2565_v63 = vsub.f32 %v5948_v4, %v2527_v61 }
 0xef6   :  { %v2587_v35 = vmul.f32 1.442695, %v2566_v33 }
 0xef7   :  { %v2585_v47 = vmul.f32 1.442695, %v2565_v63 }
 0xef8   :  { %5002 = vpow2.f32 %v2587_v35 }
 0xef9   :  { %5004 = vpow2.f32 %v2585_v47 }
 0xeff   :  { %v2542_v21 = vpop.xlane.xlu1 %2541 }
 0xf00   :  { %v2570_v20 = vsub.f32 %v5954_v44, %v2542_v21  ;;  %v2539_v29 = vpop.xlane.xlu0 %2538 }
 0xf01   :  { %v2569_v5 = vsub.f32 %v5956_v40, %v2539_v29 }
 0xf02   :  { %v6026_v34 = vpop.eup %5002  ;;  %v2595_v42 = vmul.f32 1.442695, %v2570_v20 }
 0xf03   :  { %v6028_v13 = vpop.eup %5004  ;;  %v2593_v43 = vmul.f32 1.442695, %v2569_v5  ;;  %v2536_v46 = vpop.xlane.xlu1 %2535  ;;  %v2624_v4 = vsel %vm770_vm3, %v6026_v34, 0.0 }
 0xf04   :  { %5006 = vpow2.f32 %v2595_v42  ;;  %v2568_v55 = vsub.f32 %v5958_v10, %v2536_v46  ;;  %2625 = vadd.xlane.f32.xlu1 %v2624_v4  ;;  %v2533_v14 = vpop.xlane.xlu0 %2532  ;;  %v2621_v44 = vsel %vm770_vm3, %v6028_v13, 0.0 }
 0xf05   :  { %5008 = vpow2.f32 %v2593_v43  ;;  %v2567_v40 = vsub.f32 %v5962_v1, %v2533_v14  ;;  %2622 = vadd.xlane.f32.xlu0 %v2621_v44 }
 0xf06   :  { %v2591_v38 = vmul.f32 1.442695, %v2568_v55 }
 0xf07   :  { %v2589_v12 = vmul.f32 1.442695, %v2567_v40  ;;  %v2548_v36 = vpop.xlane.xlu1 %2547 }
 0xf08   :  { %5010 = vpow2.f32 %v2591_v38  ;;  %v2572_v50 = vsub.f32 %v5966_v57, %v2548_v36  ;;  %v2545_v52 = vpop.xlane.xlu0 %2544 }
 0xf09   :  { %5012 = vpow2.f32 %v2589_v12  ;;  %v2571_v39 = vsub.f32 %v5970_v48, %v2545_v52 }
 0xf0a   :  { %v2599_v10 = vmul.f32 1.442695, %v2572_v50 }
 0xf0b   :  { %v2597_v32 = vmul.f32 1.442695, %v2571_v39  ;;  %v2554_v45 = vpop.xlane.xlu1 %2553 }
 0xf0c   :  { %5014 = vpow2.f32 %v2599_v10  ;;  %v2574_v51 = vsub.f32 %v5974_v16, %v2554_v45  ;;  %v2551_v62 = vpop.xlane.xlu0 %2550 }
 0xf0d   :  { %5016 = vpow2.f32 %v2597_v32  ;;  %v2573_v1 = vsub.f32 %v5978_v59, %v2551_v62 }
 0xf0e   :  { %v6040_v0 = vpop.eup %5006  ;;  %v2603_v60 = vmul.f32 1.442695, %v2574_v51 }
 0xf0f   :  { %v6042_v6 = vpop.eup %5008  ;;  %v2601_v57 = vmul.f32 1.442695, %v2573_v1  ;;  %v2560_v9 = vpop.xlane.xlu1 %2559  ;;  %v2636_v48 = vsel %vm770_vm3, %v6040_v0, 0.0 }
 0xf10   :  { %5018 = vpow2.f32 %v2603_v60  ;;  %v2576_v23 = vsub.f32 %v5982_v25, %v2560_v9  ;;  %2637 = vadd.xlane.f32.xlu1 %v2636_v48  ;;  %v2557_v3 = vpop.xlane.xlu0 %2556  ;;  %v2633_v16 = vsel %vm770_vm3, %v6042_v6, 0.0 }
 0xf11   :  { %5020 = vpow2.f32 %v2601_v57  ;;  %v2575_v59 = vsub.f32 %v5986_v58, %v2557_v3  ;;  %2634 = vadd.xlane.f32.xlu0 %v2633_v16 }
 0xf12   :  { %v6050_v8 = vpop.eup %5010  ;;  %v2607_v53 = vmul.f32 1.442695, %v2576_v23 }
 0xf13   :  { %v6052_v7 = vpop.eup %5012  ;;  %v2605_v15 = vmul.f32 1.442695, %v2575_v59  ;;  %v4785_v17 = vpop.permute.xlu1 %4784  ;;  %v2630_v19 = vsel %vm770_vm3, %v6050_v8, 0.0 }
 0xf14   :  { %5022 = vpow2.f32 %v2607_v53  ;;  %2631 = vadd.xlane.f32.xlu1 %v2630_v19  ;;  %v4780_v25 = vpop.permute.xlu0 %4779  ;;  %v2627_v30 = vsel %vm770_vm3, %v6052_v7, 0.0  ;;  %v4787_v52 = vunpack.i.h.bf16 %v4785_v17  ;;  %v4786_v39 = vunpack.i.l.bf16 %v4785_v17 }
 0xf15   :  { %5024 = vpow2.f32 %v2605_v15  ;;  %v4782_v31 = vunpack.i.h.bf16 %v4780_v25  ;;  %v4781_v58 = vunpack.i.l.bf16 %v4780_v25  ;;  %2628 = vadd.xlane.f32.xlu0 %v2627_v30 }
 0xf16   :  { %v6058_v11 = vpop.eup %5014  ;;  %v4610_v45 = vpack.c.bf16 %v4787_v52, %v4786_v39 }
 0xf17   :  { %v6060_v54 = vpop.eup %5016  ;;  %v4606_v27 = vpack.c.bf16 %v4782_v31, %v4781_v58  ;;  %v4790_v28 = vpop.permute.xlu1 %4789  ;;  %v2642_v33 = vsel %vm770_vm3, %v6058_v11, 0.0 }
 0xf18   :  { %v4792_v61 = vunpack.i.h.bf16 %v4790_v28  ;;  %v4791_v63 = vunpack.i.l.bf16 %v4790_v28  ;;  %2643 = vadd.xlane.f32.xlu1 %v2642_v33  ;;  %v2639_v35 = vsel %vm770_vm3, %v6060_v54, 0.0 }
 0xf19   :  { %2640 = vadd.xlane.f32.xlu0 %v2639_v35  ;;  %4607 = vmatprep.subr.bf16.mxu1 %v4606_v27 }
 0xf1a   :  { %v6066_v47 = vpop.eup %5018  ;;  %v4614_v21 = vpack.c.bf16 %v4792_v61, %v4791_v63 }
 0xf1b   :  { %v6068_v20 = vpop.eup %5020  ;;  %v2648_v29 = vsel %vm770_vm3, %v6066_v47, 0.0  ;;  %v4795_v14 = vpop.permute.xlu1 %4794 }
 0xf1c   :  { %4615 = vmatprep.subr.bf16.mxu0 %v4614_v21  ;;  %2649 = vadd.xlane.f32.xlu1 %v2648_v29  ;;  %v2645_v5 = vsel %vm770_vm3, %v6068_v20, 0.0  ;;  %v4797_v51 = vunpack.i.h.bf16 %v4795_v14  ;;  %v4796_v62 = vunpack.i.l.bf16 %v4795_v14 }
 0xf1d   :  { %4617 = vmatpush3.bf16.msra.mxu0 %v4614_v21  ;;  %2646 = vadd.xlane.f32.xlu0 %v2645_v5 }
 0xf1e   :  { %v6074_v42 = vpop.eup %5022  ;;  %v4622_v60 = vpack.c.bf16 %v4797_v51, %v4796_v62  ;;  %v4880_v62 = vld [vmem:[%s6280_s6 + $0x30] sm:$0xff]  }
 0xf1f   :  { %v6076_v43 = vpop.eup %5024  ;;  %v2654_v46 = vsel %vm770_vm3, %v6074_v42, 0.0 }
 0xf20   :  { %2655 = vadd.xlane.f32.xlu1 %v2654_v46  ;;  %v2651_v4 = vsel %vm770_vm3, %v6076_v43, 0.0 }
 0xf21   :  { %2652 = vadd.xlane.f32.xlu0 %v2651_v4 }
 0xf31   :  { %4804 = vrot.lane.b32.xlu1 %v5814_v2, %s5089_s19 }
 0xf37   :  { %4799 = vrot.lane.b32.xlu0 %v5814_v2, %s5088_s0 }
 0xf45   :  { %v2611_v55 = vpop.xlane.xlu0 %2610 }
 0xf46   :  { %5026 = vrcp.f32 %v2611_v55 }
 0xf49   :  { %v2617_v44 = vpop.xlane.xlu0 %2616 }
 0xf4a   :  { %5028 = vrcp.f32 %v2617_v44 }
 0xf4c   :  { %v2614_v40 = vpop.xlane.xlu1 %2613 }
 0xf4d   :  { %5030 = vrcp.f32 %v2614_v40 }
 0xf50   :  { %v5027_v38 = vpop.eup %5026  ;;  %v2620_v12 = vpop.xlane.xlu1 %2619 }
 0xf51   :  { %5032 = vrcp.f32 %v2620_v12  ;;  %v2673_v36 = vmul.f32 %v5027_v38, %v6006_v24 }
 0xf53   :  { %4366 = vmatprep.mubr.msk.f32.mxu1 %vm770_vm3, %v2673_v36 }
 0xf54   :  { %v5029_v50 = vpop.eup %5028 }
 0xf55   :  { %v2675_v32 = vmul.f32 %v5029_v50, %v6010_v37 }
 0xf57   :  { %v5031_v10 = vpop.eup %5030 }
 0xf58   :  { %v2674_v2 = vmul.f32 %v5031_v10, %v6012_v26 }
 0xf5a   :  { %4367 = vmatmul.mubr.msk.f32.vlgmr.msra.gmra.mrb[44].mxu1 %vm770_vm3, %v2674_v2 }
 0xf5b   :  { %v5033_v1 = vpop.eup %5032  ;;  %4609 = vmatpush3.bf16.msra.mxu1 %v4606_v27  ;;  %4369 = vmatprep.mubr.msk.f32.mxu1 %vm770_vm3, %v2675_v32  ;;  %v4878_v32 = vld [vmem:[%s6280_s6 + $0x20] sm:$0xff]  }
 0xf5c   :  { %4611 = vmatprep.subr.bf16.mxu1 %v4610_v45  ;;  %v2676_v24 = vmul.f32 %v5033_v1, %v6018_v56 }
 0xf5e   :  { %4370 = vmatmul.mubr.msk.f32.gmra.mrb[46].mxu1 %vm770_vm3, %v2676_v24  ;;  %v4881_v24 = vld [vmem:[%s6280_s6 + $0x38] sm:$0xff]  }
 0xf5f   :  { %4613 = vmatpush3.bf16.msra.mxu1 %v4610_v45  ;;  %v4879_v45 = vld [vmem:[%s6280_s6 + $0x28] sm:$0xff]  }
 0xf60   :  { %4623 = vmatprep.subr.bf16.mxu1 %v4622_v60 }
 0xf91   :  { %v2626_v26 = vpop.xlane.xlu1 %2625 }
 0xf92   :  { %5034 = vrcp.f32 %v2626_v26  ;;  %v2623_v37 = vpop.xlane.xlu0 %2622 }
 0xf93   :  { %5036 = vrcp.f32 %v2623_v37 }
 0xf9c   :  { %v5035_v57 = vpop.eup %5034 }
 0xf9d   :  { %v5037_v9 = vpop.eup %5036  ;;  %v2638_v48 = vpop.xlane.xlu1 %2637  ;;  %v2678_v16 = vmul.f32 %v5035_v57, %v6026_v34 }
 0xf9e   :  { %v2635_v23 = vpop.xlane.xlu0 %2634  ;;  %v2677_v3 = vmul.f32 %v5037_v9, %v6028_v13 }
 0xf9f   :  { %5038 = vrcp.f32 %v2635_v23 }
 0xfa0   :  { %4380 = vmatprep.mubr.msk.f32.mxu1 %vm770_vm3, %v2677_v3 }
 0xfa1   :  { %v2632_v56 = vpop.xlane.xlu1 %2631  ;;  %4381 = vmatmul.mubr.msk.f32.vlgmr.msra.gmra.mrb[48].mxu1 %vm770_vm3, %v2678_v16 }
 0xfa2   :  { %5040 = vrcp.f32 %v2632_v56  ;;  %4625 = vmatpush3.bf16.msra.mxu1 %v4622_v60  ;;  %v2629_v59 = vpop.xlane.xlu0 %2628 }
 0xfa3   :  { %5042 = vrcp.f32 %v2629_v59 }
 0xfa5   :  { %v2644_v53 = vpop.xlane.xlu1 %2643 }
 0xfa6   :  { %v2641_v15 = vpop.xlane.xlu0 %2640 }
 0xfa9   :  { %v5039_v17 = vpop.eup %5038  ;;  %v2650_v19 = vpop.xlane.xlu1 %2649 }
 0xfaa   :  { %5044 = vrcp.f32 %v2650_v19  ;;  %v2647_v25 = vpop.xlane.xlu0 %2646  ;;  %v2681_v13 = vmul.f32 %v5039_v17, %v6042_v6 }
 0xfab   :  { %5046 = vrcp.f32 %v2647_v25 }
 0xfac   :  { %v5041_v34 = vpop.eup %5040  ;;  %5048 = vrcp.f32 %v2638_v48  ;;  %4394 = vmatprep.mubr.msk.f32.mxu0 %vm770_vm3, %v2681_v13 }
 0xfad   :  { %v5043_v30 = vpop.eup %5042  ;;  %5050 = vrcp.f32 %v2641_v15  ;;  %v2656_v31 = vpop.xlane.xlu1 %2655  ;;  %v2680_v28 = vmul.f32 %v5041_v34, %v6050_v8 }
 0xfae   :  { %5052 = vrcp.f32 %v2656_v31  ;;  %v2653_v58 = vpop.xlane.xlu0 %2652  ;;  %v2679_v27 = vmul.f32 %v5043_v30, %v6052_v7 }
 0xfaf   :  { %5054 = vrcp.f32 %v2653_v58 }
 0xfb0   :  { %5056 = vrcp.f32 %v2644_v53  ;;  %4383 = vmatprep.mubr.msk.f32.mxu1 %vm770_vm3, %v2679_v27 }
 0xfb1   :  { %v4805_v33 = vpop.permute.xlu1 %4804  ;;  %4384 = vmatmul.mubr.msk.f32.gmra.mrb[50].mxu1 %vm770_vm3, %v2680_v28 }
 0xfb2   :  { %v4807_v6 = vunpack.i.h.bf16 %v4805_v33  ;;  %v4806_v61 = vunpack.i.l.bf16 %v4805_v33  ;;  %v4800_v63 = vpop.permute.xlu0 %4799 }
 0xfb3   :  { %v4802_v35 = vunpack.i.h.bf16 %v4800_v63  ;;  %v4801_v21 = vunpack.i.l.bf16 %v4800_v63 }
 0xfb4   :  { %v5045_v29 = vpop.eup %5044  ;;  %v4626_v5 = vpack.c.bf16 %v4807_v6, %v4806_v61 }
 0xfb5   :  { %v5047_v46 = vpop.eup %5046  ;;  %v4618_v4 = vpack.c.bf16 %v4802_v35, %v4801_v21  ;;  %v2686_v44 = vmul.f32 %v5045_v29, %v6066_v47 }
 0xfb6   :  { %v5049_v55 = vpop.eup %5048  ;;  %4627 = vmatprep.subr.bf16.mxu1 %v4626_v5  ;;  %v2685_v7 = vmul.f32 %v5047_v46, %v6068_v20 }
 0xfb7   :  { %v5051_v8 = vpop.eup %5050  ;;  %4619 = vmatprep.subr.bf16.mxu0 %v4618_v4  ;;  %4629 = vmatpush3.bf16.msra.mxu1 %v4626_v5  ;;  %v2682_v38 = vmul.f32 %v5049_v55, %v6040_v0 }
 0xfb8   :  { %v5053_v14 = vpop.eup %5052  ;;  %4621 = vmatpush3.bf16.msra.mxu0 %v4618_v4  ;;  %4408 = vmatprep.mubr.msk.f32.mxu1 %vm770_vm3, %v2685_v7  ;;  %v2683_v36 = vmul.f32 %v5051_v8, %v6060_v54 }
 0xfb9   :  { %v5055_v40 = vpop.eup %5054  ;;  %v2688_v47 = vmul.f32 %v5053_v14, %v6074_v42  ;;  %4414 = vmatprep.subr.bf16.mxu0 %v4878_v32 }
 0xfba   :  { %v5057_v12 = vpop.eup %5056  ;;  %4409 = vmatmul.mubr.msk.f32.vlgmr.msra.gmra.mrb[52].mxu1 %vm770_vm3, %v2686_v44  ;;  %v2687_v50 = vmul.f32 %v5055_v40, %v6076_v43 }
 0xfbb   :  { %4395 = vmatmul.mubr.msk.f32.vlgmr.msra.gmra.mrb[32].mxu0 %vm770_vm3, %v2682_v38  ;;  %v2684_v20 = vmul.f32 %v5057_v12, %v6058_v11 }
 0xfbc   :  { %4397 = vmatprep.mubr.msk.f32.mxu0 %vm770_vm3, %v2683_v36  ;;  %4411 = vmatprep.mubr.msk.f32.mxu1 %vm770_vm3, %v2687_v50 }
 0xfbd   :  { %4415 = vmatpush3.bf16.msra.mxu0 %v4878_v32 }
 0xfbe   :  { %4412 = vmatmul.mubr.msk.f32.gmra.mrb[54].mxu1 %vm770_vm3, %v2688_v47  ;;  %4416 = vmatprep.subr.bf16.mxu0 %v4879_v45  ;;  %v3904_v47 = vld [vmem:[%s6281_s7 + $0x1] ss:$0 sm:$0xff] }
 0xfbf   :  { %4398 = vmatmul.mubr.msk.f32.gmra.mrb[34].mxu0 %vm770_vm3, %v2684_v20 }
 0xfc1   :  { %4417 = vmatpush3.bf16.msra.mxu0 %v4879_v45 }
 0xfc2   :  { %4418 = vmatprep.subr.bf16.mxu0 %v4880_v62 }
 0xfc5   :  { %4419 = vmatpush3.bf16.msra.mxu0 %v4880_v62 }
 0xfc6   :  { %4420 = vmatprep.subr.bf16.mxu0 %v4881_v24 }
 0xfc9   :  { %4421 = vmatpush3.bf16.msra.mxu0 %v4881_v24 }
0x102d   :  { %v4368_v0 = vpop.f32.mrb[44].mxu1 }
0x102e   :  { %v2767_v52 = vpop.f32.mrb[45].mxu1 }
0x1031   :  { %v4371_v39 = vpop.f32.mrb[46].mxu1 }
0x1032   :  { %v2777_v54 = vpop.f32.mrb[47].mxu1 }
0x1074   :  { %v4382_v10 = vpop.f32.mrb[48].mxu1 }
0x1075   :  { %v2864_v43 = vpop.f32.mrb[49].mxu1 }
0x1076   :  { %v4808_v2 = vpack.i.bf16 %v4382_v10, %v2864_v43 }
0x1078   :  { %4809 = vrot.lane.b32.xlu0 %v4808_v2, %s5091_s28 }
0x1084   :  { %v4385_v11 = vpop.f32.mrb[50].mxu1 }
0x1085   :  { %v2874_v42 = vpop.f32.mrb[51].mxu1 }
0x1086   :  { %v4818_v51 = vpack.i.bf16 %v4385_v11, %v2874_v42 }
0x1088   :  { %4819 = vrot.lane.b32.xlu1 %v4818_v51, %s5091_s28  ;;  %s6307_s28 = smov 32  }
0x108d   :  { %v4410_v1 = vpop.f32.mrb[52].mxu1 }
0x108e   :  { %v4396_v60 = vpop.f32.mrb[32].mxu0  ;;  %v3058_v26 = vpop.f32.mrb[53].mxu1 }
0x108f   :  { %v4828_v37 = vpack.i.bf16 %v4410_v1, %v3058_v26  ;;  %v2961_v57 = vpop.f32.mrb[33].mxu0 }
0x1090   :  { %v4813_v9 = vpack.i.bf16 %v4396_v60, %v2961_v57 }
0x1091   :  { %v4413_v48 = vpop.f32.mrb[54].mxu1 }
0x1092   :  { %v4399_v23 = vpop.f32.mrb[34].mxu0  ;;  %4814 = vrot.lane.b32.xlu0 %v4813_v9, %s6307_s28  ;;  %v3068_v3 = vpop.f32.mrb[55].mxu1 }
0x1093   :  { %v4833_v16 = vpack.i.bf16 %v4413_v48, %v3068_v3  ;;  %v2971_v56 = vpop.f32.mrb[35].mxu0 }
0x1094   :  { %v4823_v59 = vpack.i.bf16 %v4399_v23, %v2971_v56 }
0x1096   :  { %4824 = vrot.lane.b32.xlu1 %v4823_v59, %s6307_s28  ;;  %4829 = vrot.lane.b32.xlu0 %v4828_v37, %s6308_s20 }
0x109a   :  { %4834 = vrot.lane.b32.xlu1 %v4833_v16, %s6308_s20 }
0x10ea   :  { %v4810_v53 = vpop.permute.xlu0 %4809 }
0x10eb   :  { %v4812_v15 = vunpack.i.h.bf16 %v4810_v53  ;;  %v4811_v17 = vunpack.i.l.bf16 %v4810_v53 }
0x10ed   :  { %v3126_v30 = vsel %vm341_vm1, %v4368_v0, %v4812_v15  ;;  %v3125_v31 = vsel %vm341_vm1, %v2767_v52, %v4811_v17 }
0x10fa   :  { %v4820_v19 = vpop.permute.xlu1 %4819 }
0x10fb   :  { %v4822_v28 = vunpack.i.h.bf16 %v4820_v19  ;;  %v4821_v33 = vunpack.i.l.bf16 %v4820_v19 }
0x10fd   :  { %v3128_v7 = vsel %vm341_vm1, %v4371_v39, %v4822_v28  ;;  %v3127_v8 = vsel %vm341_vm1, %v2777_v54, %v4821_v33 }
0x1104   :  { %v4815_v25 = vpop.permute.xlu0 %4814 }
0x1105   :  { %v4817_v13 = vunpack.i.h.bf16 %v4815_v25  ;;  %v4816_v34 = vunpack.i.l.bf16 %v4815_v25 }
0x1107   :  { %v3129_v63 = vsel %vm770_vm3, %v3125_v31, %v4816_v34  ;;  %v3130_v35 = vsel %vm770_vm3, %v3126_v30, %v4817_v13  ;;  %v4882_v13 = vld [vmem:[%s6282_s10 + $0x20] sm:$0xff]   ;;  %v4883_v34 = vld [vmem:[%s6282_s10 + $0x28] sm:$0xff]   ;;  %v4884_v30 = vld [vmem:[%s6282_s10 + $0x30] sm:$0xff]  }
0x1108   :  { %v4825_v58 = vpop.permute.xlu1 %4824  ;;  %v4830_v27 = vpop.permute.xlu0 %4829  ;;  %4426 = vmatprep.subr.bf16.mxu1 %v4882_v13  ;;  %v4885_v31 = vld [vmem:[%s6282_s10 + $0x38] sm:$0xff]  }
0x1109   :  { %v4832_v6 = vunpack.i.h.bf16 %v4830_v27  ;;  %v4831_v61 = vunpack.i.l.bf16 %v4830_v27  ;;  %v4827_v21 = vunpack.i.h.bf16 %v4825_v58  ;;  %v4826_v29 = vunpack.i.l.bf16 %v4825_v58  ;;  %4427 = vmatpush3.bf16.msra.mxu1 %v4882_v13  ;;  %v4886_v58 = vld [vmem:[%s6283_s12 + $0x40] sm:$0xff]   ;;  %v4887_v27 = vld [vmem:[%s6283_s12 + $0x48] sm:$0xff]  }
0x110a   :  { %4428 = vmatprep.subr.bf16.mxu1 %v4883_v34  ;;  %4438 = vmatprep.subr.bf16.mxu0 %v4886_v58 }
0x110b   :  { %v3134_v5 = vsel %vm1391_vm4, %v3130_v35, %v4832_v6  ;;  %v3133_v46 = vsel %vm1391_vm4, %v3129_v63, %v4831_v61  ;;  %v3131_v40 = vsel %vm770_vm3, %v3127_v8, %v4826_v29  ;;  %v3132_v38 = vsel %vm770_vm3, %v3128_v7, %v4827_v21  ;;  %v3913_v8 = vld [vmem:[%s6284_s8 + $0x1] ss:$0 sm:$0xff] }
0x110c   :  { %v3148_v4 = vpack.c.bf16 %v3134_v5, %v3133_v46  ;;  %v4835_v55 = vpop.permute.xlu1 %4834 }
0x110d   :  { %v4837_v14 = vunpack.i.h.bf16 %v4835_v55  ;;  %v4836_v44 = vunpack.i.l.bf16 %v4835_v55  ;;  %4429 = vmatpush3.bf16.msra.mxu1 %v4883_v34 }
0x110e   :  { %4422 = vmatprep.mubr.msk.bf16.mxu0 %vm66_vm0, %v3148_v4  ;;  %4430 = vmatprep.subr.bf16.mxu1 %v4884_v30 }
0x110f   :  { %v3136_v12 = vsel %vm1391_vm4, %v3132_v38, %v4837_v14  ;;  %v3135_v36 = vsel %vm1391_vm4, %v3131_v40, %v4836_v44 }
0x1110   :  { %v3149_v50 = vpack.c.bf16 %v3136_v12, %v3135_v36  ;;  %v3914_v36 = vld [vmem:[%s6285_s9 + $0x1] ss:$0 sm:$0xff] }
0x1111   :  { %4431 = vmatpush3.bf16.msra.mxu1 %v4884_v30 }
0x1112   :  { %4423 = vmatmul.mubr.msk.bf16.vlgmr.msra.gmra.mrb[36].mxu0 %vm66_vm0, %v3149_v50  ;;  %4432 = vmatprep.subr.bf16.mxu1 %v4885_v31 }
0x1113   :  { %4439 = vmatpush3.bf16.msra.mxu0 %v4886_v58 }
0x1114   :  { %4440 = vmatprep.subr.bf16.mxu0 %v4887_v27 }
0x1115   :  { %4433 = vmatpush3.bf16.msra.mxu1 %v4885_v31 }
0x1117   :  { %4441 = vmatpush3.bf16.msra.mxu0 %v4887_v27 }
0x11e5   :  { %v4424_v20 = vpop.f32.mrb[36].mxu0 }
0x11e6   :  { %v3220_v0 = vpop.f32.mrb[37].mxu0  ;;  %v3229_v52 = vadd.f32 %v4424_v20, %v3904_v47 }
0x11e7   :  { %v3221_v39 = vadd.f32 %v3904_v47, %v3220_v0  ;;  %v4425_v54 = vpop.f32.mrb[38].mxu0 }
0x11e8   :  { %v3223_v10 = vpop.f32.mrb[39].mxu0  ;;  %v3237_v32 = vadd.f32 %v3229_v52, %v5787_v41  ;;  %v3232_v11 = vadd.f32 %v4425_v54, %v3904_v47 }
0x11e9   :  { %v3235_v43 = vadd.f32 %v3221_v39, %v5777_v22  ;;  %v3224_v2 = vadd.f32 %v3904_v47, %v3223_v10 }
0x11ea   :  { %v3238_v62 = vadd.f32 %v3232_v11, %v5785_v49  ;;  %v3249_v1 = vsel %vm66_vm0, %v3237_v32, 0.0 }
0x11eb   :  { %v3236_v42 = vadd.f32 %v3224_v2, %v5779_v18  ;;  %v3243_v45 = vsel %vm66_vm0, %v3235_v43, 0.0 }
0x11ec   :  { %3244 = vadd.xlane.f32.xlu0 %v3243_v45  ;;  %v3252_v24 = vsel %vm66_vm0, %v3238_v62, 0.0  ;;  %v4889_v45 = vld [vmem:[%s6283_s12 + $0x58] sm:$0xff]  }
0x11ed   :  { %v3246_v51 = vsel %vm66_vm0, %v3236_v42, 0.0 }
0x11ee   :  { %3247 = vadd.xlane.f32.xlu1 %v3246_v51  ;;  %v4890_v51 = vld [vmem:[%s6283_s12 + $0x60] sm:$0xff]  }
0x11f0   :  { %3250 = vadd.xlane.f32.xlu0 %v3249_v1  ;;  %v4892_v1 = vld [vmem:[%s6283_s12 + $0x70] sm:$0xff]  }
0x11f4   :  { %3253 = vadd.xlane.f32.xlu0 %v3252_v24  ;;  %v4893_v24 = vld [vmem:[%s6283_s12 + $0x78] sm:$0xff]  }
0x1279   :  { %v3245_v22 = vpop.xlane.xlu0 %3244 }
0x127a   :  { %v3255_v60 = vmul.f32 0.015625, %v3245_v22  ;;  %v3924_v22 = vld [vmem:[%s6286_s11 + $0x1] ss:$0 sm:$0xff] }
0x127b   :  { %v3248_v41 = vpop.xlane.xlu1 %3247 }
0x127c   :  { %v3259_v26 = vsub.f32 %v3235_v43, %v3255_v60  ;;  %v3256_v37 = vmul.f32 0.015625, %v3248_v41 }
0x127d   :  { %v3251_v18 = vpop.xlane.xlu0 %3250 }
0x127e   :  { %v3260_v57 = vsub.f32 %v3236_v42, %v3256_v37  ;;  %v3257_v9 = vmul.f32 0.015625, %v3251_v18  ;;  %v3263_v48 = vmul.f32 %v3259_v26, %v3259_v26  ;;  %v4888_v42 = vld [vmem:[%s6283_s12 + $0x50] sm:$0xff]  }
0x127f   :  { %4442 = vmatprep.subr.bf16.mxu0 %v4888_v42 }
0x1280   :  { %v3261_v23 = vsub.f32 %v3237_v32, %v3257_v9  ;;  %v3267_v3 = vsel %vm66_vm0, %v3263_v48, 0.0  ;;  %v3264_v16 = vmul.f32 %v3260_v57, %v3260_v57  ;;  %4443 = vmatpush3.bf16.msra.mxu0 %v4888_v42 }
0x1281   :  { %3268 = vadd.xlane.f32.xlu0 %v3267_v3  ;;  %v3254_v49 = vpop.xlane.xlu0 %3253  ;;  %4444 = vmatprep.subr.bf16.mxu0 %v4889_v45 }
0x1282   :  { %v3258_v56 = vmul.f32 0.015625, %v3254_v49  ;;  %v3270_v59 = vsel %vm66_vm0, %v3264_v16, 0.0  ;;  %v3265_v53 = vmul.f32 %v3261_v23, %v3261_v23 }
0x1283   :  { %3271 = vadd.xlane.f32.xlu1 %v3270_v59 }
0x1284   :  { %v3262_v15 = vsub.f32 %v3238_v62, %v3258_v56  ;;  %v3273_v17 = vsel %vm66_vm0, %v3265_v53, 0.0  ;;  %4445 = vmatpush3.bf16.msra.mxu0 %v4889_v45  ;;  %v4891_v62 = vld [vmem:[%s6283_s12 + $0x68] sm:$0xff]  }
0x1285   :  { %3274 = vadd.xlane.f32.xlu0 %v3273_v17  ;;  %4446 = vmatprep.subr.bf16.mxu0 %v4890_v51 }
0x1286   :  { %v3266_v19 = vmul.f32 %v3262_v15, %v3262_v15 }
0x1288   :  { %v3276_v25 = vsel %vm66_vm0, %v3266_v19, 0.0  ;;  %4447 = vmatpush3.bf16.msra.mxu0 %v4890_v51 }
0x1289   :  { %3277 = vadd.xlane.f32.xlu1 %v3276_v25  ;;  %4448 = vmatprep.subr.bf16.mxu0 %v4891_v62 }
0x128c   :  { %4449 = vmatpush3.bf16.msra.mxu0 %v4891_v62 }
0x128d   :  { %4450 = vmatprep.subr.bf16.mxu0 %v4892_v1 }
0x1290   :  { %4451 = vmatpush3.bf16.msra.mxu0 %v4892_v1 }
0x1291   :  { %4452 = vmatprep.subr.bf16.mxu0 %v4893_v24 }
0x1294   :  { %4453 = vmatpush3.bf16.msra.mxu0 %v4893_v24 }
0x130e   :  { %v3269_v28 = vpop.xlane.xlu0 %3268 }
0x130f   :  { %v3279_v33 = vmul.f32 0.015625, %v3269_v28 }
0x1310   :  { %v3272_v6 = vpop.xlane.xlu1 %3271 }
0x1311   :  { %v3283_v61 = vadd.f32 1e-05, %v3279_v33  ;;  %v3280_v63 = vmul.f32 0.015625, %v3272_v6 }
0x1312   :  { %v3275_v35 = vpop.xlane.xlu0 %3274 }
0x1313   :  { %5058 = vrsqrt.f32 %v3283_v61  ;;  %v3284_v21 = vadd.f32 1e-05, %v3280_v63  ;;  %v3281_v29 = vmul.f32 0.015625, %v3275_v35  ;;  %v3948_v35 = vld [vmem:[%s6287_s13 + $0x1] ss:$0 sm:$0xff] }
0x1315   :  { %5060 = vrsqrt.f32 %v3284_v21  ;;  %v3285_v5 = vadd.f32 1e-05, %v3281_v29 }
0x1316   :  { %v3278_v46 = vpop.xlane.xlu1 %3277 }
0x1317   :  { %5062 = vrsqrt.f32 %v3285_v5  ;;  %v3282_v4 = vmul.f32 0.015625, %v3278_v46 }
0x1319   :  { %v3286_v55 = vadd.f32 1e-05, %v3282_v4 }
0x131b   :  { %5064 = vrsqrt.f32 %v3286_v55 }
0x131d   :  { %v5059_v7 = vpop.eup %5058 }
0x131e   :  { %v3291_v14 = vmul.f32 %v5059_v7, %v3259_v26 }
0x131f   :  { %v5061_v44 = vpop.eup %5060 }
0x1320   :  { %v3292_v40 = vmul.f32 %v5061_v44, %v3260_v57  ;;  %v3301_v38 = vmul.f32 %v3913_v8, %v3291_v14 }
0x1321   :  { %v5063_v12 = vpop.eup %5062 }
0x1322   :  { %v3293_v50 = vmul.f32 %v5063_v12, %v3261_v23  ;;  %v3302_v47 = vmul.f32 %v3913_v8, %v3292_v40  ;;  %v6189_v20 = vadd.f32 %v3914_v36, %v3301_v38 }
0x1324   :  { %v6191_v0 = vadd.f32 %v3914_v36, %v3302_v47  ;;  %v3303_v39 = vmul.f32 %v3913_v8, %v3293_v50 }
0x1325   :  { %v5065_v52 = vpop.eup %5064 }
0x1326   :  { %v3294_v54 = vmul.f32 %v5065_v52, %v3262_v15  ;;  %v3326_v10 = vpack.c.bf16 %v6191_v0, %v6189_v20  ;;  %v6196_v2 = vadd.f32 %v3914_v36, %v3303_v39 }
0x1328   :  { %v3304_v43 = vmul.f32 %v3913_v8, %v3294_v54  ;;  %4434 = vmatprep.mubr.msk.bf16.mxu1 %vm66_vm0, %v3326_v10 }
0x132a   :  { %v6198_v32 = vadd.f32 %v3914_v36, %v3304_v43 }
0x132c   :  { %v3327_v11 = vpack.c.bf16 %v6198_v32, %v6196_v2 }
0x132e   :  { %4435 = vmatmul.mubr.msk.bf16.vlgmr.msra.gmra.mrb[56].mxu1 %vm66_vm0, %v3327_v11 }
0x1401   :  { %v4436_v60 = vpop.f32.mrb[56].mxu1 }
0x1402   :  { %v3407_v41 = vadd.f32 %v4436_v60, %v3924_v22  ;;  %v3398_v26 = vpop.f32.mrb[57].mxu1 }
0x1403   :  { %v3399_v37 = vadd.f32 %v3924_v22, %v3398_v26  ;;  %v4437_v18 = vpop.f32.mrb[58].mxu1 }
0x1404   :  { %v3419_v57 = vmul.f32 0.70710677, %v3407_v41  ;;  %v3410_v9 = vadd.f32 %v4437_v18, %v3924_v22  ;;  %v3401_v48 = vpop.f32.mrb[59].mxu1  ;;  %v3415_v25 = vmul.f32 0.5, %v3407_v41  ;;  %v4895_v18 = vld [vmem:[%s6290_s16 + $0x8] sm:$0xff]  }
0x1405   :  { %v3417_v23 = vmul.f32 0.70710677, %v3399_v37  ;;  %v3402_v3 = vadd.f32 %v3924_v22, %v3401_v48  ;;  %v3413_v30 = vmul.f32 0.5, %v3399_v37  ;;  %v4894_v37 = vld [vmem:[%s6290_s16] sm:$0xff]  }
0x1406   :  { %5066 = verf.f32 %v3419_v57  ;;  %v3420_v16 = vmul.f32 0.70710677, %v3410_v9  ;;  %v3416_v13 = vmul.f32 0.5, %v3410_v9  ;;  %4458 = vmatprep.subr.bf16.mxu1 %v4894_v37  ;;  %v4896_v57 = vld [vmem:[%s6290_s16 + $0x10] sm:$0xff]   ;;  %v4897_v9 = vld [vmem:[%s6290_s16 + $0x18] sm:$0xff]  }
0x1407   :  { %5068 = verf.f32 %v3417_v23  ;;  %v3418_v49 = vmul.f32 0.70710677, %v3402_v3  ;;  %v3414_v31 = vmul.f32 0.5, %v3402_v3  ;;  %4459 = vmatpush3.bf16.msra.mxu1 %v4894_v37 }
0x1408   :  { %5070 = verf.f32 %v3420_v16  ;;  %4460 = vmatprep.subr.bf16.mxu1 %v4895_v18 }
0x1409   :  { %5072 = verf.f32 %v3418_v49 }
0x140b   :  { %4461 = vmatpush3.bf16.msra.mxu1 %v4895_v18 }
0x140c   :  { %4462 = vmatprep.subr.bf16.mxu1 %v4896_v57 }
0x140f   :  { %4463 = vmatpush3.bf16.msra.mxu1 %v4896_v57 }
0x1410   :  { %v5067_v56 = vpop.eup %5066  ;;  %4464 = vmatprep.subr.bf16.mxu1 %v4897_v9 }
0x1411   :  { %v5069_v59 = vpop.eup %5068  ;;  %v3427_v53 = vadd.f32 1.0, %v5067_v56 }
0x1412   :  { %v5071_v15 = vpop.eup %5070  ;;  %v3425_v17 = vadd.f32 1.0, %v5069_v59 }
0x1413   :  { %v5073_v19 = vpop.eup %5072  ;;  %v3428_v34 = vadd.f32 1.0, %v5071_v15  ;;  %v3431_v27 = vmul.f32 %v3427_v53, %v3415_v25  ;;  %4465 = vmatpush3.bf16.msra.mxu1 %v4897_v9 }
0x1414   :  { %v3426_v58 = vadd.f32 1.0, %v5073_v19  ;;  %v3429_v33 = vmul.f32 %v3425_v17, %v3413_v30 }
0x1415   :  { %v3432_v28 = vmul.f32 %v3428_v34, %v3416_v13  ;;  %v3959_v34 = vld [vmem:[%s6288_s14 + $0x1] ss:$0 sm:$0xff] }
0x1416   :  { %v3430_v6 = vmul.f32 %v3426_v58, %v3414_v31 }
0x1417   :  { %v3453_v61 = vpack.c.bf16 %v3432_v28, %v3431_v27 }
0x1418   :  { %v3452_v63 = vpack.c.bf16 %v3430_v6, %v3429_v33  ;;  %v3960_v33 = vld [vmem:[%s6289_s15 + $0x1] ss:$0 sm:$0xff] }
0x141a   :  { %4454 = vmatprep.mubr.bf16.mxu0 %v3452_v63 }
0x141b   :  { %4455 = vmatmul.mubr.bf16.vlgmr.msra.gmra.mrb[40].mxu0 %v3453_v61 }
0x14ee   :  { %v4456_v21 = vpop.f32.mrb[40].mxu0 }
0x14ef   :  { %v3542_v29 = vpop.f32.mrb[41].mxu0  ;;  %v3551_v5 = vadd.f32 %v4456_v21, %v3948_v35 }
0x14f0   :  { %v3543_v46 = vadd.f32 %v3948_v35, %v3542_v29  ;;  %v4457_v4 = vpop.f32.mrb[42].mxu0 }
0x14f1   :  { %v3545_v55 = vpop.f32.mrb[43].mxu0  ;;  %v3554_v8 = vadd.f32 %v4457_v4, %v3948_v35  ;;  %v3559_v44 = vadd.f32 %v3551_v5, %v6196_v2 }
0x14f2   :  { %v3557_v7 = vadd.f32 %v3543_v46, %v6189_v20  ;;  %v3546_v14 = vadd.f32 %v3948_v35, %v3545_v55 }
0x14f3   :  { %v3560_v12 = vadd.f32 %v3554_v8, %v6198_v32  ;;  %v3571_v50 = vsel %vm66_vm0, %v3559_v44, 0.0 }
0x14f4   :  { %v3558_v40 = vadd.f32 %v3546_v14, %v6191_v0  ;;  %v3565_v38 = vsel %vm66_vm0, %v3557_v7, 0.0  ;;  %v3961_v14 = vld [vmem:[%s6291_s17] ss:$0 sm:$0xff] }
0x14f5   :  { %3566 = vadd.xlane.f32.xlu0 %v3565_v38  ;;  %v3574_v47 = vsel %vm66_vm0, %v3560_v12, 0.0 }
0x14f6   :  { %v3568_v36 = vsel %vm66_vm0, %v3558_v40, 0.0 }
0x14f7   :  { %3569 = vadd.xlane.f32.xlu1 %v3568_v36 }
0x14f9   :  { %3572 = vadd.xlane.f32.xlu0 %v3571_v50 }
0x14fb   :  { %3575 = vadd.xlane.f32.xlu1 %v3574_v47 }
0x1582   :  { %v3567_v20 = vpop.xlane.xlu0 %3566 }
0x1583   :  { %v3577_v52 = vmul.f32 0.015625, %v3567_v20 }
0x1584   :  { %v3570_v39 = vpop.xlane.xlu1 %3569 }
0x1585   :  { %v3581_v54 = vsub.f32 %v3557_v7, %v3577_v52  ;;  %v3578_v10 = vmul.f32 0.015625, %v3570_v39 }
0x1586   :  { %v3573_v0 = vpop.xlane.xlu0 %3572 }
0x1587   :  { %v3582_v43 = vsub.f32 %v3558_v40, %v3578_v10  ;;  %v3579_v2 = vmul.f32 0.015625, %v3573_v0  ;;  %v3585_v11 = vmul.f32 %v3581_v54, %v3581_v54 }
0x1588   :  { %v3576_v42 = vpop.xlane.xlu1 %3575 }
0x1589   :  { %v3583_v32 = vsub.f32 %v3559_v44, %v3579_v2  ;;  %v3580_v45 = vmul.f32 0.015625, %v3576_v42  ;;  %v3589_v51 = vsel %vm66_vm0, %v3585_v11, 0.0  ;;  %v3586_v62 = vmul.f32 %v3582_v43, %v3582_v43 }
0x158a   :  { %3590 = vadd.xlane.f32.xlu0 %v3589_v51 }
0x158b   :  { %v3584_v1 = vsub.f32 %v3560_v12, %v3580_v45  ;;  %v3592_v24 = vsel %vm66_vm0, %v3586_v62, 0.0  ;;  %v3587_v22 = vmul.f32 %v3583_v32, %v3583_v32 }
0x158c   :  { %3593 = vadd.xlane.f32.xlu1 %v3592_v24 }
0x158d   :  { %v3595_v60 = vsel %vm66_vm0, %v3587_v22, 0.0  ;;  %v3588_v41 = vmul.f32 %v3584_v1, %v3584_v1 }
0x158e   :  { %3596 = vadd.xlane.f32.xlu0 %v3595_v60 }
0x158f   :  { %v3598_v26 = vsel %vm66_vm0, %v3588_v41, 0.0 }
0x1590   :  { %3599 = vadd.xlane.f32.xlu1 %v3598_v26 }
0x1617   :  { %v3591_v48 = vpop.xlane.xlu0 %3590 }
0x1618   :  { %v3601_v23 = vmul.f32 0.015625, %v3591_v48 }
0x1619   :  { %v3594_v3 = vpop.xlane.xlu1 %3593 }
0x161a   :  { %v3605_v16 = vadd.f32 1e-05, %v3601_v23  ;;  %v3602_v49 = vmul.f32 0.015625, %v3594_v3 }
0x161b   :  { %v3597_v56 = vpop.xlane.xlu0 %3596 }
0x161c   :  { %5074 = vrsqrt.f32 %v3605_v16  ;;  %v3606_v59 = vadd.f32 1e-05, %v3602_v49  ;;  %v3603_v53 = vmul.f32 0.015625, %v3597_v56 }
0x161d   :  { %v3600_v15 = vpop.xlane.xlu1 %3599 }
0x161e   :  { %5076 = vrsqrt.f32 %v3606_v59  ;;  %v3607_v17 = vadd.f32 1e-05, %v3603_v53  ;;  %v3604_v19 = vmul.f32 0.015625, %v3600_v15 }
0x1620   :  { %5078 = vrsqrt.f32 %v3607_v17  ;;  %v3608_v25 = vadd.f32 1e-05, %v3604_v19 }
0x1622   :  { %5080 = vrsqrt.f32 %v3608_v25 }
0x1626   :  { %v5075_v13 = vpop.eup %5074 }
0x1627   :  { %v3613_v30 = vmul.f32 %v5075_v13, %v3581_v54 }
0x1628   :  { %v5077_v31 = vpop.eup %5076 }
0x1629   :  { %v3614_v58 = vmul.f32 %v5077_v31, %v3582_v43  ;;  %v3623_v27 = vmul.f32 %v3959_v34, %v3613_v30 }
0x162a   :  { %v5079_v28 = vpop.eup %5078 }
0x162b   :  { %v3615_v6 = vmul.f32 %v5079_v28, %v3583_v32  ;;  %v3624_v61 = vmul.f32 %v3959_v34, %v3614_v58  ;;  %v3633_v29 = vadd.f32 %v3960_v33, %v3623_v27 }
0x162c   :  { %v5081_v63 = vpop.eup %5080 }
0x162d   :  { %v3625_v35 = vmul.f32 %v3959_v34, %v3615_v6  ;;  %v3616_v21 = vmul.f32 %v5081_v63, %v3584_v1  ;;  %v3634_v5 = vadd.f32 %v3960_v33, %v3624_v61 }
0x162f   :  { %v3626_v46 = vmul.f32 %v3959_v34, %v3616_v21  ;;  %v3646_v4 = vpack.c.bf16 %v3634_v5, %v3633_v29  ;;  %v3635_v55 = vadd.f32 %v3960_v33, %v3625_v35 }
0x1631   :  { %4466 = vmatprep.mubr.msk.bf16.mxu1 %vm66_vm0, %v3646_v4  ;;  %v3636_v7 = vadd.f32 %v3960_v33, %v3626_v46 }
0x1633   :  { %v3647_v8 = vpack.c.bf16 %v3636_v7, %v3635_v55 }
0x1635   :  { %4467 = vmatmul.mubr.msk.bf16.vlgmr.msra.gmra.mrb[60].mxu1 %vm66_vm0, %v3647_v8 }
0x1708   :  { %v4468_v44 = vpop.f32.mrb[60].mxu1 }
0x1709   :  { %v3727_v40 = vadd.f32 %v4468_v44, %v3961_v14  ;;  %v3718_v38 = vpop.f32.mrb[61].mxu1 }
0x170a   :  { %v3719_v12 = vadd.f32 %v3961_v14, %v3718_v38  ;;  %v4469_v36 = vpop.f32.mrb[62].mxu1 }
0x170b   :  { %3735 = vst [vmem:[%s6292_s18 + $0x10] sm:$0xff] %v3727_v40  ;;  %v3730_v50 = vadd.f32 %v4469_v36, %v3961_v14  ;;  %v3721_v47 = vpop.f32.mrb[63].mxu1 }
0x170c   :  { %3733 = vst [vmem:[%s6292_s18] sm:$0xff] %v3719_v12  ;;  %v3722_v20 = vadd.f32 %v3961_v14, %v3721_v47 }
0x170d   :  { %3736 = vst [vmem:[%s6292_s18 + $0x18] sm:$0xff] %v3730_v50 }
0x170e   :  { %3734 = vst [vmem:[%s6292_s18 + $0x8] sm:$0xff] %v3722_v20 }

</bundles_post_ra>
